<compile_context>
chip_gen: v5e
topology: v5e:2x2
jax: 0.10.0
libtpu: 0.0.40
codegen_flags: <defaults>
</compile_context>

<pallas_src>
import functools

import jax
import jax.numpy as jnp
from jax import lax
from jax.experimental import pallas as pl
from jax.experimental.pallas import tpu as pltpu


def _round_up(x, m):
    return (x + m - 1) // m * m


# ---------------------------------------------------------------------------
# Per-generation VMEM budgeting
# ---------------------------------------------------------------------------
def _vmem_limit_bytes():
    """Scoped-VMEM limit: ~half of physical VMEM, capped at 64 MiB."""
    cap = None
    try:
        cap = getattr(pltpu.get_tpu_info(), "vmem_capacity_bytes", None)
    except Exception:
        cap = None
    if not cap:
        cap = 64 * 1024 * 1024          # conservative default (v7x physical)
    return int(min(cap // 2, 64 * 1024 * 1024))


# ---------------------------------------------------------------------------
# Pass 1: fused channel mean + max, lane-dense over H*W
# ---------------------------------------------------------------------------
def _make_reduce_kernel(tc, inv_c):
    def kernel(x_ref, o_ref, sum_ref, max_ref):
        # x_ref:   (TN, TC, HW)  input block (lane-dense last dim)
        # o_ref:   (TN, 2, HW)   f32 output block ([mean, max]); resident over C
        # sum_ref/max_ref: (TN, HW) f32 running accumulators (VMEM scratch)
        c_idx = pl.program_id(1)

        @pl.when(c_idx == 0)
        def _():
            sum_ref[...] = jnp.zeros_like(sum_ref)
            max_ref[...] = jnp.full_like(max_ref, -jnp.inf)

        # Statically unrolled channel chunk with 2-way split accumulators
        # (breaks the serial add/max dependence chain for the VALU).
        s0 = sum_ref[...]
        m0 = max_ref[...]
        s1 = jnp.zeros_like(s0)
        m1 = jnp.full_like(m0, -jnp.inf)
        for c in range(tc):
            xc = x_ref[:, c, :].astype(jnp.float32)
            if c % 2 == 0:
                s0 = s0 + xc
                m0 = jnp.maximum(m0, xc)
            else:
                s1 = s1 + xc
                m1 = jnp.maximum(m1, xc)
        sum_ref[...] = s0 + s1
        max_ref[...] = jnp.maximum(m0, m1)

        @pl.when(c_idx == pl.num_programs(1) - 1)
        def _():
            o_ref[:, 0, :] = sum_ref[...] * jnp.float32(inv_c)
            o_ref[:, 1, :] = max_ref[...]

    return kernel


def _choose_reduce_tiles(N, C, HW, itemsize, budget):
    """Pick (TN, TC) whose double-buffered, (8,128)-padded footprint fits."""
    hw_pad = _round_up(HW, 128)

    def footprint(tn, tc):
        in_blk = tn * _round_up(tc, 8) * hw_pad * itemsize
        out_blk = tn * 8 * hw_pad * 4            # (TN, 2, HW): 2 pads to 8
        scratch = 2 * max(tn, 8) * hw_pad * 4    # sum + max accumulators
        return 2 * in_blk + 2 * out_blk + scratch

    # Keep >= 2 parallel steps when N >= 2 so both v7x TensorCores get work.
    tn_opts = [d for d in range(min(N, 8), 0, -1)
               if N % d == 0 and not (N >= 2 and N // d < 2)]
    # Last-two block dims must be full extents or 8/128 multiples: TC is the
    # second-to-last dim, so it must equal C or be a multiple of 8.
    tc_opts = [d for d in range(min(C, 64), 0, -1)
               if C % d == 0 and (d == C or d % 8 == 0)]
    if not tc_opts:
        tc_opts = [C]
    for tn in tn_opts:
        for tc in tc_opts:
            if footprint(tn, tc) <= budget:
                return tn, tc
    return 1, tc_opts[-1]


def _channel_mean_max(xf, vmem_limit):
    """xf: (N, C, HW)  ->  (N, 2, HW) f32 with [mean, max] over C."""
    N, C, HW = xf.shape
    budget = (vmem_limit * 3) // 4
    TN, TC = _choose_reduce_tiles(N, C, HW, jnp.dtype(xf.dtype).itemsize,
                                  budget)
    return pl.pallas_call(
        _make_reduce_kernel(TC, 1.0 / C),
        out_shape=jax.ShapeDtypeStruct((N, 2, HW), jnp.float32),
        grid_spec=pltpu.PrefetchScalarGridSpec(
            num_scalar_prefetch=0,
            grid=(N // TN, C // TC),
            in_specs=[pl.BlockSpec((TN, TC, HW), lambda n, c: (n, c, 0))],
            out_specs=pl.BlockSpec((TN, 2, HW), lambda n, c: (n, 0, 0)),
            scratch_shapes=[pltpu.VMEM((TN, HW), jnp.float32),
                            pltpu.VMEM((TN, HW), jnp.float32)],
        ),
        compiler_params=pltpu.CompilerParams(
            dimension_semantics=("parallel", "arbitrary"),
            vmem_limit_bytes=vmem_limit,
        ),
    )(xf)


# ---------------------------------------------------------------------------
# Pass 2: 7x7 (or 3x3) conv over [avg, max] planes + sigmoid
# ---------------------------------------------------------------------------
def _make_conv_kernel(ksize):
    def kernel(p_ref, w_ref, o_ref):
        # p_ref: (TNB, 2, H+2P, W+2P) zero-padded [avg, max] planes (f32)
        # w_ref: (2*ksize*ksize,)     conv weights in SMEM (OIHW flattened)
        # o_ref: (TNB, H, W)
        TNB, H, W = o_ref.shape
        # 4 independent partial accumulators -> no single 196-op serial chain.
        accs = [jnp.zeros((TNB, H, W), jnp.float32) for _ in range(4)]
        t = 0
        for kh in range(ksize):
            for kw in range(ksize):
                w_avg = w_ref[kh * ksize + kw]                       # SMEM scalar
                w_max = w_ref[ksize * ksize + kh * ksize + kw]       # SMEM scalar
                a_win = p_ref[:, 0, kh:kh + H, kw:kw + W]
                m_win = p_ref[:, 1, kh:kh + H, kw:kw + W]
                accs[t & 3] = accs[t & 3] + w_avg * a_win
                accs[(t + 1) & 3] = accs[(t + 1) & 3] + w_max * m_win
                t += 2
        acc = (accs[0] + accs[1]) + (accs[2] + accs[3])
        o_ref[...] = jax.nn.sigmoid(acc).astype(o_ref.dtype)

    return kernel


def _choose_conv_tile(N, H, W, pad, in_itemsize, out_itemsize, budget):
    hp = _round_up(H + 2 * pad, 8)
    wp = _round_up(W + 2 * pad, 128)
    per_img = (2 * (2 * hp * wp * in_itemsize)                     # input (x2 buf)
               + 2 * (_round_up(H, 8) * _round_up(W, 128) * out_itemsize))
    best = 1
    for tn in range(1, min(N, 16) + 1):
        if N % tn or (N >= 2 and N // tn < 2) or tn * per_img > budget:
            continue
        best = tn
    return best


def _conv_sigmoid(planes_padded, w_flat, H, W, ksize, pad, out_dtype,
                  vmem_limit):
    N, _, Hp, Wp = planes_padded.shape
    budget = (vmem_limit * 3) // 4
    TNB = _choose_conv_tile(N, H, W, pad,
                            jnp.dtype(planes_padded.dtype).itemsize,
                            jnp.dtype(out_dtype).itemsize, budget)
    return pl.pallas_call(
        _make_conv_kernel(ksize),
        out_shape=jax.ShapeDtypeStruct((N, H, W), out_dtype),
        grid_spec=pltpu.PrefetchScalarGridSpec(
            num_scalar_prefetch=0,
            grid=(N // TNB,),
            in_specs=[
                pl.BlockSpec((TNB, 2, Hp, Wp), lambda n: (n, 0, 0, 0)),
                pl.BlockSpec(memory_space=pltpu.MemorySpace.SMEM),
            ],
            out_specs=pl.BlockSpec((TNB, H, W), lambda n: (n, 0, 0)),
        ),
        compiler_params=pltpu.CompilerParams(
            dimension_semantics=("parallel",),
            vmem_limit_bytes=vmem_limit,
        ),
    )(planes_padded, w_flat)


# ---------------------------------------------------------------------------
# Public wrapper + reference
# ---------------------------------------------------------------------------
@jax.jit
def spatial_attention(x, conv_w):
    """x: (N, C, H, W); conv_w: (1, 2, K, K) with K in {3, 7} -> (N, 1, H, W)."""
    N, C, H, W = x.shape
    ksize = conv_w.shape[-1]
    pad = 3 if ksize == 7 else 1
    vmem_limit = _vmem_limit_bytes()

    # Pass 1: lane-dense fused channel mean/max over (N, C, H*W).
    xf = x.reshape(N, C, H * W)                   # free contiguous reshape
    planes = _channel_mean_max(xf, vmem_limit)    # (N, 2, H*W) f32

    # Zero-pad the tiny plane pair in the wrapper: no in-kernel scratch/memset,
    # and every conv tap window stays inside a single 128-lane tile.
    planes2d = planes.reshape(N, 2, H, W)
    planes_padded = jnp.pad(planes2d, ((0, 0), (0, 0), (pad, pad), (pad, pad)))

    w_flat = conv_w.astype(jnp.float32).reshape(-1)   # (2*K*K,), OIHW order
    y = _conv_sigmoid(planes_padded, w_flat, H, W, ksize, pad, x.dtype,
                      vmem_limit)                     # (N, H, W)
    return y[:, None, :, :]


def spatial_attention_ref(x, conv_w):
    """Pure-JAX reference mirroring the PyTorch forward."""
    pad = 3 if conv_w.shape[-1] == 7 else 1
    avg_out = jnp.mean(x, axis=1, keepdims=True)
    max_out = jnp.max(x, axis=1, keepdims=True)
    cat = jnp.concatenate([avg_out, max_out], axis=1)       # (N, 2, H, W)
    y = lax.conv_general_dilated(
        cat, conv_w, window_strides=(1, 1),
        padding=((pad, pad), (pad, pad)),
        dimension_numbers=("NCHW", "OIHW", "NCHW"))
    return jax.nn.sigmoid(y)


if __name__ == "__main__":
    key = jax.random.PRNGKey(0)
    kx, kw = jax.random.split(key)

    N, C, H, W = 2, 4, 16, 16
    KSIZE = 7
    x = jax.random.normal(kx, (N, C, H, W), dtype=jnp.float32)
    # Deterministic synthetic weights for nn.Conv2d(2, 1, 7, padding=3, bias=False)
    conv_w = (jax.random.normal(kw, (1, 2, KSIZE, KSIZE), dtype=jnp.float32)
              * (1.0 / (2 * KSIZE * KSIZE) ** 0.5))

    out = jax.block_until_ready(spatial_attention(x, conv_w))
    ref = spatial_attention_ref(x, conv_w)

    assert out.shape == (N, 1, H, W), out.shape
    assert jnp.allclose(out, ref, atol=1e-5, rtol=1e-5), (
        float(jnp.max(jnp.abs(out - ref))))

    print("KERNEL_OK")
</pallas_src>

<mosaic_0001>
module attributes {stable_mosaic.version = 11 : i64} {
  func.func @kernel(%arg0: i32, %arg1: i32, %arg2: memref<1x4x256xf32, #tpu.memory_space<vmem>>, %arg3: memref<1x2x256xf32, #tpu.memory_space<vmem>>, %arg4: memref<1x256xf32, #tpu.memory_space<vmem>>, %arg5: memref<1x256xf32, #tpu.memory_space<vmem>>) attributes {dimension_semantics = [#tpu.dimension_semantics<parallel>, #tpu.dimension_semantics<arbitrary>], iteration_bounds = array<i64: 2, 1>, scalar_prefetch = 0 : i64, scratch_operands = 2 : i64, tpu.core_type = #tpu.core_type<tc>, window_params = [{transform_indices = @transform_0, window_bounds = array<i64: 1, 4, 256>}, {transform_indices = @transform_1, window_bounds = array<i64: 1, 2, 256>}]} {
    %c0_i32 = arith.constant 0 : i32
    %0 = arith.cmpi eq, %arg1, %c0_i32 : i32
    %1 = arith.extui %0 : i1 to i32
    %c0_i32_0 = arith.constant 0 : i32
    %2 = arith.cmpi ne, %1, %c0_i32_0 : i32
    scf.if %2 {
      %cst_20 = arith.constant 0.000000e+00 : f32
      %30 = vector.broadcast %cst_20 : f32 to vector<1x256xf32>
      %c0_21 = arith.constant 0 : index
      %c0_22 = arith.constant 0 : index
      %31 = vector.load %arg4[%c0_21, %c0_22] : memref<1x256xf32, #tpu.memory_space<vmem>>, vector<1x256xf32>
      tpu.vector_store %arg4[%c0_21, %c0_22], %30 {strides = array<i32>} : memref<1x256xf32, #tpu.memory_space<vmem>>, vector<1x256xf32>,
      %cst_23 = arith.constant 0xFF800000 : f32
      %32 = vector.broadcast %cst_23 : f32 to vector<1x256xf32>
      %c0_24 = arith.constant 0 : index
      %c0_25 = arith.constant 0 : index
      %33 = vector.load %arg5[%c0_24, %c0_25] : memref<1x256xf32, #tpu.memory_space<vmem>>, vector<1x256xf32>
      tpu.vector_store %arg5[%c0_24, %c0_25], %32 {strides = array<i32>} : memref<1x256xf32, #tpu.memory_space<vmem>>, vector<1x256xf32>,
    } else {
    }
    %c0 = arith.constant 0 : index
    %c0_1 = arith.constant 0 : index
    %3 = vector.load %arg4[%c0, %c0_1] : memref<1x256xf32, #tpu.memory_space<vmem>>, vector<1x256xf32>
    %c0_2 = arith.constant 0 : index
    %c0_3 = arith.constant 0 : index
    %4 = vector.load %arg5[%c0_2, %c0_3] : memref<1x256xf32, #tpu.memory_space<vmem>>, vector<1x256xf32>
    %cst = arith.constant 0.000000e+00 : f32
    %5 = vector.broadcast %cst : f32 to vector<1x256xf32>
    %cst_4 = arith.constant 0xFF800000 : f32
    %6 = vector.broadcast %cst_4 : f32 to vector<1x256xf32>
    %c0_5 = arith.constant 0 : index
    %c0_6 = arith.constant 0 : index
    %c0_7 = arith.constant 0 : index
    %7 = vector.load %arg2[%c0_5, %c0_6, %c0_7] : memref<1x4x256xf32, #tpu.memory_space<vmem>>, vector<1x1x256xf32>
    %8 = vector.shape_cast %7 : vector<1x1x256xf32> to vector<1x256xf32>
    %9 = arith.addf %3, %8 : vector<1x256xf32>
    %10 = arith.maximumf %4, %8 : vector<1x256xf32>
    %c0_8 = arith.constant 0 : index
    %c1 = arith.constant 1 : index
    %c0_9 = arith.constant 0 : index
    %11 = vector.load %arg2[%c0_8, %c1, %c0_9] : memref<1x4x256xf32, #tpu.memory_space<vmem>>, vector<1x1x256xf32>
    %12 = vector.shape_cast %11 : vector<1x1x256xf32> to vector<1x256xf32>
    %13 = arith.addf %5, %12 : vector<1x256xf32>
    %14 = arith.maximumf %6, %12 : vector<1x256xf32>
    %c0_10 = arith.constant 0 : index
    %c2 = arith.constant 2 : index
    %c0_11 = arith.constant 0 : index
    %15 = vector.load %arg2[%c0_10, %c2, %c0_11] : memref<1x4x256xf32, #tpu.memory_space<vmem>>, vector<1x1x256xf32>
    %16 = vector.shape_cast %15 : vector<1x1x256xf32> to vector<1x256xf32>
    %17 = arith.addf %9, %16 : vector<1x256xf32>
    %18 = arith.maximumf %10, %16 : vector<1x256xf32>
    %c0_12 = arith.constant 0 : index
    %c3 = arith.constant 3 : index
    %c0_13 = arith.constant 0 : index
    %19 = vector.load %arg2[%c0_12, %c3, %c0_13] : memref<1x4x256xf32, #tpu.memory_space<vmem>>, vector<1x1x256xf32>
    %20 = vector.shape_cast %19 : vector<1x1x256xf32> to vector<1x256xf32>
    %21 = arith.addf %13, %20 : vector<1x256xf32>
    %22 = arith.maximumf %14, %20 : vector<1x256xf32>
    %23 = arith.addf %17, %21 : vector<1x256xf32>
    %c0_14 = arith.constant 0 : index
    %c0_15 = arith.constant 0 : index
    %24 = vector.load %arg4[%c0_14, %c0_15] : memref<1x256xf32, #tpu.memory_space<vmem>>, vector<1x256xf32>
    tpu.vector_store %arg4[%c0_14, %c0_15], %23 {strides = array<i32>} : memref<1x256xf32, #tpu.memory_space<vmem>>, vector<1x256xf32>,
    %25 = arith.maximumf %18, %22 : vector<1x256xf32>
    %c0_16 = arith.constant 0 : index
    %c0_17 = arith.constant 0 : index
    %26 = vector.load %arg5[%c0_16, %c0_17] : memref<1x256xf32, #tpu.memory_space<vmem>>, vector<1x256xf32>
    tpu.vector_store %arg5[%c0_16, %c0_17], %25 {strides = array<i32>} : memref<1x256xf32, #tpu.memory_space<vmem>>, vector<1x256xf32>,
    %c0_i32_18 = arith.constant 0 : i32
    %27 = arith.cmpi eq, %arg1, %c0_i32_18 : i32
    %28 = arith.extui %27 : i1 to i32
    %c0_i32_19 = arith.constant 0 : i32
    %29 = arith.cmpi ne, %28, %c0_i32_19 : i32
    scf.if %29 {
      %c0_20 = arith.constant 0 : index
      %c0_21 = arith.constant 0 : index
      %30 = vector.load %arg4[%c0_20, %c0_21] : memref<1x256xf32, #tpu.memory_space<vmem>>, vector<1x256xf32>
      %cst_22 = arith.constant 2.500000e-01 : f32
      %31 = vector.broadcast %cst_22 : f32 to vector<1x256xf32>
      %32 = arith.mulf %30, %31 : vector<1x256xf32>
      %c0_23 = arith.constant 0 : index
      %c0_24 = arith.constant 0 : index
      %c0_25 = arith.constant 0 : index
      %33 = vector.load %arg3[%c0_23, %c0_24, %c0_25] : memref<1x2x256xf32, #tpu.memory_space<vmem>>, vector<1x1x256xf32>
      %34 = vector.shape_cast %33 : vector<1x1x256xf32> to vector<1x256xf32>
      %35 = vector.shape_cast %32 : vector<1x256xf32> to vector<1x1x256xf32>
      tpu.vector_store %arg3[%c0_23, %c0_24, %c0_25], %35 {strides = array<i32>} : memref<1x2x256xf32, #tpu.memory_space<vmem>>, vector<1x1x256xf32>,
      %c0_26 = arith.constant 0 : index
      %c0_27 = arith.constant 0 : index
      %36 = vector.load %arg5[%c0_26, %c0_27] : memref<1x256xf32, #tpu.memory_space<vmem>>, vector<1x256xf32>
      %c0_28 = arith.constant 0 : index
      %c1_29 = arith.constant 1 : index
      %c0_30 = arith.constant 0 : index
      %37 = vector.load %arg3[%c0_28, %c1_29, %c0_30] : memref<1x2x256xf32, #tpu.memory_space<vmem>>, vector<1x1x256xf32>
      %38 = vector.shape_cast %37 : vector<1x1x256xf32> to vector<1x256xf32>
      %39 = vector.shape_cast %36 : vector<1x256xf32> to vector<1x1x256xf32>
      tpu.vector_store %arg3[%c0_28, %c1_29, %c0_30], %39 {strides = array<i32>} : memref<1x2x256xf32, #tpu.memory_space<vmem>>, vector<1x1x256xf32>,
    } else {
    }
    return
  }
  func.func @transform_0(%arg0: i32, %arg1: i32) -> (i32, i32, i32) {
    %c0_i32 = arith.constant 0 : i32
    %c0_i32_0 = arith.constant 0 : i32
    return %arg0, %arg1, %c0_i32 : i32, i32, i32
  }
  func.func @transform_1(%arg0: i32, %arg1: i32) -> (i32, i32, i32) {
    %c0_i32 = arith.constant 0 : i32
    %c0_i32_0 = arith.constant 0 : i32
    %c0_i32_1 = arith.constant 0 : i32
    return %arg0, %c0_i32, %c0_i32_0 : i32, i32, i32
  }
}

module attributes {stable_mosaic.version = 11 : i64} {
  func.func @kernel(%arg0: i32, %arg1: memref<1x2x22x22xf32, #tpu.memory_space<vmem>>, %arg2: memref<98xf32, #tpu.memory_space<smem>>, %arg3: memref<1x16x16xf32, #tpu.memory_space<vmem>>) attributes {dimension_semantics = [#tpu.dimension_semantics<parallel>], iteration_bounds = array<i64: 2>, scalar_prefetch = 0 : i64, scratch_operands = 0 : i64, tpu.core_type = #tpu.core_type<tc>, window_params = [{transform_indices = @transform_0, window_bounds = array<i64: 1, 2, 22, 22>}, {transform_indices = @transform_1, window_bounds = array<i64: 98>}, {transform_indices = @transform_2, window_bounds = array<i64: 1, 16, 16>}]} {
    %cst = arith.constant 0.000000e+00 : f32
    %0 = vector.broadcast %cst : f32 to vector<1x16x16xf32>
    %cst_0 = arith.constant 0.000000e+00 : f32
    %1 = vector.broadcast %cst_0 : f32 to vector<1x16x16xf32>
    %cst_1 = arith.constant 0.000000e+00 : f32
    %2 = vector.broadcast %cst_1 : f32 to vector<1x16x16xf32>
    %cst_2 = arith.constant 0.000000e+00 : f32
    %3 = vector.broadcast %cst_2 : f32 to vector<1x16x16xf32>
    %c0 = arith.constant 0 : index
    %4 = memref.load %arg2[%c0] : memref<98xf32, #tpu.memory_space<smem>>
    %c49 = arith.constant 49 : index
    %5 = memref.load %arg2[%c49] : memref<98xf32, #tpu.memory_space<smem>>
    %c0_3 = arith.constant 0 : index
    %c0_4 = arith.constant 0 : index
    %c0_5 = arith.constant 0 : index
    %c0_6 = arith.constant 0 : index
    %6 = vector.load %arg1[%c0_3, %c0_4, %c0_5, %c0_6] : memref<1x2x22x22xf32, #tpu.memory_space<vmem>>, vector<1x1x16x16xf32>
    %7 = vector.shape_cast %6 : vector<1x1x16x16xf32> to vector<1x16x16xf32>
    %c0_7 = arith.constant 0 : index
    %c1 = arith.constant 1 : index
    %c0_8 = arith.constant 0 : index
    %c0_9 = arith.constant 0 : index
    %8 = vector.load %arg1[%c0_7, %c1, %c0_8, %c0_9] : memref<1x2x22x22xf32, #tpu.memory_space<vmem>>, vector<1x1x16x16xf32>
    %9 = vector.shape_cast %8 : vector<1x1x16x16xf32> to vector<1x16x16xf32>
    %10 = vector.broadcast %4 : f32 to vector<1x16x16xf32>
    %11 = arith.mulf %10, %7 : vector<1x16x16xf32>
    %12 = arith.addf %0, %11 : vector<1x16x16xf32>
    %13 = vector.broadcast %5 : f32 to vector<1x16x16xf32>
    %14 = arith.mulf %13, %9 : vector<1x16x16xf32>
    %15 = arith.addf %1, %14 : vector<1x16x16xf32>
    %c1_10 = arith.constant 1 : index
    %16 = memref.load %arg2[%c1_10] : memref<98xf32, #tpu.memory_space<smem>>
    %c50 = arith.constant 50 : index
    %17 = memref.load %arg2[%c50] : memref<98xf32, #tpu.memory_space<smem>>
    %c0_11 = arith.constant 0 : index
    %c0_12 = arith.constant 0 : index
    %c0_13 = arith.constant 0 : index
    %c1_14 = arith.constant 1 : index
    %18 = vector.load %arg1[%c0_11, %c0_12, %c0_13, %c1_14] : memref<1x2x22x22xf32, #tpu.memory_space<vmem>>, vector<1x1x16x16xf32>
    %19 = vector.shape_cast %18 : vector<1x1x16x16xf32> to vector<1x16x16xf32>
    %c0_15 = arith.constant 0 : index
    %c1_16 = arith.constant 1 : index
    %c0_17 = arith.constant 0 : index
    %c1_18 = arith.constant 1 : index
    %20 = vector.load %arg1[%c0_15, %c1_16, %c0_17, %c1_18] : memref<1x2x22x22xf32, #tpu.memory_space<vmem>>, vector<1x1x16x16xf32>
    %21 = vector.shape_cast %20 : vector<1x1x16x16xf32> to vector<1x16x16xf32>
    %22 = vector.broadcast %16 : f32 to vector<1x16x16xf32>
    %23 = arith.mulf %22, %19 : vector<1x16x16xf32>
    %24 = arith.addf %2, %23 : vector<1x16x16xf32>
    %25 = vector.broadcast %17 : f32 to vector<1x16x16xf32>
    %26 = arith.mulf %25, %21 : vector<1x16x16xf32>
    %27 = arith.addf %3, %26 : vector<1x16x16xf32>
    %c2 = arith.constant 2 : index
    %28 = memref.load %arg2[%c2] : memref<98xf32, #tpu.memory_space<smem>>
    %c51 = arith.constant 51 : index
    %29 = memref.load %arg2[%c51] : memref<98xf32, #tpu.memory_space<smem>>
    %c0_19 = arith.constant 0 : index
    %c0_20 = arith.constant 0 : index
    %c0_21 = arith.constant 0 : index
    %c2_22 = arith.constant 2 : index
    %30 = vector.load %arg1[%c0_19, %c0_20, %c0_21, %c2_22] : memref<1x2x22x22xf32, #tpu.memory_space<vmem>>, vector<1x1x16x16xf32>
    %31 = vector.shape_cast %30 : vector<1x1x16x16xf32> to vector<1x16x16xf32>
    %c0_23 = arith.constant 0 : index
    %c1_24 = arith.constant 1 : index
    %c0_25 = arith.constant 0 : index
    %c2_26 = arith.constant 2 : index
    %32 = vector.load %arg1[%c0_23, %c1_24, %c0_25, %c2_26] : memref<1x2x22x22xf32, #tpu.memory_space<vmem>>, vector<1x1x16x16xf32>
    %33 = vector.shape_cast %32 : vector<1x1x16x16xf32> to vector<1x16x16xf32>
    %34 = vector.broadcast %28 : f32 to vector<1x16x16xf32>
    %35 = arith.mulf %34, %31 : vector<1x16x16xf32>
    %36 = arith.addf %12, %35 : vector<1x16x16xf32>
    %37 = vector.broadcast %29 : f32 to vector<1x16x16xf32>
    %38 = arith.mulf %37, %33 : vector<1x16x16xf32>
    %39 = arith.addf %15, %38 : vector<1x16x16xf32>
    %c3 = arith.constant 3 : index
    %40 = memref.load %arg2[%c3] : memref<98xf32, #tpu.memory_space<smem>>
    %c52 = arith.constant 52 : index
    %41 = memref.load %arg2[%c52] : memref<98xf32, #tpu.memory_space<smem>>
    %c0_27 = arith.constant 0 : index
    %c0_28 = arith.constant 0 : index
    %c0_29 = arith.constant 0 : index
    %c3_30 = arith.constant 3 : index
    %42 = vector.load %arg1[%c0_27, %c0_28, %c0_29, %c3_30] : memref<1x2x22x22xf32, #tpu.memory_space<vmem>>, vector<1x1x16x16xf32>
    %43 = vector.shape_cast %42 : vector<1x1x16x16xf32> to vector<1x16x16xf32>
    %c0_31 = arith.constant 0 : index
    %c1_32 = arith.constant 1 : index
    %c0_33 = arith.constant 0 : index
    %c3_34 = arith.constant 3 : index
    %44 = vector.load %arg1[%c0_31, %c1_32, %c0_33, %c3_34] : memref<1x2x22x22xf32, #tpu.memory_space<vmem>>, vector<1x1x16x16xf32>
    %45 = vector.shape_cast %44 : vector<1x1x16x16xf32> to vector<1x16x16xf32>
    %46 = vector.broadcast %40 : f32 to vector<1x16x16xf32>
    %47 = arith.mulf %46, %43 : vector<1x16x16xf32>
    %48 = arith.addf %24, %47 : vector<1x16x16xf32>
    %49 = vector.broadcast %41 : f32 to vector<1x16x16xf32>
    %50 = arith.mulf %49, %45 : vector<1x16x16xf32>
    %51 = arith.addf %27, %50 : vector<1x16x16xf32>
    %c4 = arith.constant 4 : index
    %52 = memref.load %arg2[%c4] : memref<98xf32, #tpu.memory_space<smem>>
    %c53 = arith.constant 53 : index
    %53 = memref.load %arg2[%c53] : memref<98xf32, #tpu.memory_space<smem>>
    %c0_35 = arith.constant 0 : index
    %c0_36 = arith.constant 0 : index
    %c0_37 = arith.constant 0 : index
    %c4_38 = arith.constant 4 : index
    %54 = vector.load %arg1[%c0_35, %c0_36, %c0_37, %c4_38] : memref<1x2x22x22xf32, #tpu.memory_space<vmem>>, vector<1x1x16x16xf32>
    %55 = vector.shape_cast %54 : vector<1x1x16x16xf32> to vector<1x16x16xf32>
    %c0_39 = arith.constant 0 : index
    %c1_40 = arith.constant 1 : index
    %c0_41 = arith.constant 0 : index
    %c4_42 = arith.constant 4 : index
    %56 = vector.load %arg1[%c0_39, %c1_40, %c0_41, %c4_42] : memref<1x2x22x22xf32, #tpu.memory_space<vmem>>, vector<1x1x16x16xf32>
    %57 = vector.shape_cast %56 : vector<1x1x16x16xf32> to vector<1x16x16xf32>
    %58 = vector.broadcast %52 : f32 to vector<1x16x16xf32>
    %59 = arith.mulf %58, %55 : vector<1x16x16xf32>
    %60 = arith.addf %36, %59 : vector<1x16x16xf32>
    %61 = vector.broadcast %53 : f32 to vector<1x16x16xf32>
    %62 = arith.mulf %61, %57 : vector<1x16x16xf32>
    %63 = arith.addf %39, %62 : vector<1x16x16xf32>
    %c5 = arith.constant 5 : index
    %64 = memref.load %arg2[%c5] : memref<98xf32, #tpu.memory_space<smem>>
    %c54 = arith.constant 54 : index
    %65 = memref.load %arg2[%c54] : memref<98xf32, #tpu.memory_space<smem>>
    %c0_43 = arith.constant 0 : index
    %c0_44 = arith.constant 0 : index
    %c0_45 = arith.constant 0 : index
    %c5_46 = arith.constant 5 : index
    %66 = vector.load %arg1[%c0_43, %c0_44, %c0_45, %c5_46] : memref<1x2x22x22xf32, #tpu.memory_space<vmem>>, vector<1x1x16x16xf32>
    %67 = vector.shape_cast %66 : vector<1x1x16x16xf32> to vector<1x16x16xf32>
    %c0_47 = arith.constant 0 : index
    %c1_48 = arith.constant 1 : index
    %c0_49 = arith.constant 0 : index
    %c5_50 = arith.constant 5 : index
    %68 = vector.load %arg1[%c0_47, %c1_48, %c0_49, %c5_50] : memref<1x2x22x22xf32, #tpu.memory_space<vmem>>, vector<1x1x16x16xf32>
    %69 = vector.shape_cast %68 : vector<1x1x16x16xf32> to vector<1x16x16xf32>
    %70 = vector.broadcast %64 : f32 to vector<1x16x16xf32>
    %71 = arith.mulf %70, %67 : vector<1x16x16xf32>
    %72 = arith.addf %48, %71 : vector<1x16x16xf32>
    %73 = vector.broadcast %65 : f32 to vector<1x16x16xf32>
    %74 = arith.mulf %73, %69 : vector<1x16x16xf32>
    %75 = arith.addf %51, %74 : vector<1x16x16xf32>
    %c6 = arith.constant 6 : index
    %76 = memref.load %arg2[%c6] : memref<98xf32, #tpu.memory_space<smem>>
    %c55 = arith.constant 55 : index
    %77 = memref.load %arg2[%c55] : memref<98xf32, #tpu.memory_space<smem>>
    %c0_51 = arith.constant 0 : index
    %c0_52 = arith.constant 0 : index
    %c0_53 = arith.constant 0 : index
    %c6_54 = arith.constant 6 : index
    %78 = vector.load %arg1[%c0_51, %c0_52, %c0_53, %c6_54] : memref<1x2x22x22xf32, #tpu.memory_space<vmem>>, vector<1x1x16x16xf32>
    %79 = vector.shape_cast %78 : vector<1x1x16x16xf32> to vector<1x16x16xf32>
    %c0_55 = arith.constant 0 : index
    %c1_56 = arith.constant 1 : index
    %c0_57 = arith.constant 0 : index
    %c6_58 = arith.constant 6 : index
    %80 = vector.load %arg1[%c0_55, %c1_56, %c0_57, %c6_58] : memref<1x2x22x22xf32, #tpu.memory_space<vmem>>, vector<1x1x16x16xf32>
    %81 = vector.shape_cast %80 : vector<1x1x16x16xf32> to vector<1x16x16xf32>
    %82 = vector.broadcast %76 : f32 to vector<1x16x16xf32>
    %83 = arith.mulf %82, %79 : vector<1x16x16xf32>
    %84 = arith.addf %60, %83 : vector<1x16x16xf32>
    %85 = vector.broadcast %77 : f32 to vector<1x16x16xf32>
    %86 = arith.mulf %85, %81 : vector<1x16x16xf32>
    %87 = arith.addf %63, %86 : vector<1x16x16xf32>
    %c7 = arith.constant 7 : index
    %88 = memref.load %arg2[%c7] : memref<98xf32, #tpu.memory_space<smem>>
    %c56 = arith.constant 56 : index
    %89 = memref.load %arg2[%c56] : memref<98xf32, #tpu.memory_space<smem>>
    %c0_59 = arith.constant 0 : index
    %c0_60 = arith.constant 0 : index
    %c1_61 = arith.constant 1 : index
    %c0_62 = arith.constant 0 : index
    %90 = vector.load %arg1[%c0_59, %c0_60, %c1_61, %c0_62] : memref<1x2x22x22xf32, #tpu.memory_space<vmem>>, vector<1x1x16x16xf32>
    %91 = vector.shape_cast %90 : vector<1x1x16x16xf32> to vector<1x16x16xf32>
    %c0_63 = arith.constant 0 : index
    %c1_64 = arith.constant 1 : index
    %c1_65 = arith.constant 1 : index
    %c0_66 = arith.constant 0 : index
    %92 = vector.load %arg1[%c0_63, %c1_64, %c1_65, %c0_66] : memref<1x2x22x22xf32, #tpu.memory_space<vmem>>, vector<1x1x16x16xf32>
    %93 = vector.shape_cast %92 : vector<1x1x16x16xf32> to vector<1x16x16xf32>
    %94 = vector.broadcast %88 : f32 to vector<1x16x16xf32>
    %95 = arith.mulf %94, %91 : vector<1x16x16xf32>
    %96 = arith.addf %72, %95 : vector<1x16x16xf32>
    %97 = vector.broadcast %89 : f32 to vector<1x16x16xf32>
    %98 = arith.mulf %97, %93 : vector<1x16x16xf32>
    %99 = arith.addf %75, %98 : vector<1x16x16xf32>
    %c8 = arith.constant 8 : index
    %100 = memref.load %arg2[%c8] : memref<98xf32, #tpu.memory_space<smem>>
    %c57 = arith.constant 57 : index
    %101 = memref.load %arg2[%c57] : memref<98xf32, #tpu.memory_space<smem>>
    %c0_67 = arith.constant 0 : index
    %c0_68 = arith.constant 0 : index
    %c1_69 = arith.constant 1 : index
    %c1_70 = arith.constant 1 : index
    %102 = vector.load %arg1[%c0_67, %c0_68, %c1_69, %c1_70] : memref<1x2x22x22xf32, #tpu.memory_space<vmem>>, vector<1x1x16x16xf32>
    %103 = vector.shape_cast %102 : vector<1x1x16x16xf32> to vector<1x16x16xf32>
    %c0_71 = arith.constant 0 : index
    %c1_72 = arith.constant 1 : index
    %c1_73 = arith.constant 1 : index
    %c1_74 = arith.constant 1 : index
    %104 = vector.load %arg1[%c0_71, %c1_72, %c1_73, %c1_74] : memref<1x2x22x22xf32, #tpu.memory_space<vmem>>, vector<1x1x16x16xf32>
    %105 = vector.shape_cast %104 : vector<1x1x16x16xf32> to vector<1x16x16xf32>
    %106 = vector.broadcast %100 : f32 to vector<1x16x16xf32>
    %107 = arith.mulf %106, %103 : vector<1x16x16xf32>
    %108 = arith.addf %84, %107 : vector<1x16x16xf32>
    %109 = vector.broadcast %101 : f32 to vector<1x16x16xf32>
    %110 = arith.mulf %109, %105 : vector<1x16x16xf32>
    %111 = arith.addf %87, %110 : vector<1x16x16xf32>
    %c9 = arith.constant 9 : index
    %112 = memref.load %arg2[%c9] : memref<98xf32, #tpu.memory_space<smem>>
    %c58 = arith.constant 58 : index
    %113 = memref.load %arg2[%c58] : memref<98xf32, #tpu.memory_space<smem>>
    %c0_75 = arith.constant 0 : index
    %c0_76 = arith.constant 0 : index
    %c1_77 = arith.constant 1 : index
    %c2_78 = arith.constant 2 : index
    %114 = vector.load %arg1[%c0_75, %c0_76, %c1_77, %c2_78] : memref<1x2x22x22xf32, #tpu.memory_space<vmem>>, vector<1x1x16x16xf32>
    %115 = vector.shape_cast %114 : vector<1x1x16x16xf32> to vector<1x16x16xf32>
    %c0_79 = arith.constant 0 : index
    %c1_80 = arith.constant 1 : index
    %c1_81 = arith.constant 1 : index
    %c2_82 = arith.constant 2 : index
    %116 = vector.load %arg1[%c0_79, %c1_80, %c1_81, %c2_82] : memref<1x2x22x22xf32, #tpu.memory_space<vmem>>, vector<1x1x16x16xf32>
    %117 = vector.shape_cast %116 : vector<1x1x16x16xf32> to vector<1x16x16xf32>
    %118 = vector.broadcast %112 : f32 to vector<1x16x16xf32>
    %119 = arith.mulf %118, %115 : vector<1x16x16xf32>
    %120 = arith.addf %96, %119 : vector<1x16x16xf32>
    %121 = vector.broadcast %113 : f32 to vector<1x16x16xf32>
    %122 = arith.mulf %121, %117 : vector<1x16x16xf32>
    %123 = arith.addf %99, %122 : vector<1x16x16xf32>
    %c10 = arith.constant 10 : index
    %124 = memref.load %arg2[%c10] : memref<98xf32, #tpu.memory_space<smem>>
    %c59 = arith.constant 59 : index
    %125 = memref.load %arg2[%c59] : memref<98xf32, #tpu.memory_space<smem>>
    %c0_83 = arith.constant 0 : index
    %c0_84 = arith.constant 0 : index
    %c1_85 = arith.constant 1 : index
    %c3_86 = arith.constant 3 : index
    %126 = vector.load %arg1[%c0_83, %c0_84, %c1_85, %c3_86] : memref<1x2x22x22xf32, #tpu.memory_space<vmem>>, vector<1x1x16x16xf32>
    %127 = vector.shape_cast %126 : vector<1x1x16x16xf32> to vector<1x16x16xf32>
    %c0_87 = arith.constant 0 : index
    %c1_88 = arith.constant 1 : index
    %c1_89 = arith.constant 1 : index
    %c3_90 = arith.constant 3 : index
    %128 = vector.load %arg1[%c0_87, %c1_88, %c1_89, %c3_90] : memref<1x2x22x22xf32, #tpu.memory_space<vmem>>, vector<1x1x16x16xf32>
    %129 = vector.shape_cast %128 : vector<1x1x16x16xf32> to vector<1x16x16xf32>
    %130 = vector.broadcast %124 : f32 to vector<1x16x16xf32>
    %131 = arith.mulf %130, %127 : vector<1x16x16xf32>
    %132 = arith.addf %108, %131 : vector<1x16x16xf32>
    %133 = vector.broadcast %125 : f32 to vector<1x16x16xf32>
    %134 = arith.mulf %133, %129 : vector<1x16x16xf32>
    %135 = arith.addf %111, %134 : vector<1x16x16xf32>
    %c11 = arith.constant 11 : index
    %136 = memref.load %arg2[%c11] : memref<98xf32, #tpu.memory_space<smem>>
    %c60 = arith.constant 60 : index
    %137 = memref.load %arg2[%c60] : memref<98xf32, #tpu.memory_space<smem>>
    %c0_91 = arith.constant 0 : index
    %c0_92 = arith.constant 0 : index
    %c1_93 = arith.constant 1 : index
    %c4_94 = arith.constant 4 : index
    %138 = vector.load %arg1[%c0_91, %c0_92, %c1_93, %c4_94] : memref<1x2x22x22xf32, #tpu.memory_space<vmem>>, vector<1x1x16x16xf32>
    %139 = vector.shape_cast %138 : vector<1x1x16x16xf32> to vector<1x16x16xf32>
    %c0_95 = arith.constant 0 : index
    %c1_96 = arith.constant 1 : index
    %c1_97 = arith.constant 1 : index
    %c4_98 = arith.constant 4 : index
    %140 = vector.load %arg1[%c0_95, %c1_96, %c1_97, %c4_98] : memref<1x2x22x22xf32, #tpu.memory_space<vmem>>, vector<1x1x16x16xf32>
    %141 = vector.shape_cast %140 : vector<1x1x16x16xf32> to vector<1x16x16xf32>
    %142 = vector.broadcast %136 : f32 to vector<1x16x16xf32>
    %143 = arith.mulf %142, %139 : vector<1x16x16xf32>
    %144 = arith.addf %120, %143 : vector<1x16x16xf32>
    %145 = vector.broadcast %137 : f32 to vector<1x16x16xf32>
    %146 = arith.mulf %145, %141 : vector<1x16x16xf32>
    %147 = arith.addf %123, %146 : vector<1x16x16xf32>
    %c12 = arith.constant 12 : index
    %148 = memref.load %arg2[%c12] : memref<98xf32, #tpu.memory_space<smem>>
    %c61 = arith.constant 61 : index
    %149 = memref.load %arg2[%c61] : memref<98xf32, #tpu.memory_space<smem>>
    %c0_99 = arith.constant 0 : index
    %c0_100 = arith.constant 0 : index
    %c1_101 = arith.constant 1 : index
    %c5_102 = arith.constant 5 : index
    %150 = vector.load %arg1[%c0_99, %c0_100, %c1_101, %c5_102] : memref<1x2x22x22xf32, #tpu.memory_space<vmem>>, vector<1x1x16x16xf32>
    %151 = vector.shape_cast %150 : vector<1x1x16x16xf32> to vector<1x16x16xf32>
    %c0_103 = arith.constant 0 : index
    %c1_104 = arith.constant 1 : index
    %c1_105 = arith.constant 1 : index
    %c5_106 = arith.constant 5 : index
    %152 = vector.load %arg1[%c0_103, %c1_104, %c1_105, %c5_106] : memref<1x2x22x22xf32, #tpu.memory_space<vmem>>, vector<1x1x16x16xf32>
    %153 = vector.shape_cast %152 : vector<1x1x16x16xf32> to vector<1x16x16xf32>
    %154 = vector.broadcast %148 : f32 to vector<1x16x16xf32>
    %155 = arith.mulf %154, %151 : vector<1x16x16xf32>
    %156 = arith.addf %132, %155 : vector<1x16x16xf32>
    %157 = vector.broadcast %149 : f32 to vector<1x16x16xf32>
    %158 = arith.mulf %157, %153 : vector<1x16x16xf32>
    %159 = arith.addf %135, %158 : vector<1x16x16xf32>
    %c13 = arith.constant 13 : index
    %160 = memref.load %arg2[%c13] : memref<98xf32, #tpu.memory_space<smem>>
    %c62 = arith.constant 62 : index
    %161 = memref.load %arg2[%c62] : memref<98xf32, #tpu.memory_space<smem>>
    %c0_107 = arith.constant 0 : index
    %c0_108 = arith.constant 0 : index
    %c1_109 = arith.constant 1 : index
    %c6_110 = arith.constant 6 : index
    %162 = vector.load %arg1[%c0_107, %c0_108, %c1_109, %c6_110] : memref<1x2x22x22xf32, #tpu.memory_space<vmem>>, vector<1x1x16x16xf32>
    %163 = vector.shape_cast %162 : vector<1x1x16x16xf32> to vector<1x16x16xf32>
    %c0_111 = arith.constant 0 : index
    %c1_112 = arith.constant 1 : index
    %c1_113 = arith.constant 1 : index
    %c6_114 = arith.constant 6 : index
    %164 = vector.load %arg1[%c0_111, %c1_112, %c1_113, %c6_114] : memref<1x2x22x22xf32, #tpu.memory_space<vmem>>, vector<1x1x16x16xf32>
    %165 = vector.shape_cast %164 : vector<1x1x16x16xf32> to vector<1x16x16xf32>
    %166 = vector.broadcast %160 : f32 to vector<1x16x16xf32>
    %167 = arith.mulf %166, %163 : vector<1x16x16xf32>
    %168 = arith.addf %144, %167 : vector<1x16x16xf32>
    %169 = vector.broadcast %161 : f32 to vector<1x16x16xf32>
    %170 = arith.mulf %169, %165 : vector<1x16x16xf32>
    %171 = arith.addf %147, %170 : vector<1x16x16xf32>
    %c14 = arith.constant 14 : index
    %172 = memref.load %arg2[%c14] : memref<98xf32, #tpu.memory_space<smem>>
    %c63 = arith.constant 63 : index
    %173 = memref.load %arg2[%c63] : memref<98xf32, #tpu.memory_space<smem>>
    %c0_115 = arith.constant 0 : index
    %c0_116 = arith.constant 0 : index
    %c2_117 = arith.constant 2 : index
    %c0_118 = arith.constant 0 : index
    %174 = vector.load %arg1[%c0_115, %c0_116, %c2_117, %c0_118] : memref<1x2x22x22xf32, #tpu.memory_space<vmem>>, vector<1x1x16x16xf32>
    %175 = vector.shape_cast %174 : vector<1x1x16x16xf32> to vector<1x16x16xf32>
    %c0_119 = arith.constant 0 : index
    %c1_120 = arith.constant 1 : index
    %c2_121 = arith.constant 2 : index
    %c0_122 = arith.constant 0 : index
    %176 = vector.load %arg1[%c0_119, %c1_120, %c2_121, %c0_122] : memref<1x2x22x22xf32, #tpu.memory_space<vmem>>, vector<1x1x16x16xf32>
    %177 = vector.shape_cast %176 : vector<1x1x16x16xf32> to vector<1x16x16xf32>
    %178 = vector.broadcast %172 : f32 to vector<1x16x16xf32>
    %179 = arith.mulf %178, %175 : vector<1x16x16xf32>
    %180 = arith.addf %156, %179 : vector<1x16x16xf32>
    %181 = vector.broadcast %173 : f32 to vector<1x16x16xf32>
    %182 = arith.mulf %181, %177 : vector<1x16x16xf32>
    %183 = arith.addf %159, %182 : vector<1x16x16xf32>
    %c15 = arith.constant 15 : index
    %184 = memref.load %arg2[%c15] : memref<98xf32, #tpu.memory_space<smem>>
    %c64 = arith.constant 64 : index
    %185 = memref.load %arg2[%c64] : memref<98xf32, #tpu.memory_space<smem>>
    %c0_123 = arith.constant 0 : index
    %c0_124 = arith.constant 0 : index
    %c2_125 = arith.constant 2 : index
    %c1_126 = arith.constant 1 : index
    %186 = vector.load %arg1[%c0_123, %c0_124, %c2_125, %c1_126] : memref<1x2x22x22xf32, #tpu.memory_space<vmem>>, vector<1x1x16x16xf32>
    %187 = vector.shape_cast %186 : vector<1x1x16x16xf32> to vector<1x16x16xf32>
    %c0_127 = arith.constant 0 : index
    %c1_128 = arith.constant 1 : index
    %c2_129 = arith.constant 2 : index
    %c1_130 = arith.constant 1 : index
    %188 = vector.load %arg1[%c0_127, %c1_128, %c2_129, %c1_130] : memref<1x2x22x22xf32, #tpu.memory_space<vmem>>, vector<1x1x16x16xf32>
    %189 = vector.shape_cast %188 : vector<1x1x16x16xf32> to vector<1x16x16xf32>
    %190 = vector.broadcast %184 : f32 to vector<1x16x16xf32>
    %191 = arith.mulf %190, %187 : vector<1x16x16xf32>
    %192 = arith.addf %168, %191 : vector<1x16x16xf32>
    %193 = vector.broadcast %185 : f32 to vector<1x16x16xf32>
    %194 = arith.mulf %193, %189 : vector<1x16x16xf32>
    %195 = arith.addf %171, %194 : vector<1x16x16xf32>
    %c16 = arith.constant 16 : index
    %196 = memref.load %arg2[%c16] : memref<98xf32, #tpu.memory_space<smem>>
    %c65 = arith.constant 65 : index
    %197 = memref.load %arg2[%c65] : memref<98xf32, #tpu.memory_space<smem>>
    %c0_131 = arith.constant 0 : index
    %c0_132 = arith.constant 0 : index
    %c2_133 = arith.constant 2 : index
    %c2_134 = arith.constant 2 : index
    %198 = vector.load %arg1[%c0_131, %c0_132, %c2_133, %c2_134] : memref<1x2x22x22xf32, #tpu.memory_space<vmem>>, vector<1x1x16x16xf32>
    %199 = vector.shape_cast %198 : vector<1x1x16x16xf32> to vector<1x16x16xf32>
    %c0_135 = arith.constant 0 : index
    %c1_136 = arith.constant 1 : index
    %c2_137 = arith.constant 2 : index
    %c2_138 = arith.constant 2 : index
    %200 = vector.load %arg1[%c0_135, %c1_136, %c2_137, %c2_138] : memref<1x2x22x22xf32, #tpu.memory_space<vmem>>, vector<1x1x16x16xf32>
    %201 = vector.shape_cast %200 : vector<1x1x16x16xf32> to vector<1x16x16xf32>
    %202 = vector.broadcast %196 : f32 to vector<1x16x16xf32>
    %203 = arith.mulf %202, %199 : vector<1x16x16xf32>
    %204 = arith.addf %180, %203 : vector<1x16x16xf32>
    %205 = vector.broadcast %197 : f32 to vector<1x16x16xf32>
    %206 = arith.mulf %205, %201 : vector<1x16x16xf32>
    %207 = arith.addf %183, %206 : vector<1x16x16xf32>
    %c17 = arith.constant 17 : index
    %208 = memref.load %arg2[%c17] : memref<98xf32, #tpu.memory_space<smem>>
    %c66 = arith.constant 66 : index
    %209 = memref.load %arg2[%c66] : memref<98xf32, #tpu.memory_space<smem>>
    %c0_139 = arith.constant 0 : index
    %c0_140 = arith.constant 0 : index
    %c2_141 = arith.constant 2 : index
    %c3_142 = arith.constant 3 : index
    %210 = vector.load %arg1[%c0_139, %c0_140, %c2_141, %c3_142] : memref<1x2x22x22xf32, #tpu.memory_space<vmem>>, vector<1x1x16x16xf32>
    %211 = vector.shape_cast %210 : vector<1x1x16x16xf32> to vector<1x16x16xf32>
    %c0_143 = arith.constant 0 : index
    %c1_144 = arith.constant 1 : index
    %c2_145 = arith.constant 2 : index
    %c3_146 = arith.constant 3 : index
    %212 = vector.load %arg1[%c0_143, %c1_144, %c2_145, %c3_146] : memref<1x2x22x22xf32, #tpu.memory_space<vmem>>, vector<1x1x16x16xf32>
    %213 = vector.shape_cast %212 : vector<1x1x16x16xf32> to vector<1x16x16xf32>
    %214 = vector.broadcast %208 : f32 to vector<1x16x16xf32>
    %215 = arith.mulf %214, %211 : vector<1x16x16xf32>
    %216 = arith.addf %192, %215 : vector<1x16x16xf32>
    %217 = vector.broadcast %209 : f32 to vector<1x16x16xf32>
    %218 = arith.mulf %217, %213 : vector<1x16x16xf32>
    %219 = arith.addf %195, %218 : vector<1x16x16xf32>
    %c18 = arith.constant 18 : index
    %220 = memref.load %arg2[%c18] : memref<98xf32, #tpu.memory_space<smem>>
    %c67 = arith.constant 67 : index
    %221 = memref.load %arg2[%c67] : memref<98xf32, #tpu.memory_space<smem>>
    %c0_147 = arith.constant 0 : index
    %c0_148 = arith.constant 0 : index
    %c2_149 = arith.constant 2 : index
    %c4_150 = arith.constant 4 : index
    %222 = vector.load %arg1[%c0_147, %c0_148, %c2_149, %c4_150] : memref<1x2x22x22xf32, #tpu.memory_space<vmem>>, vector<1x1x16x16xf32>
    %223 = vector.shape_cast %222 : vector<1x1x16x16xf32> to vector<1x16x16xf32>
    %c0_151 = arith.constant 0 : index
    %c1_152 = arith.constant 1 : index
    %c2_153 = arith.constant 2 : index
    %c4_154 = arith.constant 4 : index
    %224 = vector.load %arg1[%c0_151, %c1_152, %c2_153, %c4_154] : memref<1x2x22x22xf32, #tpu.memory_space<vmem>>, vector<1x1x16x16xf32>
    %225 = vector.shape_cast %224 : vector<1x1x16x16xf32> to vector<1x16x16xf32>
    %226 = vector.broadcast %220 : f32 to vector<1x16x16xf32>
    %227 = arith.mulf %226, %223 : vector<1x16x16xf32>
    %228 = arith.addf %204, %227 : vector<1x16x16xf32>
    %229 = vector.broadcast %221 : f32 to vector<1x16x16xf32>
    %230 = arith.mulf %229, %225 : vector<1x16x16xf32>
    %231 = arith.addf %207, %230 : vector<1x16x16xf32>
    %c19 = arith.constant 19 : index
    %232 = memref.load %arg2[%c19] : memref<98xf32, #tpu.memory_space<smem>>
    %c68 = arith.constant 68 : index
    %233 = memref.load %arg2[%c68] : memref<98xf32, #tpu.memory_space<smem>>
    %c0_155 = arith.constant 0 : index
    %c0_156 = arith.constant 0 : index
    %c2_157 = arith.constant 2 : index
    %c5_158 = arith.constant 5 : index
    %234 = vector.load %arg1[%c0_155, %c0_156, %c2_157, %c5_158] : memref<1x2x22x22xf32, #tpu.memory_space<vmem>>, vector<1x1x16x16xf32>
    %235 = vector.shape_cast %234 : vector<1x1x16x16xf32> to vector<1x16x16xf32>
    %c0_159 = arith.constant 0 : index
    %c1_160 = arith.constant 1 : index
    %c2_161 = arith.constant 2 : index
    %c5_162 = arith.constant 5 : index
    %236 = vector.load %arg1[%c0_159, %c1_160, %c2_161, %c5_162] : memref<1x2x22x22xf32, #tpu.memory_space<vmem>>, vector<1x1x16x16xf32>
    %237 = vector.shape_cast %236 : vector<1x1x16x16xf32> to vector<1x16x16xf32>
    %238 = vector.broadcast %232 : f32 to vector<1x16x16xf32>
    %239 = arith.mulf %238, %235 : vector<1x16x16xf32>
    %240 = arith.addf %216, %239 : vector<1x16x16xf32>
    %241 = vector.broadcast %233 : f32 to vector<1x16x16xf32>
    %242 = arith.mulf %241, %237 : vector<1x16x16xf32>
    %243 = arith.addf %219, %242 : vector<1x16x16xf32>
    %c20 = arith.constant 20 : index
    %244 = memref.load %arg2[%c20] : memref<98xf32, #tpu.memory_space<smem>>
    %c69 = arith.constant 69 : index
    %245 = memref.load %arg2[%c69] : memref<98xf32, #tpu.memory_space<smem>>
    %c0_163 = arith.constant 0 : index
    %c0_164 = arith.constant 0 : index
    %c2_165 = arith.constant 2 : index
    %c6_166 = arith.constant 6 : index
    %246 = vector.load %arg1[%c0_163, %c0_164, %c2_165, %c6_166] : memref<1x2x22x22xf32, #tpu.memory_space<vmem>>, vector<1x1x16x16xf32>
    %247 = vector.shape_cast %246 : vector<1x1x16x16xf32> to vector<1x16x16xf32>
    %c0_167 = arith.constant 0 : index
    %c1_168 = arith.constant 1 : index
    %c2_169 = arith.constant 2 : index
    %c6_170 = arith.constant 6 : index
    %248 = vector.load %arg1[%c0_167, %c1_168, %c2_169, %c6_170] : memref<1x2x22x22xf32, #tpu.memory_space<vmem>>, vector<1x1x16x16xf32>
    %249 = vector.shape_cast %248 : vector<1x1x16x16xf32> to vector<1x16x16xf32>
    %250 = vector.broadcast %244 : f32 to vector<1x16x16xf32>
    %251 = arith.mulf %250, %247 : vector<1x16x16xf32>
    %252 = arith.addf %228, %251 : vector<1x16x16xf32>
    %253 = vector.broadcast %245 : f32 to vector<1x16x16xf32>
    %254 = arith.mulf %253, %249 : vector<1x16x16xf32>
    %255 = arith.addf %231, %254 : vector<1x16x16xf32>
    %c21 = arith.constant 21 : index
    %256 = memref.load %arg2[%c21] : memref<98xf32, #tpu.memory_space<smem>>
    %c70 = arith.constant 70 : index
    %257 = memref.load %arg2[%c70] : memref<98xf32, #tpu.memory_space<smem>>
    %c0_171 = arith.constant 0 : index
    %c0_172 = arith.constant 0 : index
    %c3_173 = arith.constant 3 : index
    %c0_174 = arith.constant 0 : index
    %258 = vector.load %arg1[%c0_171, %c0_172, %c3_173, %c0_174] : memref<1x2x22x22xf32, #tpu.memory_space<vmem>>, vector<1x1x16x16xf32>
    %259 = vector.shape_cast %258 : vector<1x1x16x16xf32> to vector<1x16x16xf32>
    %c0_175 = arith.constant 0 : index
    %c1_176 = arith.constant 1 : index
    %c3_177 = arith.constant 3 : index
    %c0_178 = arith.constant 0 : index
    %260 = vector.load %arg1[%c0_175, %c1_176, %c3_177, %c0_178] : memref<1x2x22x22xf32, #tpu.memory_space<vmem>>, vector<1x1x16x16xf32>
    %261 = vector.shape_cast %260 : vector<1x1x16x16xf32> to vector<1x16x16xf32>
    %262 = vector.broadcast %256 : f32 to vector<1x16x16xf32>
    %263 = arith.mulf %262, %259 : vector<1x16x16xf32>
    %264 = arith.addf %240, %263 : vector<1x16x16xf32>
    %265 = vector.broadcast %257 : f32 to vector<1x16x16xf32>
    %266 = arith.mulf %265, %261 : vector<1x16x16xf32>
    %267 = arith.addf %243, %266 : vector<1x16x16xf32>
    %c22 = arith.constant 22 : index
    %268 = memref.load %arg2[%c22] : memref<98xf32, #tpu.memory_space<smem>>
    %c71 = arith.constant 71 : index
    %269 = memref.load %arg2[%c71] : memref<98xf32, #tpu.memory_space<smem>>
    %c0_179 = arith.constant 0 : index
    %c0_180 = arith.constant 0 : index
    %c3_181 = arith.constant 3 : index
    %c1_182 = arith.constant 1 : index
    %270 = vector.load %arg1[%c0_179, %c0_180, %c3_181, %c1_182] : memref<1x2x22x22xf32, #tpu.memory_space<vmem>>, vector<1x1x16x16xf32>
    %271 = vector.shape_cast %270 : vector<1x1x16x16xf32> to vector<1x16x16xf32>
    %c0_183 = arith.constant 0 : index
    %c1_184 = arith.constant 1 : index
    %c3_185 = arith.constant 3 : index
    %c1_186 = arith.constant 1 : index
    %272 = vector.load %arg1[%c0_183, %c1_184, %c3_185, %c1_186] : memref<1x2x22x22xf32, #tpu.memory_space<vmem>>, vector<1x1x16x16xf32>
    %273 = vector.shape_cast %272 : vector<1x1x16x16xf32> to vector<1x16x16xf32>
    %274 = vector.broadcast %268 : f32 to vector<1x16x16xf32>
    %275 = arith.mulf %274, %271 : vector<1x16x16xf32>
    %276 = arith.addf %252, %275 : vector<1x16x16xf32>
    %277 = vector.broadcast %269 : f32 to vector<1x16x16xf32>
    %278 = arith.mulf %277, %273 : vector<1x16x16xf32>
    %279 = arith.addf %255, %278 : vector<1x16x16xf32>
    %c23 = arith.constant 23 : index
    %280 = memref.load %arg2[%c23] : memref<98xf32, #tpu.memory_space<smem>>
    %c72 = arith.constant 72 : index
    %281 = memref.load %arg2[%c72] : memref<98xf32, #tpu.memory_space<smem>>
    %c0_187 = arith.constant 0 : index
    %c0_188 = arith.constant 0 : index
    %c3_189 = arith.constant 3 : index
    %c2_190 = arith.constant 2 : index
    %282 = vector.load %arg1[%c0_187, %c0_188, %c3_189, %c2_190] : memref<1x2x22x22xf32, #tpu.memory_space<vmem>>, vector<1x1x16x16xf32>
    %283 = vector.shape_cast %282 : vector<1x1x16x16xf32> to vector<1x16x16xf32>
    %c0_191 = arith.constant 0 : index
    %c1_192 = arith.constant 1 : index
    %c3_193 = arith.constant 3 : index
    %c2_194 = arith.constant 2 : index
    %284 = vector.load %arg1[%c0_191, %c1_192, %c3_193, %c2_194] : memref<1x2x22x22xf32, #tpu.memory_space<vmem>>, vector<1x1x16x16xf32>
    %285 = vector.shape_cast %284 : vector<1x1x16x16xf32> to vector<1x16x16xf32>
    %286 = vector.broadcast %280 : f32 to vector<1x16x16xf32>
    %287 = arith.mulf %286, %283 : vector<1x16x16xf32>
    %288 = arith.addf %264, %287 : vector<1x16x16xf32>
    %289 = vector.broadcast %281 : f32 to vector<1x16x16xf32>
    %290 = arith.mulf %289, %285 : vector<1x16x16xf32>
    %291 = arith.addf %267, %290 : vector<1x16x16xf32>
    %c24 = arith.constant 24 : index
    %292 = memref.load %arg2[%c24] : memref<98xf32, #tpu.memory_space<smem>>
    %c73 = arith.constant 73 : index
    %293 = memref.load %arg2[%c73] : memref<98xf32, #tpu.memory_space<smem>>
    %c0_195 = arith.constant 0 : index
    %c0_196 = arith.constant 0 : index
    %c3_197 = arith.constant 3 : index
    %c3_198 = arith.constant 3 : index
    %294 = vector.load %arg1[%c0_195, %c0_196, %c3_197, %c3_198] : memref<1x2x22x22xf32, #tpu.memory_space<vmem>>, vector<1x1x16x16xf32>
    %295 = vector.shape_cast %294 : vector<1x1x16x16xf32> to vector<1x16x16xf32>
    %c0_199 = arith.constant 0 : index
    %c1_200 = arith.constant 1 : index
    %c3_201 = arith.constant 3 : index
    %c3_202 = arith.constant 3 : index
    %296 = vector.load %arg1[%c0_199, %c1_200, %c3_201, %c3_202] : memref<1x2x22x22xf32, #tpu.memory_space<vmem>>, vector<1x1x16x16xf32>
    %297 = vector.shape_cast %296 : vector<1x1x16x16xf32> to vector<1x16x16xf32>
    %298 = vector.broadcast %292 : f32 to vector<1x16x16xf32>
    %299 = arith.mulf %298, %295 : vector<1x16x16xf32>
    %300 = arith.addf %276, %299 : vector<1x16x16xf32>
    %301 = vector.broadcast %293 : f32 to vector<1x16x16xf32>
    %302 = arith.mulf %301, %297 : vector<1x16x16xf32>
    %303 = arith.addf %279, %302 : vector<1x16x16xf32>
    %c25 = arith.constant 25 : index
    %304 = memref.load %arg2[%c25] : memref<98xf32, #tpu.memory_space<smem>>
    %c74 = arith.constant 74 : index
    %305 = memref.load %arg2[%c74] : memref<98xf32, #tpu.memory_space<smem>>
    %c0_203 = arith.constant 0 : index
    %c0_204 = arith.constant 0 : index
    %c3_205 = arith.constant 3 : index
    %c4_206 = arith.constant 4 : index
    %306 = vector.load %arg1[%c0_203, %c0_204, %c3_205, %c4_206] : memref<1x2x22x22xf32, #tpu.memory_space<vmem>>, vector<1x1x16x16xf32>
    %307 = vector.shape_cast %306 : vector<1x1x16x16xf32> to vector<1x16x16xf32>
    %c0_207 = arith.constant 0 : index
    %c1_208 = arith.constant 1 : index
    %c3_209 = arith.constant 3 : index
    %c4_210 = arith.constant 4 : index
    %308 = vector.load %arg1[%c0_207, %c1_208, %c3_209, %c4_210] : memref<1x2x22x22xf32, #tpu.memory_space<vmem>>, vector<1x1x16x16xf32>
    %309 = vector.shape_cast %308 : vector<1x1x16x16xf32> to vector<1x16x16xf32>
    %310 = vector.broadcast %304 : f32 to vector<1x16x16xf32>
    %311 = arith.mulf %310, %307 : vector<1x16x16xf32>
    %312 = arith.addf %288, %311 : vector<1x16x16xf32>
    %313 = vector.broadcast %305 : f32 to vector<1x16x16xf32>
    %314 = arith.mulf %313, %309 : vector<1x16x16xf32>
    %315 = arith.addf %291, %314 : vector<1x16x16xf32>
    %c26 = arith.constant 26 : index
    %316 = memref.load %arg2[%c26] : memref<98xf32, #tpu.memory_space<smem>>
    %c75 = arith.constant 75 : index
    %317 = memref.load %arg2[%c75] : memref<98xf32, #tpu.memory_space<smem>>
    %c0_211 = arith.constant 0 : index
    %c0_212 = arith.constant 0 : index
    %c3_213 = arith.constant 3 : index
    %c5_214 = arith.constant 5 : index
    %318 = vector.load %arg1[%c0_211, %c0_212, %c3_213, %c5_214] : memref<1x2x22x22xf32, #tpu.memory_space<vmem>>, vector<1x1x16x16xf32>
    %319 = vector.shape_cast %318 : vector<1x1x16x16xf32> to vector<1x16x16xf32>
    %c0_215 = arith.constant 0 : index
    %c1_216 = arith.constant 1 : index
    %c3_217 = arith.constant 3 : index
    %c5_218 = arith.constant 5 : index
    %320 = vector.load %arg1[%c0_215, %c1_216, %c3_217, %c5_218] : memref<1x2x22x22xf32, #tpu.memory_space<vmem>>, vector<1x1x16x16xf32>
    %321 = vector.shape_cast %320 : vector<1x1x16x16xf32> to vector<1x16x16xf32>
    %322 = vector.broadcast %316 : f32 to vector<1x16x16xf32>
    %323 = arith.mulf %322, %319 : vector<1x16x16xf32>
    %324 = arith.addf %300, %323 : vector<1x16x16xf32>
    %325 = vector.broadcast %317 : f32 to vector<1x16x16xf32>
    %326 = arith.mulf %325, %321 : vector<1x16x16xf32>
    %327 = arith.addf %303, %326 : vector<1x16x16xf32>
    %c27 = arith.constant 27 : index
    %328 = memref.load %arg2[%c27] : memref<98xf32, #tpu.memory_space<smem>>
    %c76 = arith.constant 76 : index
    %329 = memref.load %arg2[%c76] : memref<98xf32, #tpu.memory_space<smem>>
    %c0_219 = arith.constant 0 : index
    %c0_220 = arith.constant 0 : index
    %c3_221 = arith.constant 3 : index
    %c6_222 = arith.constant 6 : index
    %330 = vector.load %arg1[%c0_219, %c0_220, %c3_221, %c6_222] : memref<1x2x22x22xf32, #tpu.memory_space<vmem>>, vector<1x1x16x16xf32>
    %331 = vector.shape_cast %330 : vector<1x1x16x16xf32> to vector<1x16x16xf32>
    %c0_223 = arith.constant 0 : index
    %c1_224 = arith.constant 1 : index
    %c3_225 = arith.constant 3 : index
    %c6_226 = arith.constant 6 : index
    %332 = vector.load %arg1[%c0_223, %c1_224, %c3_225, %c6_226] : memref<1x2x22x22xf32, #tpu.memory_space<vmem>>, vector<1x1x16x16xf32>
    %333 = vector.shape_cast %332 : vector<1x1x16x16xf32> to vector<1x16x16xf32>
    %334 = vector.broadcast %328 : f32 to vector<1x16x16xf32>
    %335 = arith.mulf %334, %331 : vector<1x16x16xf32>
    %336 = arith.addf %312, %335 : vector<1x16x16xf32>
    %337 = vector.broadcast %329 : f32 to vector<1x16x16xf32>
    %338 = arith.mulf %337, %333 : vector<1x16x16xf32>
    %339 = arith.addf %315, %338 : vector<1x16x16xf32>
    %c28 = arith.constant 28 : index
    %340 = memref.load %arg2[%c28] : memref<98xf32, #tpu.memory_space<smem>>
    %c77 = arith.constant 77 : index
    %341 = memref.load %arg2[%c77] : memref<98xf32, #tpu.memory_space<smem>>
    %c0_227 = arith.constant 0 : index
    %c0_228 = arith.constant 0 : index
    %c4_229 = arith.constant 4 : index
    %c0_230 = arith.constant 0 : index
    %342 = vector.load %arg1[%c0_227, %c0_228, %c4_229, %c0_230] : memref<1x2x22x22xf32, #tpu.memory_space<vmem>>, vector<1x1x16x16xf32>
    %343 = vector.shape_cast %342 : vector<1x1x16x16xf32> to vector<1x16x16xf32>
    %c0_231 = arith.constant 0 : index
    %c1_232 = arith.constant 1 : index
    %c4_233 = arith.constant 4 : index
    %c0_234 = arith.constant 0 : index
    %344 = vector.load %arg1[%c0_231, %c1_232, %c4_233, %c0_234] : memref<1x2x22x22xf32, #tpu.memory_space<vmem>>, vector<1x1x16x16xf32>
    %345 = vector.shape_cast %344 : vector<1x1x16x16xf32> to vector<1x16x16xf32>
    %346 = vector.broadcast %340 : f32 to vector<1x16x16xf32>
    %347 = arith.mulf %346, %343 : vector<1x16x16xf32>
    %348 = arith.addf %324, %347 : vector<1x16x16xf32>
    %349 = vector.broadcast %341 : f32 to vector<1x16x16xf32>
    %350 = arith.mulf %349, %345 : vector<1x16x16xf32>
    %351 = arith.addf %327, %350 : vector<1x16x16xf32>
    %c29 = arith.constant 29 : index
    %352 = memref.load %arg2[%c29] : memref<98xf32, #tpu.memory_space<smem>>
    %c78 = arith.constant 78 : index
    %353 = memref.load %arg2[%c78] : memref<98xf32, #tpu.memory_space<smem>>
    %c0_235 = arith.constant 0 : index
    %c0_236 = arith.constant 0 : index
    %c4_237 = arith.constant 4 : index
    %c1_238 = arith.constant 1 : index
    %354 = vector.load %arg1[%c0_235, %c0_236, %c4_237, %c1_238] : memref<1x2x22x22xf32, #tpu.memory_space<vmem>>, vector<1x1x16x16xf32>
    %355 = vector.shape_cast %354 : vector<1x1x16x16xf32> to vector<1x16x16xf32>
    %c0_239 = arith.constant 0 : index
    %c1_240 = arith.constant 1 : index
    %c4_241 = arith.constant 4 : index
    %c1_242 = arith.constant 1 : index
    %356 = vector.load %arg1[%c0_239, %c1_240, %c4_241, %c1_242] : memref<1x2x22x22xf32, #tpu.memory_space<vmem>>, vector<1x1x16x16xf32>
    %357 = vector.shape_cast %356 : vector<1x1x16x16xf32> to vector<1x16x16xf32>
    %358 = vector.broadcast %352 : f32 to vector<1x16x16xf32>
    %359 = arith.mulf %358, %355 : vector<1x16x16xf32>
    %360 = arith.addf %336, %359 : vector<1x16x16xf32>
    %361 = vector.broadcast %353 : f32 to vector<1x16x16xf32>
    %362 = arith.mulf %361, %357 : vector<1x16x16xf32>
    %363 = arith.addf %339, %362 : vector<1x16x16xf32>
    %c30 = arith.constant 30 : index
    %364 = memref.load %arg2[%c30] : memref<98xf32, #tpu.memory_space<smem>>
    %c79 = arith.constant 79 : index
    %365 = memref.load %arg2[%c79] : memref<98xf32, #tpu.memory_space<smem>>
    %c0_243 = arith.constant 0 : index
    %c0_244 = arith.constant 0 : index
    %c4_245 = arith.constant 4 : index
    %c2_246 = arith.constant 2 : index
    %366 = vector.load %arg1[%c0_243, %c0_244, %c4_245, %c2_246] : memref<1x2x22x22xf32, #tpu.memory_space<vmem>>, vector<1x1x16x16xf32>
    %367 = vector.shape_cast %366 : vector<1x1x16x16xf32> to vector<1x16x16xf32>
    %c0_247 = arith.constant 0 : index
    %c1_248 = arith.constant 1 : index
    %c4_249 = arith.constant 4 : index
    %c2_250 = arith.constant 2 : index
    %368 = vector.load %arg1[%c0_247, %c1_248, %c4_249, %c2_250] : memref<1x2x22x22xf32, #tpu.memory_space<vmem>>, vector<1x1x16x16xf32>
    %369 = vector.shape_cast %368 : vector<1x1x16x16xf32> to vector<1x16x16xf32>
    %370 = vector.broadcast %364 : f32 to vector<1x16x16xf32>
    %371 = arith.mulf %370, %367 : vector<1x16x16xf32>
    %372 = arith.addf %348, %371 : vector<1x16x16xf32>
    %373 = vector.broadcast %365 : f32 to vector<1x16x16xf32>
    %374 = arith.mulf %373, %369 : vector<1x16x16xf32>
    %375 = arith.addf %351, %374 : vector<1x16x16xf32>
    %c31 = arith.constant 31 : index
    %376 = memref.load %arg2[%c31] : memref<98xf32, #tpu.memory_space<smem>>
    %c80 = arith.constant 80 : index
    %377 = memref.load %arg2[%c80] : memref<98xf32, #tpu.memory_space<smem>>
    %c0_251 = arith.constant 0 : index
    %c0_252 = arith.constant 0 : index
    %c4_253 = arith.constant 4 : index
    %c3_254 = arith.constant 3 : index
    %378 = vector.load %arg1[%c0_251, %c0_252, %c4_253, %c3_254] : memref<1x2x22x22xf32, #tpu.memory_space<vmem>>, vector<1x1x16x16xf32>
    %379 = vector.shape_cast %378 : vector<1x1x16x16xf32> to vector<1x16x16xf32>
    %c0_255 = arith.constant 0 : index
    %c1_256 = arith.constant 1 : index
    %c4_257 = arith.constant 4 : index
    %c3_258 = arith.constant 3 : index
    %380 = vector.load %arg1[%c0_255, %c1_256, %c4_257, %c3_258] : memref<1x2x22x22xf32, #tpu.memory_space<vmem>>, vector<1x1x16x16xf32>
    %381 = vector.shape_cast %380 : vector<1x1x16x16xf32> to vector<1x16x16xf32>
    %382 = vector.broadcast %376 : f32 to vector<1x16x16xf32>
    %383 = arith.mulf %382, %379 : vector<1x16x16xf32>
    %384 = arith.addf %360, %383 : vector<1x16x16xf32>
    %385 = vector.broadcast %377 : f32 to vector<1x16x16xf32>
    %386 = arith.mulf %385, %381 : vector<1x16x16xf32>
    %387 = arith.addf %363, %386 : vector<1x16x16xf32>
    %c32 = arith.constant 32 : index
    %388 = memref.load %arg2[%c32] : memref<98xf32, #tpu.memory_space<smem>>
    %c81 = arith.constant 81 : index
    %389 = memref.load %arg2[%c81] : memref<98xf32, #tpu.memory_space<smem>>
    %c0_259 = arith.constant 0 : index
    %c0_260 = arith.constant 0 : index
    %c4_261 = arith.constant 4 : index
    %c4_262 = arith.constant 4 : index
    %390 = vector.load %arg1[%c0_259, %c0_260, %c4_261, %c4_262] : memref<1x2x22x22xf32, #tpu.memory_space<vmem>>, vector<1x1x16x16xf32>
    %391 = vector.shape_cast %390 : vector<1x1x16x16xf32> to vector<1x16x16xf32>
    %c0_263 = arith.constant 0 : index
    %c1_264 = arith.constant 1 : index
    %c4_265 = arith.constant 4 : index
    %c4_266 = arith.constant 4 : index
    %392 = vector.load %arg1[%c0_263, %c1_264, %c4_265, %c4_266] : memref<1x2x22x22xf32, #tpu.memory_space<vmem>>, vector<1x1x16x16xf32>
    %393 = vector.shape_cast %392 : vector<1x1x16x16xf32> to vector<1x16x16xf32>
    %394 = vector.broadcast %388 : f32 to vector<1x16x16xf32>
    %395 = arith.mulf %394, %391 : vector<1x16x16xf32>
    %396 = arith.addf %372, %395 : vector<1x16x16xf32>
    %397 = vector.broadcast %389 : f32 to vector<1x16x16xf32>
    %398 = arith.mulf %397, %393 : vector<1x16x16xf32>
    %399 = arith.addf %375, %398 : vector<1x16x16xf32>
    %c33 = arith.constant 33 : index
    %400 = memref.load %arg2[%c33] : memref<98xf32, #tpu.memory_space<smem>>
    %c82 = arith.constant 82 : index
    %401 = memref.load %arg2[%c82] : memref<98xf32, #tpu.memory_space<smem>>
    %c0_267 = arith.constant 0 : index
    %c0_268 = arith.constant 0 : index
    %c4_269 = arith.constant 4 : index
    %c5_270 = arith.constant 5 : index
    %402 = vector.load %arg1[%c0_267, %c0_268, %c4_269, %c5_270] : memref<1x2x22x22xf32, #tpu.memory_space<vmem>>, vector<1x1x16x16xf32>
    %403 = vector.shape_cast %402 : vector<1x1x16x16xf32> to vector<1x16x16xf32>
    %c0_271 = arith.constant 0 : index
    %c1_272 = arith.constant 1 : index
    %c4_273 = arith.constant 4 : index
    %c5_274 = arith.constant 5 : index
    %404 = vector.load %arg1[%c0_271, %c1_272, %c4_273, %c5_274] : memref<1x2x22x22xf32, #tpu.memory_space<vmem>>, vector<1x1x16x16xf32>
    %405 = vector.shape_cast %404 : vector<1x1x16x16xf32> to vector<1x16x16xf32>
    %406 = vector.broadcast %400 : f32 to vector<1x16x16xf32>
    %407 = arith.mulf %406, %403 : vector<1x16x16xf32>
    %408 = arith.addf %384, %407 : vector<1x16x16xf32>
    %409 = vector.broadcast %401 : f32 to vector<1x16x16xf32>
    %410 = arith.mulf %409, %405 : vector<1x16x16xf32>
    %411 = arith.addf %387, %410 : vector<1x16x16xf32>
    %c34 = arith.constant 34 : index
    %412 = memref.load %arg2[%c34] : memref<98xf32, #tpu.memory_space<smem>>
    %c83 = arith.constant 83 : index
    %413 = memref.load %arg2[%c83] : memref<98xf32, #tpu.memory_space<smem>>
    %c0_275 = arith.constant 0 : index
    %c0_276 = arith.constant 0 : index
    %c4_277 = arith.constant 4 : index
    %c6_278 = arith.constant 6 : index
    %414 = vector.load %arg1[%c0_275, %c0_276, %c4_277, %c6_278] : memref<1x2x22x22xf32, #tpu.memory_space<vmem>>, vector<1x1x16x16xf32>
    %415 = vector.shape_cast %414 : vector<1x1x16x16xf32> to vector<1x16x16xf32>
    %c0_279 = arith.constant 0 : index
    %c1_280 = arith.constant 1 : index
    %c4_281 = arith.constant 4 : index
    %c6_282 = arith.constant 6 : index
    %416 = vector.load %arg1[%c0_279, %c1_280, %c4_281, %c6_282] : memref<1x2x22x22xf32, #tpu.memory_space<vmem>>, vector<1x1x16x16xf32>
    %417 = vector.shape_cast %416 : vector<1x1x16x16xf32> to vector<1x16x16xf32>
    %418 = vector.broadcast %412 : f32 to vector<1x16x16xf32>
    %419 = arith.mulf %418, %415 : vector<1x16x16xf32>
    %420 = arith.addf %396, %419 : vector<1x16x16xf32>
    %421 = vector.broadcast %413 : f32 to vector<1x16x16xf32>
    %422 = arith.mulf %421, %417 : vector<1x16x16xf32>
    %423 = arith.addf %399, %422 : vector<1x16x16xf32>
    %c35 = arith.constant 35 : index
    %424 = memref.load %arg2[%c35] : memref<98xf32, #tpu.memory_space<smem>>
    %c84 = arith.constant 84 : index
    %425 = memref.load %arg2[%c84] : memref<98xf32, #tpu.memory_space<smem>>
    %c0_283 = arith.constant 0 : index
    %c0_284 = arith.constant 0 : index
    %c5_285 = arith.constant 5 : index
    %c0_286 = arith.constant 0 : index
    %426 = vector.load %arg1[%c0_283, %c0_284, %c5_285, %c0_286] : memref<1x2x22x22xf32, #tpu.memory_space<vmem>>, vector<1x1x16x16xf32>
    %427 = vector.shape_cast %426 : vector<1x1x16x16xf32> to vector<1x16x16xf32>
    %c0_287 = arith.constant 0 : index
    %c1_288 = arith.constant 1 : index
    %c5_289 = arith.constant 5 : index
    %c0_290 = arith.constant 0 : index
    %428 = vector.load %arg1[%c0_287, %c1_288, %c5_289, %c0_290] : memref<1x2x22x22xf32, #tpu.memory_space<vmem>>, vector<1x1x16x16xf32>
    %429 = vector.shape_cast %428 : vector<1x1x16x16xf32> to vector<1x16x16xf32>
    %430 = vector.broadcast %424 : f32 to vector<1x16x16xf32>
    %431 = arith.mulf %430, %427 : vector<1x16x16xf32>
    %432 = arith.addf %408, %431 : vector<1x16x16xf32>
    %433 = vector.broadcast %425 : f32 to vector<1x16x16xf32>
    %434 = arith.mulf %433, %429 : vector<1x16x16xf32>
    %435 = arith.addf %411, %434 : vector<1x16x16xf32>
    %c36 = arith.constant 36 : index
    %436 = memref.load %arg2[%c36] : memref<98xf32, #tpu.memory_space<smem>>
    %c85 = arith.constant 85 : index
    %437 = memref.load %arg2[%c85] : memref<98xf32, #tpu.memory_space<smem>>
    %c0_291 = arith.constant 0 : index
    %c0_292 = arith.constant 0 : index
    %c5_293 = arith.constant 5 : index
    %c1_294 = arith.constant 1 : index
    %438 = vector.load %arg1[%c0_291, %c0_292, %c5_293, %c1_294] : memref<1x2x22x22xf32, #tpu.memory_space<vmem>>, vector<1x1x16x16xf32>
    %439 = vector.shape_cast %438 : vector<1x1x16x16xf32> to vector<1x16x16xf32>
    %c0_295 = arith.constant 0 : index
    %c1_296 = arith.constant 1 : index
    %c5_297 = arith.constant 5 : index
    %c1_298 = arith.constant 1 : index
    %440 = vector.load %arg1[%c0_295, %c1_296, %c5_297, %c1_298] : memref<1x2x22x22xf32, #tpu.memory_space<vmem>>, vector<1x1x16x16xf32>
    %441 = vector.shape_cast %440 : vector<1x1x16x16xf32> to vector<1x16x16xf32>
    %442 = vector.broadcast %436 : f32 to vector<1x16x16xf32>
    %443 = arith.mulf %442, %439 : vector<1x16x16xf32>
    %444 = arith.addf %420, %443 : vector<1x16x16xf32>
    %445 = vector.broadcast %437 : f32 to vector<1x16x16xf32>
    %446 = arith.mulf %445, %441 : vector<1x16x16xf32>
    %447 = arith.addf %423, %446 : vector<1x16x16xf32>
    %c37 = arith.constant 37 : index
    %448 = memref.load %arg2[%c37] : memref<98xf32, #tpu.memory_space<smem>>
    %c86 = arith.constant 86 : index
    %449 = memref.load %arg2[%c86] : memref<98xf32, #tpu.memory_space<smem>>
    %c0_299 = arith.constant 0 : index
    %c0_300 = arith.constant 0 : index
    %c5_301 = arith.constant 5 : index
    %c2_302 = arith.constant 2 : index
    %450 = vector.load %arg1[%c0_299, %c0_300, %c5_301, %c2_302] : memref<1x2x22x22xf32, #tpu.memory_space<vmem>>, vector<1x1x16x16xf32>
    %451 = vector.shape_cast %450 : vector<1x1x16x16xf32> to vector<1x16x16xf32>
    %c0_303 = arith.constant 0 : index
    %c1_304 = arith.constant 1 : index
    %c5_305 = arith.constant 5 : index
    %c2_306 = arith.constant 2 : index
    %452 = vector.load %arg1[%c0_303, %c1_304, %c5_305, %c2_306] : memref<1x2x22x22xf32, #tpu.memory_space<vmem>>, vector<1x1x16x16xf32>
    %453 = vector.shape_cast %452 : vector<1x1x16x16xf32> to vector<1x16x16xf32>
    %454 = vector.broadcast %448 : f32 to vector<1x16x16xf32>
    %455 = arith.mulf %454, %451 : vector<1x16x16xf32>
    %456 = arith.addf %432, %455 : vector<1x16x16xf32>
    %457 = vector.broadcast %449 : f32 to vector<1x16x16xf32>
    %458 = arith.mulf %457, %453 : vector<1x16x16xf32>
    %459 = arith.addf %435, %458 : vector<1x16x16xf32>
    %c38 = arith.constant 38 : index
    %460 = memref.load %arg2[%c38] : memref<98xf32, #tpu.memory_space<smem>>
    %c87 = arith.constant 87 : index
    %461 = memref.load %arg2[%c87] : memref<98xf32, #tpu.memory_space<smem>>
    %c0_307 = arith.constant 0 : index
    %c0_308 = arith.constant 0 : index
    %c5_309 = arith.constant 5 : index
    %c3_310 = arith.constant 3 : index
    %462 = vector.load %arg1[%c0_307, %c0_308, %c5_309, %c3_310] : memref<1x2x22x22xf32, #tpu.memory_space<vmem>>, vector<1x1x16x16xf32>
    %463 = vector.shape_cast %462 : vector<1x1x16x16xf32> to vector<1x16x16xf32>
    %c0_311 = arith.constant 0 : index
    %c1_312 = arith.constant 1 : index
    %c5_313 = arith.constant 5 : index
    %c3_314 = arith.constant 3 : index
    %464 = vector.load %arg1[%c0_311, %c1_312, %c5_313, %c3_314] : memref<1x2x22x22xf32, #tpu.memory_space<vmem>>, vector<1x1x16x16xf32>
    %465 = vector.shape_cast %464 : vector<1x1x16x16xf32> to vector<1x16x16xf32>
    %466 = vector.broadcast %460 : f32 to vector<1x16x16xf32>
    %467 = arith.mulf %466, %463 : vector<1x16x16xf32>
    %468 = arith.addf %444, %467 : vector<1x16x16xf32>
    %469 = vector.broadcast %461 : f32 to vector<1x16x16xf32>
    %470 = arith.mulf %469, %465 : vector<1x16x16xf32>
    %471 = arith.addf %447, %470 : vector<1x16x16xf32>
    %c39 = arith.constant 39 : index
    %472 = memref.load %arg2[%c39] : memref<98xf32, #tpu.memory_space<smem>>
    %c88 = arith.constant 88 : index
    %473 = memref.load %arg2[%c88] : memref<98xf32, #tpu.memory_space<smem>>
    %c0_315 = arith.constant 0 : index
    %c0_316 = arith.constant 0 : index
    %c5_317 = arith.constant 5 : index
    %c4_318 = arith.constant 4 : index
    %474 = vector.load %arg1[%c0_315, %c0_316, %c5_317, %c4_318] : memref<1x2x22x22xf32, #tpu.memory_space<vmem>>, vector<1x1x16x16xf32>
    %475 = vector.shape_cast %474 : vector<1x1x16x16xf32> to vector<1x16x16xf32>
    %c0_319 = arith.constant 0 : index
    %c1_320 = arith.constant 1 : index
    %c5_321 = arith.constant 5 : index
    %c4_322 = arith.constant 4 : index
    %476 = vector.load %arg1[%c0_319, %c1_320, %c5_321, %c4_322] : memref<1x2x22x22xf32, #tpu.memory_space<vmem>>, vector<1x1x16x16xf32>
    %477 = vector.shape_cast %476 : vector<1x1x16x16xf32> to vector<1x16x16xf32>
    %478 = vector.broadcast %472 : f32 to vector<1x16x16xf32>
    %479 = arith.mulf %478, %475 : vector<1x16x16xf32>
    %480 = arith.addf %456, %479 : vector<1x16x16xf32>
    %481 = vector.broadcast %473 : f32 to vector<1x16x16xf32>
    %482 = arith.mulf %481, %477 : vector<1x16x16xf32>
    %483 = arith.addf %459, %482 : vector<1x16x16xf32>
    %c40 = arith.constant 40 : index
    %484 = memref.load %arg2[%c40] : memref<98xf32, #tpu.memory_space<smem>>
    %c89 = arith.constant 89 : index
    %485 = memref.load %arg2[%c89] : memref<98xf32, #tpu.memory_space<smem>>
    %c0_323 = arith.constant 0 : index
    %c0_324 = arith.constant 0 : index
    %c5_325 = arith.constant 5 : index
    %c5_326 = arith.constant 5 : index
    %486 = vector.load %arg1[%c0_323, %c0_324, %c5_325, %c5_326] : memref<1x2x22x22xf32, #tpu.memory_space<vmem>>, vector<1x1x16x16xf32>
    %487 = vector.shape_cast %486 : vector<1x1x16x16xf32> to vector<1x16x16xf32>
    %c0_327 = arith.constant 0 : index
    %c1_328 = arith.constant 1 : index
    %c5_329 = arith.constant 5 : index
    %c5_330 = arith.constant 5 : index
    %488 = vector.load %arg1[%c0_327, %c1_328, %c5_329, %c5_330] : memref<1x2x22x22xf32, #tpu.memory_space<vmem>>, vector<1x1x16x16xf32>
    %489 = vector.shape_cast %488 : vector<1x1x16x16xf32> to vector<1x16x16xf32>
    %490 = vector.broadcast %484 : f32 to vector<1x16x16xf32>
    %491 = arith.mulf %490, %487 : vector<1x16x16xf32>
    %492 = arith.addf %468, %491 : vector<1x16x16xf32>
    %493 = vector.broadcast %485 : f32 to vector<1x16x16xf32>
    %494 = arith.mulf %493, %489 : vector<1x16x16xf32>
    %495 = arith.addf %471, %494 : vector<1x16x16xf32>
    %c41 = arith.constant 41 : index
    %496 = memref.load %arg2[%c41] : memref<98xf32, #tpu.memory_space<smem>>
    %c90 = arith.constant 90 : index
    %497 = memref.load %arg2[%c90] : memref<98xf32, #tpu.memory_space<smem>>
    %c0_331 = arith.constant 0 : index
    %c0_332 = arith.constant 0 : index
    %c5_333 = arith.constant 5 : index
    %c6_334 = arith.constant 6 : index
    %498 = vector.load %arg1[%c0_331, %c0_332, %c5_333, %c6_334] : memref<1x2x22x22xf32, #tpu.memory_space<vmem>>, vector<1x1x16x16xf32>
    %499 = vector.shape_cast %498 : vector<1x1x16x16xf32> to vector<1x16x16xf32>
    %c0_335 = arith.constant 0 : index
    %c1_336 = arith.constant 1 : index
    %c5_337 = arith.constant 5 : index
    %c6_338 = arith.constant 6 : index
    %500 = vector.load %arg1[%c0_335, %c1_336, %c5_337, %c6_338] : memref<1x2x22x22xf32, #tpu.memory_space<vmem>>, vector<1x1x16x16xf32>
    %501 = vector.shape_cast %500 : vector<1x1x16x16xf32> to vector<1x16x16xf32>
    %502 = vector.broadcast %496 : f32 to vector<1x16x16xf32>
    %503 = arith.mulf %502, %499 : vector<1x16x16xf32>
    %504 = arith.addf %480, %503 : vector<1x16x16xf32>
    %505 = vector.broadcast %497 : f32 to vector<1x16x16xf32>
    %506 = arith.mulf %505, %501 : vector<1x16x16xf32>
    %507 = arith.addf %483, %506 : vector<1x16x16xf32>
    %c42 = arith.constant 42 : index
    %508 = memref.load %arg2[%c42] : memref<98xf32, #tpu.memory_space<smem>>
    %c91 = arith.constant 91 : index
    %509 = memref.load %arg2[%c91] : memref<98xf32, #tpu.memory_space<smem>>
    %c0_339 = arith.constant 0 : index
    %c0_340 = arith.constant 0 : index
    %c6_341 = arith.constant 6 : index
    %c0_342 = arith.constant 0 : index
    %510 = vector.load %arg1[%c0_339, %c0_340, %c6_341, %c0_342] : memref<1x2x22x22xf32, #tpu.memory_space<vmem>>, vector<1x1x16x16xf32>
    %511 = vector.shape_cast %510 : vector<1x1x16x16xf32> to vector<1x16x16xf32>
    %c0_343 = arith.constant 0 : index
    %c1_344 = arith.constant 1 : index
    %c6_345 = arith.constant 6 : index
    %c0_346 = arith.constant 0 : index
    %512 = vector.load %arg1[%c0_343, %c1_344, %c6_345, %c0_346] : memref<1x2x22x22xf32, #tpu.memory_space<vmem>>, vector<1x1x16x16xf32>
    %513 = vector.shape_cast %512 : vector<1x1x16x16xf32> to vector<1x16x16xf32>
    %514 = vector.broadcast %508 : f32 to vector<1x16x16xf32>
    %515 = arith.mulf %514, %511 : vector<1x16x16xf32>
    %516 = arith.addf %492, %515 : vector<1x16x16xf32>
    %517 = vector.broadcast %509 : f32 to vector<1x16x16xf32>
    %518 = arith.mulf %517, %513 : vector<1x16x16xf32>
    %519 = arith.addf %495, %518 : vector<1x16x16xf32>
    %c43 = arith.constant 43 : index
    %520 = memref.load %arg2[%c43] : memref<98xf32, #tpu.memory_space<smem>>
    %c92 = arith.constant 92 : index
    %521 = memref.load %arg2[%c92] : memref<98xf32, #tpu.memory_space<smem>>
    %c0_347 = arith.constant 0 : index
    %c0_348 = arith.constant 0 : index
    %c6_349 = arith.constant 6 : index
    %c1_350 = arith.constant 1 : index
    %522 = vector.load %arg1[%c0_347, %c0_348, %c6_349, %c1_350] : memref<1x2x22x22xf32, #tpu.memory_space<vmem>>, vector<1x1x16x16xf32>
    %523 = vector.shape_cast %522 : vector<1x1x16x16xf32> to vector<1x16x16xf32>
    %c0_351 = arith.constant 0 : index
    %c1_352 = arith.constant 1 : index
    %c6_353 = arith.constant 6 : index
    %c1_354 = arith.constant 1 : index
    %524 = vector.load %arg1[%c0_351, %c1_352, %c6_353, %c1_354] : memref<1x2x22x22xf32, #tpu.memory_space<vmem>>, vector<1x1x16x16xf32>
    %525 = vector.shape_cast %524 : vector<1x1x16x16xf32> to vector<1x16x16xf32>
    %526 = vector.broadcast %520 : f32 to vector<1x16x16xf32>
    %527 = arith.mulf %526, %523 : vector<1x16x16xf32>
    %528 = arith.addf %504, %527 : vector<1x16x16xf32>
    %529 = vector.broadcast %521 : f32 to vector<1x16x16xf32>
    %530 = arith.mulf %529, %525 : vector<1x16x16xf32>
    %531 = arith.addf %507, %530 : vector<1x16x16xf32>
    %c44 = arith.constant 44 : index
    %532 = memref.load %arg2[%c44] : memref<98xf32, #tpu.memory_space<smem>>
    %c93 = arith.constant 93 : index
    %533 = memref.load %arg2[%c93] : memref<98xf32, #tpu.memory_space<smem>>
    %c0_355 = arith.constant 0 : index
    %c0_356 = arith.constant 0 : index
    %c6_357 = arith.constant 6 : index
    %c2_358 = arith.constant 2 : index
    %534 = vector.load %arg1[%c0_355, %c0_356, %c6_357, %c2_358] : memref<1x2x22x22xf32, #tpu.memory_space<vmem>>, vector<1x1x16x16xf32>
    %535 = vector.shape_cast %534 : vector<1x1x16x16xf32> to vector<1x16x16xf32>
    %c0_359 = arith.constant 0 : index
    %c1_360 = arith.constant 1 : index
    %c6_361 = arith.constant 6 : index
    %c2_362 = arith.constant 2 : index
    %536 = vector.load %arg1[%c0_359, %c1_360, %c6_361, %c2_362] : memref<1x2x22x22xf32, #tpu.memory_space<vmem>>, vector<1x1x16x16xf32>
    %537 = vector.shape_cast %536 : vector<1x1x16x16xf32> to vector<1x16x16xf32>
    %538 = vector.broadcast %532 : f32 to vector<1x16x16xf32>
    %539 = arith.mulf %538, %535 : vector<1x16x16xf32>
    %540 = arith.addf %516, %539 : vector<1x16x16xf32>
    %541 = vector.broadcast %533 : f32 to vector<1x16x16xf32>
    %542 = arith.mulf %541, %537 : vector<1x16x16xf32>
    %543 = arith.addf %519, %542 : vector<1x16x16xf32>
    %c45 = arith.constant 45 : index
    %544 = memref.load %arg2[%c45] : memref<98xf32, #tpu.memory_space<smem>>
    %c94 = arith.constant 94 : index
    %545 = memref.load %arg2[%c94] : memref<98xf32, #tpu.memory_space<smem>>
    %c0_363 = arith.constant 0 : index
    %c0_364 = arith.constant 0 : index
    %c6_365 = arith.constant 6 : index
    %c3_366 = arith.constant 3 : index
    %546 = vector.load %arg1[%c0_363, %c0_364, %c6_365, %c3_366] : memref<1x2x22x22xf32, #tpu.memory_space<vmem>>, vector<1x1x16x16xf32>
    %547 = vector.shape_cast %546 : vector<1x1x16x16xf32> to vector<1x16x16xf32>
    %c0_367 = arith.constant 0 : index
    %c1_368 = arith.constant 1 : index
    %c6_369 = arith.constant 6 : index
    %c3_370 = arith.constant 3 : index
    %548 = vector.load %arg1[%c0_367, %c1_368, %c6_369, %c3_370] : memref<1x2x22x22xf32, #tpu.memory_space<vmem>>, vector<1x1x16x16xf32>
    %549 = vector.shape_cast %548 : vector<1x1x16x16xf32> to vector<1x16x16xf32>
    %550 = vector.broadcast %544 : f32 to vector<1x16x16xf32>
    %551 = arith.mulf %550, %547 : vector<1x16x16xf32>
    %552 = arith.addf %528, %551 : vector<1x16x16xf32>
    %553 = vector.broadcast %545 : f32 to vector<1x16x16xf32>
    %554 = arith.mulf %553, %549 : vector<1x16x16xf32>
    %555 = arith.addf %531, %554 : vector<1x16x16xf32>
    %c46 = arith.constant 46 : index
    %556 = memref.load %arg2[%c46] : memref<98xf32, #tpu.memory_space<smem>>
    %c95 = arith.constant 95 : index
    %557 = memref.load %arg2[%c95] : memref<98xf32, #tpu.memory_space<smem>>
    %c0_371 = arith.constant 0 : index
    %c0_372 = arith.constant 0 : index
    %c6_373 = arith.constant 6 : index
    %c4_374 = arith.constant 4 : index
    %558 = vector.load %arg1[%c0_371, %c0_372, %c6_373, %c4_374] : memref<1x2x22x22xf32, #tpu.memory_space<vmem>>, vector<1x1x16x16xf32>
    %559 = vector.shape_cast %558 : vector<1x1x16x16xf32> to vector<1x16x16xf32>
    %c0_375 = arith.constant 0 : index
    %c1_376 = arith.constant 1 : index
    %c6_377 = arith.constant 6 : index
    %c4_378 = arith.constant 4 : index
    %560 = vector.load %arg1[%c0_375, %c1_376, %c6_377, %c4_378] : memref<1x2x22x22xf32, #tpu.memory_space<vmem>>, vector<1x1x16x16xf32>
    %561 = vector.shape_cast %560 : vector<1x1x16x16xf32> to vector<1x16x16xf32>
    %562 = vector.broadcast %556 : f32 to vector<1x16x16xf32>
    %563 = arith.mulf %562, %559 : vector<1x16x16xf32>
    %564 = arith.addf %540, %563 : vector<1x16x16xf32>
    %565 = vector.broadcast %557 : f32 to vector<1x16x16xf32>
    %566 = arith.mulf %565, %561 : vector<1x16x16xf32>
    %567 = arith.addf %543, %566 : vector<1x16x16xf32>
    %c47 = arith.constant 47 : index
    %568 = memref.load %arg2[%c47] : memref<98xf32, #tpu.memory_space<smem>>
    %c96 = arith.constant 96 : index
    %569 = memref.load %arg2[%c96] : memref<98xf32, #tpu.memory_space<smem>>
    %c0_379 = arith.constant 0 : index
    %c0_380 = arith.constant 0 : index
    %c6_381 = arith.constant 6 : index
    %c5_382 = arith.constant 5 : index
    %570 = vector.load %arg1[%c0_379, %c0_380, %c6_381, %c5_382] : memref<1x2x22x22xf32, #tpu.memory_space<vmem>>, vector<1x1x16x16xf32>
    %571 = vector.shape_cast %570 : vector<1x1x16x16xf32> to vector<1x16x16xf32>
    %c0_383 = arith.constant 0 : index
    %c1_384 = arith.constant 1 : index
    %c6_385 = arith.constant 6 : index
    %c5_386 = arith.constant 5 : index
    %572 = vector.load %arg1[%c0_383, %c1_384, %c6_385, %c5_386] : memref<1x2x22x22xf32, #tpu.memory_space<vmem>>, vector<1x1x16x16xf32>
    %573 = vector.shape_cast %572 : vector<1x1x16x16xf32> to vector<1x16x16xf32>
    %574 = vector.broadcast %568 : f32 to vector<1x16x16xf32>
    %575 = arith.mulf %574, %571 : vector<1x16x16xf32>
    %576 = arith.addf %552, %575 : vector<1x16x16xf32>
    %577 = vector.broadcast %569 : f32 to vector<1x16x16xf32>
    %578 = arith.mulf %577, %573 : vector<1x16x16xf32>
    %579 = arith.addf %555, %578 : vector<1x16x16xf32>
    %c48 = arith.constant 48 : index
    %580 = memref.load %arg2[%c48] : memref<98xf32, #tpu.memory_space<smem>>
    %c97 = arith.constant 97 : index
    %581 = memref.load %arg2[%c97] : memref<98xf32, #tpu.memory_space<smem>>
    %c0_387 = arith.constant 0 : index
    %c0_388 = arith.constant 0 : index
    %c6_389 = arith.constant 6 : index
    %c6_390 = arith.constant 6 : index
    %582 = vector.load %arg1[%c0_387, %c0_388, %c6_389, %c6_390] : memref<1x2x22x22xf32, #tpu.memory_space<vmem>>, vector<1x1x16x16xf32>
    %583 = vector.shape_cast %582 : vector<1x1x16x16xf32> to vector<1x16x16xf32>
    %c0_391 = arith.constant 0 : index
    %c1_392 = arith.constant 1 : index
    %c6_393 = arith.constant 6 : index
    %c6_394 = arith.constant 6 : index
    %584 = vector.load %arg1[%c0_391, %c1_392, %c6_393, %c6_394] : memref<1x2x22x22xf32, #tpu.memory_space<vmem>>, vector<1x1x16x16xf32>
    %585 = vector.shape_cast %584 : vector<1x1x16x16xf32> to vector<1x16x16xf32>
    %586 = vector.broadcast %580 : f32 to vector<1x16x16xf32>
    %587 = arith.mulf %586, %583 : vector<1x16x16xf32>
    %588 = arith.addf %564, %587 : vector<1x16x16xf32>
    %589 = vector.broadcast %581 : f32 to vector<1x16x16xf32>
    %590 = arith.mulf %589, %585 : vector<1x16x16xf32>
    %591 = arith.addf %567, %590 : vector<1x16x16xf32>
    %592 = arith.addf %588, %591 : vector<1x16x16xf32>
    %593 = arith.addf %576, %579 : vector<1x16x16xf32>
    %594 = arith.addf %592, %593 : vector<1x16x16xf32>
    %595 = arith.negf %594 : vector<1x16x16xf32>
    %596 = math.exp %595 : vector<1x16x16xf32>
    %cst_395 = arith.constant 1.000000e+00 : f32
    %597 = vector.broadcast %cst_395 : f32 to vector<1x16x16xf32>
    %598 = arith.addf %597, %596 : vector<1x16x16xf32>
    %599 = arith.divf %597, %598 : vector<1x16x16xf32>
    %c0_396 = arith.constant 0 : index
    %c0_397 = arith.constant 0 : index
    %c0_398 = arith.constant 0 : index
    %600 = vector.load %arg3[%c0_396, %c0_397, %c0_398] : memref<1x16x16xf32, #tpu.memory_space<vmem>>, vector<1x16x16xf32>
    tpu.vector_store %arg3[%c0_396, %c0_397, %c0_398], %599 {strides = array<i32>} : memref<1x16x16xf32, #tpu.memory_space<vmem>>, vector<1x16x16xf32>,
    return
  }
  func.func @transform_0(%arg0: i32) -> (i32, i32, i32, i32) {
    %c0_i32 = arith.constant 0 : i32
    %c0_i32_0 = arith.constant 0 : i32
    %c0_i32_1 = arith.constant 0 : i32
    %c0_i32_2 = arith.constant 0 : i32
    return %arg0, %c0_i32, %c0_i32_0, %c0_i32_1 : i32, i32, i32, i32
  }
  func.func @transform_1(%arg0: i32) -> i32 {
    %c0_i32 = arith.constant 0 : i32
    %c0_i32_0 = arith.constant 0 : i32
    return %c0_i32 : i32
  }
  func.func @transform_2(%arg0: i32) -> (i32, i32, i32) {
    %c0_i32 = arith.constant 0 : i32
    %c0_i32_0 = arith.constant 0 : i32
    %c0_i32_1 = arith.constant 0 : i32
    return %arg0, %c0_i32, %c0_i32_0 : i32, i32, i32
  }
}

</mosaic_0001>

<bundles_post_ra>
// kernel: spatial_attention.2
= control target key start
LH: loop header
LB: loop body
LE: loop exit
PB: predicated region body
PF: predicated region fallthrough
CT: control target
= control target key end

     0   :  { %s337_s6 = smov 0   ;;  %s339_s7 = smov 0   ;;  %s386_s0 = inlined_call_operand.vmem [shape: f32[2,4,256], index: 0, kind: input, shape index: {}]   ;;  %s387_s1 = inlined_call_operand.vmem [shape: f32[2,2,256], index: 1, kind: output, shape index: {}]  }
   0x1   :  { %s341_s8 = smov 0  }
   0x2 LB: > { %s23_s9 = sadd.s32 1, %s319_s7  ;;  %p262_p0 = scmp.ge.s32.totalorder %s323_s8, 1  ;;  %s323_s8 = sphi %s341_s8, %s11_s8   ;;  %s319_s7 = sphi %s339_s7, %s391_s7   ;;  %s315_s6 = sphi %s337_s6, %s390_s6  }
   0x3   : > { %p25_p1 = scmp.ge.s32.totalorder %s23_s9, 2  ;;  %p105_p2 = scmp.lt.s32.totalorder %s323_s8, 3 }
   0x5   : > { %s393_s9 = smov (%p25_p1, %s23_s9), 0  ;;  %p106_p3 = pnand %p262_p0, %p105_p2 }
   0x6   : > { %p129_p4 = scmp.lt.s32.totalorder (!%p106_p3), %s315_s6, 1 }
   0x7   : > { %109 = sbr.rel (%p106_p3) target bundleno = 40 (0x28), region = 24 }
   0xc   : > { %v147_v0 = vlaneseq  ;;  %s395_s6 = smov (!%p129_p4, %s315_s6), 1  ;;  %v325_v2 = vmov 0.0   ;;  %v326_v3 = vmov -inf  }
   0xd   : > { %s273_s10 = sshll.u32 %s395_s6, 3  ;;  %s274_s14 = sshll.u32 %s395_s6, 2 }
   0xe   : > { %vm355_vm0 = vcmp.lt.s32.totalorder %v147_v0, 256  ;;  %s137_s13 = scalar_lea.vmem %s386_s0, %s273_s10  ;;  %s142_s17 = scalar_lea.vmem %s387_s1, %s274_s14 }
   0xf   : > { %151 = vst.msk [vmem:[#allocation2] sm:$0x3] %vm355_vm0, %v325_v2  ;;  %v155_v4 = vld [vmem:[%s137_s13] ss:$4 sm:$0x3] }
  0x10   : > { %152 = vst.msk [vmem:[#allocation3] sm:$0x3] %vm355_vm0, %v326_v3  ;;  %v267_v5 = vld [vmem:[%s137_s13 + $0x1] ss:$4 sm:$0x3] }
  0x11   : > { %v269_v6 = vld [vmem:[%s137_s13 + $0x3] ss:$4 sm:$0x3]  ;;  %v268_v8 = vld [vmem:[%s137_s13 + $0x2] ss:$4 sm:$0x3] }
  0x12   : > { %v167_v10 = vadd.f32 %v269_v6, %v267_v5  ;;  %v168_v13 = vmax.f32 %v267_v5, %v269_v6 }
  0x16   : > { %v153_v7 = vld [vmem:[#allocation2] sm:$0x3] }
  0x17   : > { %v156_v9 = vadd.f32 %v155_v4, %v153_v7  ;;  %v154_v11 = vld [vmem:[#allocation3] sm:$0x3] }
  0x18   : > { %v157_v12 = vmax.f32 %v154_v11, %v155_v4 }
  0x19   : > { %v163_v14 = vadd.f32 %v268_v8, %v156_v9 }
  0x1a   : > { %v164_v15 = vmax.f32 %v157_v12, %v268_v8 }
  0x1b   : > { %v169_v16 = vadd.f32 %v167_v10, %v163_v14 }
  0x1c   : > { %v175_v17 = vmax.f32 %v164_v15, %v168_v13 }
  0x1d   : > { %174 = vst.msk [vmem:[#allocation2] sm:$0x3] %vm355_vm0, %v169_v16 }
  0x1e   : > { %176 = vst.msk [vmem:[#allocation3] sm:$0x3] %vm355_vm0, %v175_v17 }
  0x24   : > { %v180_v18 = vld [vmem:[#allocation2] sm:$0x3] }
  0x25   : > { %v181_v19 = vmul.f32 0.25, %v180_v18  ;;  %v183_v20 = vld [vmem:[#allocation3] sm:$0x3] }
  0x26   : > { %270 = vst.msk [vmem:[%s142_s17 + $0x1] ss:$2 sm:$0x3] %vm355_vm0, %v183_v20 }
  0x27   : > { %182 = vst.msk [vmem:[%s142_s17] ss:$2 sm:$0x3] %vm355_vm0, %v181_v19 }
  0x28 PF: > { %s11_s8 = sadd.s32 1, %s323_s8   ;;  %s390_s6 = smov %s319_s7 }
  0x29   : > { %p8_p5 = scmp.ge.s32.totalorder %s11_s8, 4   ;;  %s391_s7 = smov %s393_s9 }
  0x2b   :  { %10 = sbr.rel (!%p8_p5) target bundleno = 2 (0x2), region = 66 }

// kernel: spatial_attention.3
= control target key start
LH: loop header
LB: loop body
LE: loop exit
PB: predicated region body
PF: predicated region fallthrough
CT: control target
= control target key end

     0   :  { %7 = vsyncpa [#allocation4], 0  ;;  %s2739_s0 = inlined_call_operand.vmem [shape: f32[2,2,22,22], index: 0, kind: input, shape index: {}]   ;;  %s2740_s1 = inlined_call_operand.vmem [shape: f32[98], index: 1, kind: input, shape index: {}]   ;;  %s2741_s2 = inlined_call_operand.hbm [shape: f32[2,16,16], index: 2, kind: output, shape index: {}]  }
   0x1   :  { %8 = vsyncpa [#allocation3], 0 }
   0x2   :  { %10 = vsyncpa [#allocation3 + $0x1], 0  ;;  %s1877_s9 = smov 0   ;;  %s1879_s10 = smov 0  }
   0x3   :  { %s1881_s11 = smov 0   ;;  %s1883_s12 = smov 0  }
   0x4 LB: > { %s1898_s13 = sadd.s32 4294967295, %s1850_s12   ;;  %s1574_s14 = sadd.s32 4294967294, %s1850_s12   ;;  %s1850_s12 = sphi %s1883_s12, %s2747_s12   ;;  %s1846_s11 = sphi %s1881_s11, %s2746_s11   ;;  %s1842_s10 = sphi %s1879_s10, %s2745_s10   ;;  %s1838_s9 = sphi %s1877_s9, %s2744_s9  }
   0x5   : > { %s1902_s15 = sadd.s32 1, %s1850_s12   ;;  %s70_s16 = sadd.s32 1, %s1846_s11 }
   0x6   : > { %s67_s17 = ssub.s32 %s1850_s12, %s1902_s15  ;;  %p80_p0 = scmp.ne.s32.totalorder %s1846_s11, %s1842_s10 }
   0x7   : > { %p68_p1 = scmp.eq.s32.totalorder %s67_s17, 0  ;;  %p81_p2 = scmp.eq.s32.totalorder %s1898_s13, 1 }
   0x8   : > { %p86_p3 = scmp.ne.s32.totalorder %s1842_s10, %s1838_s9  ;;  %p87_p4 = scmp.eq.s32.totalorder %s1574_s14, 1 }
   0x9   : > { %s1913_s18 = scalar_select %p68_p1, %s1846_s11, %s70_s16  }
   0xa   : > { %p1915_p5 = por %p81_p2, %p80_p0  ;;  %p1919_p6 = por %p87_p4, %p86_p3 }
   0xb   : > { %p1575_p7 = scmp.ge.s32.totalorder %s1850_s12, 1  ;;  %p94_p8 = scmp.lt.s32.totalorder %s1850_s12, 3 }
   0xc   : > { %p1716_p9 = scmp.eq.s32.totalorder %s1898_s13, 0  ;;  %s106_s23 = sshll.u32 %s2740_s1, 4  ;;  %s107_s23 = int_to_ptr.vmem [resolvable:$true] %s106_s23 }
   0xd   : > { %p95_p10 = pnand %p1575_p7, %p94_p8  ;;  %s1852_s24 = smov [#allocation2]  }
   0xf   : > { %p1708_p11 = pneg %p95_p10  ;;  %127 = sbr.rel (%p95_p10) target bundleno = 679 (0x2a7), region = 28 }
  0x11   : > { %p1709_p12 = pnand %p1716_p9, %p1708_p11 }
  0x13   : > { %1711 = dma.vmem_to_smem (!%p1709_p12), %s107_s23, 16, %s1852_s24, [#allocation4]  }
  0x14   : > { %1829 = dma.done.wait (%p1716_p9), [#allocation4], 16  }
  0x15   : > { %1831 = vsyncadd (%p1716_p9), [#allocation4], 4294967280 }
  0x16   : > { %134 = sfence }
  0x17   : > { %p151_p13 = scmp.lt.s32.totalorder %s1898_s13, 1  ;;  %s1588_s25 = sld [smem:[#allocation2 + $0x33]]  ;;  %vm1481_vm3 = vcmask 130048  }
  0x18   : > { %s1589_s26 = sld [smem:[#allocation2 + $0x3]]  ;;  %s1853_s5 = smov 126  }
  0x19   : > { %s152_s27 = scalar_select %p151_p13, %s1898_s13, 1 }
  0x1a   : > { %s1587_s28 = sld [smem:[#allocation2 + $0x2]]  ;;  %s1854_s14 = smov 124  }
  0x1b   : > { %s1701_s29 = smul.u32 48, %s152_s27  ;;  %s1590_s6 = sld [smem:[#allocation2 + $0x34]] }
  0x1c   : > { %s1591_s7 = sld [smem:[#allocation2 + $0x4]]  ;;  %s1855_s24 = smov 122  }
  0x1d   : > { %s1934_s4 = scalar_lea.vmem %s2739_s0, %s1701_s29  ;;  %v200_v0 = vstv %s1588_s25  ;;  %s1592_s8 = sld [smem:[#allocation2 + $0x35]] }
  0x1e   : > { %v1937_v1 = vld [vmem:[%s1934_s4 + $0x18] sm:$0xff]  ;;  %v1940_v2 = vld [vmem:[%s1934_s4] sm:$0xff]  ;;  %v215_v3 = vstv %s1589_s26  ;;  %v1951_v9 = vld [vmem:[%s1934_s4 + $0x8] sm:$0xff]  ;;  %s1593_s16 = sld [smem:[#allocation2 + $0x5]]  ;;  %s1856_s26 = smov 1  }
  0x1f   : > { %v201_v4 = vmul.f32 %v1937_v1, %v200_v0  ;;  %v216_v5 = vmul.f32 %v215_v3, %v1940_v2  ;;  %v1948_v8 = vld [vmem:[%s1934_s4 + $0x20] sm:$0xff]  ;;  %v217_v11 = vmul.f32 %v215_v3, %v1951_v9  ;;  %s1594_s17 = sld [smem:[#allocation2 + $0x36]]  ;;  %v2000_v40 = vld [vmem:[%s1934_s4 + $0x9] sm:$0xff]  ;;  %s1857_s30 = smov 127  }
  0x20   : > { %v187_v6 = vstv %s1587_s28  ;;  %v202_v10 = vmul.f32 %v1948_v8, %v200_v0  ;;  %s1595_s21 = sld [smem:[#allocation2 + $0x6]]  ;;  %v1984_v32 = vld [vmem:[%s1934_s4 + $0x1] sm:$0xff]  ;;  %v1993_v37 = vld [vmem:[%s1934_s4 + $0x19] sm:$0xff] }
  0x21   : > { %205 = vrot.lane.b32.xlu1 %v201_v4, %s1853_s5  ;;  %220 = vrot.lane.b32.xlu2 %v216_v5, %s1853_s5  ;;  %v188_v7 = vmul.f32 %v187_v6, %v1940_v2  ;;  %v189_v12 = vmul.f32 %v187_v6, %v1951_v9  ;;  %v228_v13 = vstv %s1590_s6  ;;  %s1596_s22 = sld [smem:[#allocation2 + $0x37]]  ;;  %v1996_v39 = vld [vmem:[%s1934_s4 + $0x21] sm:$0xff] }
  0x22   : > { %v243_v14 = vstv %s1591_s7  ;;  %v230_v15 = vmul.f32 %v1948_v8, %v228_v13  ;;  %v229_v17 = vmul.f32 %v1937_v1, %v228_v13  ;;  %s1597_s23 = sld [smem:[#allocation2 + $0x7]] }
  0x23   : > { %192 = vrot.lane.b32.xlu0 %v188_v7, %s1853_s5  ;;  %v244_v16 = vmul.f32 %v243_v14, %v1940_v2  ;;  %v256_v18 = vstv %s1592_s8  ;;  %v245_v21 = vmul.f32 %v243_v14, %v1951_v9  ;;  %s1598_s25 = sld [smem:[#allocation2 + $0x38]]  ;;  %s1858_s8 = smov 125  }
  0x24   : > { %v257_v19 = vmul.f32 %v1937_v1, %v256_v18  ;;  %v258_v20 = vmul.f32 %v1948_v8, %v256_v18  ;;  %v271_v22 = vstv %s1593_s16  ;;  %s1601_s27 = sld [smem:[#allocation2 + $0x8]] }
  0x25   : > { %v284_v23 = vstv %s1594_s17  ;;  %v273_v24 = vmul.f32 %v271_v22, %v1951_v9  ;;  %v272_v26 = vmul.f32 %v271_v22, %v1940_v2  ;;  %s1602_s28 = sld [smem:[#allocation2 + $0x39]] }
  0x26   : > { %v285_v25 = vmul.f32 %v1937_v1, %v284_v23  ;;  %v299_v27 = vstv %s1595_s21  ;;  %v286_v30 = vmul.f32 %v1948_v8, %v284_v23  ;;  %s1603_s29 = sld [smem:[#allocation2 + $0x9]] }
  0x27   : > { %v300_v28 = vmul.f32 %v299_v27, %v1940_v2  ;;  %v301_v29 = vmul.f32 %v299_v27, %v1951_v9  ;;  %v312_v31 = vstv %s1596_s22  ;;  %s1604_s3 = sld [smem:[#allocation2 + $0x3a]] }
  0x28   : > { %v331_v33 = vstv %s1597_s23  ;;  %v314_v34 = vmul.f32 %v1948_v8, %v312_v31  ;;  %v313_v36 = vmul.f32 %v1937_v1, %v312_v31  ;;  %s1605_s6 = sld [smem:[#allocation2 + $0xa]] }
  0x29   : > { %207 = vrot.lane.b32.xlu1 %v202_v10, %s1853_s5  ;;  %222 = vrot.lane.b32.xlu2 %v217_v11, %s1853_s5  ;;  %v332_v35 = vmul.f32 %v331_v33, %v1984_v32  ;;  %v344_v38 = vstv %s1598_s25  ;;  %v333_v43 = vmul.f32 %v331_v33, %v2000_v40  ;;  %s1606_s7 = sld [smem:[#allocation2 + $0x3b]]  ;;  %s1859_s25 = smov 123  }
  0x2a   : > { %v345_v41 = vmul.f32 %v1993_v37, %v344_v38  ;;  %v346_v42 = vmul.f32 %v1996_v39, %v344_v38  ;;  %v359_v44 = vstv %s1601_s27  ;;  %s1607_s16 = sld [smem:[#allocation2 + $0xb]] }
  0x2b   : > { %194 = vrot.lane.b32.xlu0 %v189_v12, %s1853_s5  ;;  %v372_v45 = vstv %s1602_s28  ;;  %v361_v46 = vmul.f32 %v359_v44, %v2000_v40  ;;  %v360_v48 = vmul.f32 %v359_v44, %v1984_v32  ;;  %s1608_s17 = sld [smem:[#allocation2 + $0x3c]] }
  0x2c   : > { %v373_v47 = vmul.f32 %v1993_v37, %v372_v45  ;;  %v387_v49 = vstv %s1603_s29  ;;  %v374_v52 = vmul.f32 %v1996_v39, %v372_v45  ;;  %s1609_s21 = sld [smem:[#allocation2 + $0xc]] }
  0x2d   : > { %v388_v50 = vmul.f32 %v387_v49, %v1984_v32  ;;  %v389_v51 = vmul.f32 %v387_v49, %v2000_v40  ;;  %v400_v53 = vstv %s1604_s3  ;;  %s1610_s22 = sld [smem:[#allocation2 + $0x3d]] }
  0x2e   : > { %v415_v54 = vstv %s1605_s6  ;;  %v402_v55 = vmul.f32 %v1996_v39, %v400_v53  ;;  %v401_v57 = vmul.f32 %v1993_v37, %v400_v53  ;;  %s1611_s23 = sld [smem:[#allocation2 + $0xd]] }
  0x2f   : > { %v416_v56 = vmul.f32 %v415_v54, %v1984_v32  ;;  %v428_v58 = vstv %s1606_s7  ;;  %v417_v61 = vmul.f32 %v415_v54, %v2000_v40  ;;  %s1612_s27 = sld [smem:[#allocation2 + $0x3e]] }
  0x30   : > { %v429_v59 = vmul.f32 %v1993_v37, %v428_v58  ;;  %v430_v60 = vmul.f32 %v1996_v39, %v428_v58  ;;  %v443_v62 = vstv %s1607_s16  ;;  %s1619_s28 = sld [smem:[#allocation2 + $0x10]] }
  0x31   : > { %235 = vrot.lane.b32.xlu1 %v230_v15, %s1853_s5  ;;  %248 = vrot.lane.b32.xlu2 %v244_v16, %s1854_s14  ;;  %v456_v63 = vstv %s1608_s17  ;;  %v445_v3 = vmul.f32 %v443_v62, %v2000_v40  ;;  %v444_v5 = vmul.f32 %v443_v62, %v1984_v32  ;;  %s2055_s29 = sld [smem:[#allocation2 + $0x41]] }
  0x32   : > { %v457_v4 = vmul.f32 %v1993_v37, %v456_v63  ;;  %v471_v6 = vstv %s1609_s21  ;;  %v458_v12 = vmul.f32 %v1996_v39, %v456_v63  ;;  %s1621_s3 = sld [smem:[#allocation2 + $0x11]] }
  0x33   : > { %233 = vrot.lane.b32.xlu0 %v229_v17, %s1853_s5  ;;  %v472_v10 = vmul.f32 %v471_v6, %v1984_v32  ;;  %v473_v11 = vmul.f32 %v471_v6, %v2000_v40  ;;  %v484_v13 = vstv %s1610_s22  ;;  %s1622_s6 = sld [smem:[#allocation2 + $0x42]] }
  0x34   : > { %v499_v14 = vstv %s1611_s23  ;;  %v486_v16 = vmul.f32 %v1996_v39, %v484_v13  ;;  %v485_v18 = vmul.f32 %v1993_v37, %v484_v13  ;;  %s2091_s7 = sld [smem:[#allocation2 + $0x12]] }
  0x35   : > { %v500_v17 = vmul.f32 %v499_v14, %v1984_v32  ;;  %v2082_v32 = vld [vmem:[%s1934_s4 + $0x2] sm:$0xff]  ;;  %s1624_s16 = sld [smem:[#allocation2 + $0x43]] }
  0x36   : > { %v555_v27 = vstv %s1619_s28  ;;  %s1625_s17 = sld [smem:[#allocation2 + $0x13]] }
  0x37   : > { %s2121_s21 = sld [smem:[#allocation2 + $0x44]] }
  0x38   : > { %s1627_s22 = sld [smem:[#allocation2 + $0x14]] }
  0x39   : > { %261 = vrot.lane.b32.xlu1 %v257_v19, %s1854_s14  ;;  %263 = vrot.lane.b32.xlu2 %v258_v20, %s1854_s14  ;;  %v512_v19 = vstv %s1612_s27  ;;  %v596_v45 = vstv %s1622_s6  ;;  %s2137_s23 = sld [smem:[#allocation2 + $0x1]] }
  0x3a   : > { %v513_v23 = vmul.f32 %v1993_v37, %v512_v19  ;;  %v583_v37 = vstv %s1621_s3  ;;  %s2143_s27 = sld [smem:[#allocation2]] }
  0x3b   : > { %250 = vrot.lane.b32.xlu0 %v245_v21, %s1854_s14  ;;  %v624_v53 = vstv %s1624_s16  ;;  %s2148_s28 = sld [smem:[#allocation2 + $0x45]] }
  0x3c   : > { %s2163_s3 = sld [smem:[#allocation2 + $0x31]] }
  0x3d   : > { %s2176_s6 = sld [smem:[#allocation2 + $0x46]] }
  0x3e   : > { %s2193_s16 = sld [smem:[#allocation2 + $0x16]] }
  0x3f   : > { %v175_v13 = vstv %s2137_s23  ;;  %s2255_s23 = sld [smem:[#allocation2 + $0x18]] }
  0x41   : > { %278 = vrot.lane.b32.xlu1 %v273_v24, %s1854_s14  ;;  %289 = vrot.lane.b32.xlu2 %v285_v25, %s1854_s14  ;;  %v514_v24 = vmul.f32 %v1996_v39, %v512_v19  ;;  %v501_v25 = vmul.f32 %v499_v14, %v2000_v40  ;;  %v2099_v40 = vld [vmem:[%s1934_s4 + $0x22] sm:$0xff]  ;;  %v163_v19 = vstv %s2143_s27  ;;  %s1638_s27 = sld [smem:[#allocation2 + $0x49]] }
  0x42   : > { %v626_v58 = vmul.f32 %v2099_v40, %v624_v53 }
  0x43   : > { %276 = vrot.lane.b32.xlu0 %v272_v26, %s1854_s14  ;;  %v2070_v26 = vld [vmem:[%s1934_s4 + $0xa] sm:$0xff] }
  0x49   : > { %304 = vrot.lane.b32.xlu1 %v300_v28, %s1855_s24  ;;  %306 = vrot.lane.b32.xlu2 %v301_v29, %s1855_s24  ;;  %v2073_v28 = vld [vmem:[%s1934_s4 + $0x1a] sm:$0xff]  ;;  %v568_v29 = vstv %s2055_s29  ;;  %s2150_s29 = sld [smem:[#allocation2 + $0x15]] }
  0x4a   : > { %v570_v44 = vmul.f32 %v2099_v40, %v568_v29 }
  0x4b   : > { %291 = vrot.lane.b32.xlu0 %v286_v30, %s1854_s14 }
  0x51   : > { %319 = vrot.lane.b32.xlu1 %v314_v34, %s1855_s24  ;;  %336 = vrot.lane.b32.xlu2 %v332_v35, %s1856_s26  ;;  %v557_v34 = vmul.f32 %v555_v27, %v2070_v26  ;;  %v569_v35 = vmul.f32 %v2073_v28, %v568_v29  ;;  %v2173_v29 = vld [vmem:[%s1934_s4 + $0x3] sm:$0xff] }
  0x53   : > { %317 = vrot.lane.b32.xlu0 %v313_v36, %s1855_s24  ;;  %v556_v36 = vmul.f32 %v555_v27, %v2082_v32  ;;  %v680_v27 = vstv %s2148_s28  ;;  %s1639_s28 = sld [smem:[#allocation2 + $0x19]] }
  0x59   : > { %349 = vrot.lane.b32.xlu1 %v345_v41, %s1856_s26  ;;  %351 = vrot.lane.b32.xlu2 %v346_v42, %s1856_s26  ;;  %v584_v42 = vmul.f32 %v583_v37, %v2082_v32 }
  0x5b   : > { %338 = vrot.lane.b32.xlu0 %v333_v43, %s1856_s26  ;;  %v585_v43 = vmul.f32 %v583_v37, %v2070_v26 }
  0x61   : > { %366 = vrot.lane.b32.xlu1 %v361_v46, %s1857_s30  ;;  %377 = vrot.lane.b32.xlu2 %v373_v47, %s1857_s30  ;;  %v611_v46 = vstv %s2091_s7  ;;  %s2184_s7 = sld [smem:[#allocation2 + $0x32]] }
  0x63   : > { %364 = vrot.lane.b32.xlu0 %v360_v48, %s1857_s30 }
  0x69   : > { %392 = vrot.lane.b32.xlu1 %v388_v50, %s1857_s30  ;;  %394 = vrot.lane.b32.xlu2 %v389_v51, %s1857_s30  ;;  %v598_v50 = vmul.f32 %v2099_v40, %v596_v45  ;;  %v612_v51 = vmul.f32 %v611_v46, %v2082_v32 }
  0x6b   : > { %379 = vrot.lane.b32.xlu0 %v374_v52, %s1857_s30  ;;  %v597_v52 = vmul.f32 %v2073_v28, %v596_v45 }
  0x71   : > { %407 = vrot.lane.b32.xlu1 %v402_v55, %s1857_s30  ;;  %420 = vrot.lane.b32.xlu2 %v416_v56, %s1858_s8 }
  0x73   : > { %405 = vrot.lane.b32.xlu0 %v401_v57, %s1857_s30  ;;  %v625_v57 = vmul.f32 %v2073_v28, %v624_v53 }
  0x79   : > { %433 = vrot.lane.b32.xlu1 %v429_v59, %s1858_s8  ;;  %435 = vrot.lane.b32.xlu2 %v430_v60, %s1858_s8  ;;  %v613_v59 = vmul.f32 %v611_v46, %v2070_v26  ;;  %v639_v60 = vstv %s1625_s17  ;;  %v681_v46 = vmul.f32 %v2073_v28, %v680_v27  ;;  %s2204_s17 = sld [smem:[#allocation2 + $0x47]] }
  0x7a   : > { %v640_v6 = vmul.f32 %v639_v60, %v2082_v32 }
  0x7b   : > { %422 = vrot.lane.b32.xlu0 %v417_v61, %s1858_s8  ;;  %v2032_v0 = vpop.permute.xlu2 %220  ;;  %v652_v61 = vstv %s2121_s21  ;;  %s2229_s21 = sld [smem:[#allocation2 + $0x17]] }
  0x81   : > { %450 = vrot.lane.b32.xlu1 %v445_v3, %s1858_s8  ;;  %461 = vrot.lane.b32.xlu2 %v457_v4, %s1858_s8  ;;  %v641_v4 = vmul.f32 %v639_v60, %v2070_v26 }
  0x83   : > { %448 = vrot.lane.b32.xlu0 %v444_v5, %s1858_s8  ;;  %v2040_v7 = vpop.permute.xlu2 %222  ;;  %v653_v5 = vmul.f32 %v2073_v28, %v652_v61 }
  0x89   : > { %476 = vrot.lane.b32.xlu1 %v472_v10, %s1859_s25  ;;  %478 = vrot.lane.b32.xlu2 %v473_v11, %s1859_s25  ;;  %v667_v10 = vstv %s1627_s22  ;;  %s2249_s22 = sld [smem:[#allocation2 + $0x48]] }
  0x8b   : > { %463 = vrot.lane.b32.xlu0 %v458_v12, %s1858_s8  ;;  %v2048_v15 = vpop.permute.xlu2 %248 }
  0x91   : > { %491 = vrot.lane.b32.xlu1 %v486_v16, %s1859_s25  ;;  %504 = vrot.lane.b32.xlu2 %v500_v17, %s1859_s25  ;;  %v668_v16 = vmul.f32 %v667_v10, %v2082_v32  ;;  %v669_v17 = vmul.f32 %v667_v10, %v2070_v26 }
  0x93   : > { %489 = vrot.lane.b32.xlu0 %v485_v18, %s1859_s25  ;;  %v2058_v20 = vpop.permute.xlu1 %205  ;;  %v2060_v21 = vpop.permute.xlu2 %263  ;;  %v177_v18 = vmul.f32 %v175_v13, %v1951_v9 }
  0x95   : > { %v2062_v22 = vpop.permute.xlu0 %192 }
  0x99   : > { %517 = vrot.lane.b32.xlu1 %v513_v23, %s1859_s25  ;;  %519 = vrot.lane.b32.xlu2 %v514_v24, %s1859_s25  ;;  %v654_v23 = vmul.f32 %v2099_v40, %v652_v61  ;;  %v227_v24 = vadd.f32 %v2040_v7, %v177_v18  ;;  %v682_v7 = vmul.f32 %v2099_v40, %v680_v27 }
  0x9b   : > { %506 = vrot.lane.b32.xlu0 %v501_v25, %s1859_s25  ;;  %v2077_v30 = vpop.permute.xlu1 %207  ;;  %v2079_v31 = vpop.permute.xlu2 %289  ;;  %v164_v25 = vmul.f32 %v163_v19, %v1940_v2 }
  0x9d   : > { %v2084_v33 = vpop.permute.xlu0 %194 }
  0xa1   : > { %562 = vrot.lane.b32.xlu1 %v557_v34, %s1853_s5  ;;  %573 = vrot.lane.b32.xlu2 %v569_v35, %s1853_s5  ;;  %v699_v34 = vstv %s2150_s29  ;;  %s2283_s29 = sld [smem:[#allocation2 + $0x4a]] }
  0xa3   : > { %560 = vrot.lane.b32.xlu0 %v556_v36, %s1853_s5  ;;  %v2094_v38 = vpop.permute.xlu1 %235  ;;  %v2096_v39 = vpop.permute.xlu2 %306 }
  0xa5   : > { %v2101_v41 = vpop.permute.xlu0 %233 }
  0xa9   : > { %588 = vrot.lane.b32.xlu1 %v584_v42, %s1853_s5  ;;  %590 = vrot.lane.b32.xlu2 %v585_v43, %s1853_s5  ;;  %v700_v43 = vmul.f32 %v699_v34, %v2173_v29 }
  0xab   : > { %575 = vrot.lane.b32.xlu0 %v570_v44, %s1853_s5  ;;  %v2110_v47 = vpop.permute.xlu1 %261  ;;  %v2112_v48 = vpop.permute.xlu2 %336  ;;  %v198_v44 = vadd.f32 %v2062_v22, %v164_v25  ;;  %v740_v25 = vstv %s2204_s17  ;;  %s2312_s17 = sld [smem:[#allocation2 + $0x1b]] }
  0xad   : > { %v2114_v49 = vpop.permute.xlu0 %250  ;;  %v254_v22 = vadd.f32 %v2048_v15, %v198_v44 }
  0xb1   : > { %603 = vrot.lane.b32.xlu1 %v598_v50, %s1853_s5  ;;  %616 = vrot.lane.b32.xlu2 %v612_v51, %s1854_s14  ;;  %v176_v50 = vmul.f32 %v175_v13, %v1940_v2 }
  0xb3   : > { %601 = vrot.lane.b32.xlu0 %v597_v52, %s1853_s5  ;;  %v279_v54 = vpop.permute.xlu1 %278  ;;  %v2124_v55 = vpop.permute.xlu2 %351  ;;  %v168_v52 = vstv %s2163_s3  ;;  %v226_v60 = vadd.f32 %v2032_v0, %v176_v50  ;;  %s2295_s3 = sld [smem:[#allocation2 + $0x3f]] }
  0xb4   : > { %v283_v37 = vadd.f32 %v279_v54, %v227_v24  ;;  %v170_v53 = vmul.f32 %v1948_v8, %v168_v52  ;;  %v2198_v54 = vld [vmem:[%s1934_s4 + $0x1b] sm:$0xff]  ;;  %v727_v24 = vstv %s2193_s16  ;;  %s2310_s16 = sld [smem:[#allocation2 + $0x4b]] }
  0xb5   : > { %v2126_v56 = vpop.permute.xlu0 %276 }
  0xb6   : > { %v212_v10 = vadd.f32 %v2077_v30, %v170_v53  ;;  %v282_v13 = vadd.f32 %v2126_v56, %v226_v60 }
  0xb8   : > { %v342_v30 = vadd.f32 %v2112_v48, %v282_v13  ;;  %v741_v48 = vmul.f32 %v2198_v54, %v740_v25 }
  0xb9   : > { %629 = vrot.lane.b32.xlu1 %v625_v57, %s1854_s14  ;;  %631 = vrot.lane.b32.xlu2 %v626_v58, %s1854_s14  ;;  %v712_v57 = vstv %s2176_s6  ;;  %v2202_v58 = vld [vmem:[%s1934_s4 + $0x23] sm:$0xff]  ;;  %s1641_s6 = sld [smem:[#allocation2 + $0x1a]] }
  0xba   : > { %v713_v15 = vmul.f32 %v2198_v54, %v712_v57 }
  0xbb   : > { %618 = vrot.lane.b32.xlu0 %v613_v59, %s1854_s14  ;;  %v305_v62 = vpop.permute.xlu1 %304  ;;  %v2135_v63 = vpop.permute.xlu2 %377 }
  0xbc   : > { %v310_v61 = vadd.f32 %v305_v62, %v254_v22 }
  0xbd   : > { %v2139_v3 = vpop.permute.xlu0 %291 }
  0xc1   : > { %646 = vrot.lane.b32.xlu1 %v641_v4, %s1854_s14  ;;  %657 = vrot.lane.b32.xlu2 %v653_v5, %s1854_s14  ;;  %v2211_v4 = vld [vmem:[%s1934_s4 + $0xb] sm:$0xff] }
  0xc3   : > { %644 = vrot.lane.b32.xlu0 %v640_v6, %s1854_s14  ;;  %v2153_v11 = vpop.permute.xlu1 %319  ;;  %v395_v12 = vpop.permute.xlu2 %394  ;;  %v714_v6 = vmul.f32 %v2202_v58, %v712_v57 }
  0xc5   : > { %v2156_v14 = vpop.permute.xlu0 %317 }
  0xc9   : > { %672 = vrot.lane.b32.xlu1 %v668_v16, %s1855_s24  ;;  %674 = vrot.lane.b32.xlu2 %v669_v17, %s1855_s24  ;;  %v701_v17 = vmul.f32 %v699_v34, %v2211_v4 }
  0xcb   : > { %659 = vrot.lane.b32.xlu0 %v654_v23, %s1854_s14  ;;  %v2179_v35 = vpop.permute.xlu1 %349  ;;  %v421_v36 = vpop.permute.xlu2 %420  ;;  %v268_v23 = vadd.f32 %v2060_v21, %v212_v10  ;;  %v729_v21 = vmul.f32 %v727_v24, %v2211_v4 }
  0xcd   : > { %v339_v42 = vpop.permute.xlu0 %338  ;;  %v324_v34 = vadd.f32 %v2153_v11, %v268_v23 }
  0xce   : > { %v343_v45 = vadd.f32 %v339_v42, %v283_v37  ;;  %v169_v42 = vmul.f32 %v1937_v1, %v168_v52 }
  0xd0   : > { %v2188_v51 = vadd.f32 %v395_v12, %v343_v45  ;;  %v180_v12 = vstv %s2184_s7  ;;  %v728_v45 = vmul.f32 %v727_v24, %v2173_v29  ;;  %s2305_s7 = sld [smem:[#allocation2 + $0xe]] }
  0xd1   : > { %687 = vrot.lane.b32.xlu1 %v682_v7, %s1855_s24  ;;  %704 = vrot.lane.b32.xlu2 %v700_v43, %s1856_s26  ;;  %v182_v0 = vmul.f32 %v1948_v8, %v180_v12  ;;  %v181_v18 = vmul.f32 %v1937_v1, %v180_v12  ;;  %v211_v1 = vadd.f32 %v2058_v20, %v169_v42 }
  0xd3   : > { %685 = vrot.lane.b32.xlu0 %v681_v46, %s1855_s24  ;;  %v2207_v2 = vpop.permute.xlu1 %366  ;;  %v436_v59 = vpop.permute.xlu2 %435  ;;  %v240_v27 = vadd.f32 %v2094_v38, %v182_v0  ;;  %v239_v7 = vadd.f32 %v2101_v41, %v181_v18  ;;  %v165_v38 = vmul.f32 %v163_v19, %v1951_v9  ;;  %v755_v46 = vstv %s2229_s21  ;;  %s2315_s21 = sld [smem:[#allocation2 + $0xf]] }
  0xd4   : > { %v267_v52 = vadd.f32 %v2110_v47, %v211_v1 }
  0xd5   : > { %v365_v5 = vpop.permute.xlu0 %364  ;;  %v296_v43 = vadd.f32 %v2139_v3, %v240_v27  ;;  %v295_v41 = vadd.f32 %v2079_v31, %v239_v7  ;;  %v199_v50 = vadd.f32 %v2084_v33, %v165_v38  ;;  %v756_v31 = vmul.f32 %v755_v46, %v2173_v29 }
  0xd6   : > { %v370_v16 = vadd.f32 %v365_v5, %v310_v61  ;;  %v742_v61 = vmul.f32 %v2202_v58, %v740_v25  ;;  %v768_v5 = vstv %s2249_s22  ;;  %v536_v38 = vstv %s2295_s3  ;;  %s2328_s22 = sld [smem:[#allocation2 + $0x4c]] }
  0xd7   : > { %v356_v3 = vadd.f32 %v2124_v55, %v296_v43  ;;  %v355_v53 = vadd.f32 %v2179_v35, %v295_v41  ;;  %v757_v55 = vmul.f32 %v755_v46, %v2211_v4  ;;  %v255_v57 = vadd.f32 %v2114_v49, %v199_v50  ;;  %s1654_s3 = sld [smem:[#allocation2 + $0x50]] }
  0xd8   : > { %v2220_v62 = vadd.f32 %v421_v36, %v370_v16  ;;  %v770_v13 = vmul.f32 %v2202_v58, %v768_v5  ;;  %v537_v46 = vmul.f32 %v2073_v28, %v536_v38 }
  0xd9   : > { %717 = vrot.lane.b32.xlu1 %v713_v15, %s1856_s26  ;;  %719 = vrot.lane.b32.xlu2 %v714_v6, %s1856_s26  ;;  %v311_v47 = vadd.f32 %v2096_v39, %v255_v57  ;;  %v783_v15 = vstv %s2255_s23  ;;  %v769_v39 = vmul.f32 %v2198_v54, %v768_v5  ;;  %s2346_s23 = sld [smem:[#allocation2 + $0x1e]] }
  0xda   : > { %v784_v16 = vmul.f32 %v783_v15, %v2173_v29 }
  0xdb   : > { %706 = vrot.lane.b32.xlu0 %v701_v17, %s1856_s26  ;;  %v393_v8 = vpop.permute.xlu1 %392  ;;  %v462_v56 = vpop.permute.xlu2 %461  ;;  %v371_v6 = vadd.f32 %v2207_v2, %v311_v47 }
  0xdc   : > { %v2234_v36 = vadd.f32 %v393_v8, %v342_v30 }
  0xdd   : > { %v380_v37 = vpop.permute.xlu0 %379 }
  0xde   : > { %v384_v44 = vadd.f32 %v380_v37, %v324_v34  ;;  %v811_v34 = vstv %s1639_s28  ;;  %s2355_s28 = sld [smem:[#allocation2 + $0x40]] }
  0xdf   : > { %v813_v42 = vmul.f32 %v811_v34, %v2211_v4 }
  0xe0   : > { %v2245_v11 = vadd.f32 %v436_v59, %v384_v44  ;;  %v323_v59 = vadd.f32 %v2156_v14, %v267_v52  ;;  %v812_v44 = vmul.f32 %v811_v34, %v2173_v29 }
  0xe1   : > { %734 = vrot.lane.b32.xlu1 %v729_v21, %s1857_s30  ;;  %745 = vrot.lane.b32.xlu2 %v741_v48, %s1857_s30 }
  0xe2   : > { %v383_v35 = vadd.f32 %v2135_v63, %v323_v59  ;;  %v796_v63 = vstv %s1638_s27  ;;  %v543_v59 = vstv %s2315_s21  ;;  %s2350_s27 = sld [smem:[#allocation2 + $0x4f]] }
  0xe3   : > { %732 = vrot.lane.b32.xlu0 %v728_v45, %s1857_s30  ;;  %v408_v9 = vpop.permute.xlu1 %407  ;;  %v479_v19 = vpop.permute.xlu2 %478  ;;  %v797_v24 = vmul.f32 %v2198_v54, %v796_v63  ;;  %v798_v25 = vmul.f32 %v2202_v58, %v796_v63  ;;  %v545_v47 = vmul.f32 %v543_v59, %v2070_v26  ;;  %s1659_s21 = sld [smem:[#allocation2 + $0x22]] }
  0xe4   : > { %v412_v20 = vadd.f32 %v408_v9, %v356_v3 }
  0xe5   : > { %v406_v22 = vpop.permute.xlu0 %405 }
  0xe6   : > { %v411_v60 = vadd.f32 %v406_v22, %v355_v53  ;;  %v852_v22 = vstv %s2310_s16  ;;  %s1657_s16 = sld [smem:[#allocation2 + $0x21]] }
  0xe7   : > { %v854_v5 = vmul.f32 %v2202_v58, %v852_v22 }
  0xe8   : > { %v2266_v33 = vadd.f32 %v462_v56, %v411_v60  ;;  %v785_v56 = vmul.f32 %v783_v15, %v2211_v4  ;;  %v531_v60 = vstv %s2305_s7  ;;  %v936_v34 = vstv %s2350_s27  ;;  %s1656_s7 = sld [smem:[#allocation2 + $0x51]] }
  0xe9   : > { %760 = vrot.lane.b32.xlu1 %v756_v31, %s1857_s30  ;;  %762 = vrot.lane.b32.xlu2 %v757_v55, %s1857_s30  ;;  %s1662_s27 = sld [smem:[#allocation2 + $0x54]] }
  0xeb   : > { %747 = vrot.lane.b32.xlu0 %v742_v61, %s1857_s30  ;;  %v434_v49 = vpop.permute.xlu1 %433  ;;  %v505_v14 = vpop.permute.xlu2 %504 }
  0xec   : > { %v439_v10 = vadd.f32 %v434_v49, %v383_v35 }
  0xed   : > { %v423_v12 = vpop.permute.xlu0 %422 }
  0xee   : > { %v427_v17 = vadd.f32 %v423_v12, %v371_v6  ;;  %v853_v6 = vmul.f32 %v2198_v54, %v852_v22  ;;  %v532_v12 = vmul.f32 %v531_v60, %v2082_v32  ;;  %v964_v22 = vstv %s1654_s3  ;;  %s1667_s3 = sld [smem:[#allocation2 + $0x25]] }
  0xf0   : > { %v2279_v0 = vadd.f32 %v479_v19, %v427_v17 }
  0xf1   : > { %775 = vrot.lane.b32.xlu1 %v770_v13, %s1857_s30  ;;  %788 = vrot.lane.b32.xlu2 %v784_v16, %s1858_s8  ;;  %v880_v13 = vstv %s2328_s22  ;;  %s1660_s22 = sld [smem:[#allocation2 + $0x53]] }
  0xf3   : > { %773 = vrot.lane.b32.xlu0 %v769_v39, %s1857_s30  ;;  %v451_v2 = vpop.permute.xlu1 %450  ;;  %v520_v18 = vpop.permute.xlu2 %519 }
  0xf4   : > { %v455_v23 = vadd.f32 %v451_v2, %v2188_v51  ;;  %v824_v51 = vstv %s2283_s29  ;;  %v882_v2 = vmul.f32 %v2202_v58, %v880_v13  ;;  %s1653_s29 = sld [smem:[#allocation2 + $0x1f]] }
  0xf5   : > { %v449_v30 = vpop.permute.xlu0 %448  ;;  %v825_v7 = vmul.f32 %v2198_v54, %v824_v51  ;;  %v826_v53 = vmul.f32 %v2202_v58, %v824_v51  ;;  %v923_v58 = vstv %s2346_s23  ;;  %v548_v51 = vstv %s2355_s28  ;;  %s2439_s23 = sld [smem:[#allocation2 + $0x23]] }
  0xf6   : > { %v454_v8 = vadd.f32 %v449_v30, %v2234_v36  ;;  %s1665_s28 = sld [smem:[#allocation2 + $0x24]] }
  0xf8   : > { %v2291_v27 = vadd.f32 %v505_v14, %v454_v8  ;;  %v533_v14 = vmul.f32 %v531_v60, %v2070_v26 }
  0xf9   : > { %801 = vrot.lane.b32.xlu1 %v797_v24, %s1858_s8  ;;  %803 = vrot.lane.b32.xlu2 %v798_v25, %s1858_s8  ;;  %v538_v24 = vmul.f32 %v2099_v40, %v536_v38  ;;  %v549_v38 = vmul.f32 %v2073_v28, %v548_v51 }
  0xfb   : > { %790 = vrot.lane.b32.xlu0 %v785_v56, %s1858_s8  ;;  %v477_v37 = vpop.permute.xlu1 %476  ;;  %v574_v21 = vpop.permute.xlu2 %573  ;;  %v2374_v56 = vld [vmem:[%s1934_s4 + $0x1c] sm:$0xff] }
  0xfc   : > { %v482_v36 = vadd.f32 %v477_v37, %v2220_v62  ;;  %v839_v62 = vstv %s1641_s6  ;;  %s2393_s6 = sld [smem:[#allocation2 + $0x20]] }
  0xfd   : > { %v464_v48 = vpop.permute.xlu0 %463  ;;  %v840_v19 = vmul.f32 %v839_v62, %v2173_v29  ;;  %v841_v50 = vmul.f32 %v839_v62, %v2211_v4 }
  0xfe   : > { %v468_v43 = vadd.f32 %v464_v48, %v412_v20  ;;  %v534_v39 = vadd.f32 %v532_v12, %v482_v36  ;;  %v2381_v36 = vld [vmem:[%s1934_s4 + $0x4] sm:$0xff] }
 0x100   : > { %v2303_v45 = vadd.f32 %v520_v18, %v468_v43  ;;  %v550_v43 = vmul.f32 %v2099_v40, %v548_v51 }
 0x101   : > { %818 = vrot.lane.b32.xlu1 %v813_v42, %s1858_s8  ;;  %829 = vrot.lane.b32.xlu2 %v825_v7, %s1858_s8  ;;  %v937_v42 = vmul.f32 %v2374_v56, %v936_v34 }
 0x103   : > { %816 = vrot.lane.b32.xlu0 %v812_v44, %s1858_s8  ;;  %v492_v1 = vpop.permute.xlu1 %491  ;;  %v591_v41 = vpop.permute.xlu2 %590  ;;  %v924_v44 = vmul.f32 %v923_v58, %v2381_v36 }
 0x104   : > { %v2318_v3 = vadd.f32 %v492_v1, %v2245_v11  ;;  %v867_v11 = vstv %s2312_s17  ;;  %v552_v1 = vadd.f32 %v550_v43, %v2303_v45  ;;  %s2418_s17 = sld [smem:[#allocation2 + $0x52]]  ;;  %v1067_v43 = vstv %s2439_s23 }
 0x105   : > { %v490_v9 = vpop.permute.xlu0 %489  ;;  %v868_v15 = vmul.f32 %v867_v11, %v2173_v29  ;;  %v869_v30 = vmul.f32 %v867_v11, %v2211_v4  ;;  %v979_v11 = vstv %s2393_s6  ;;  %s1668_s6 = sld [smem:[#allocation2 + $0x56]] }
 0x106   : > { %v495_v52 = vadd.f32 %v490_v9, %v439_v10  ;;  %v2398_v9 = vld [vmem:[%s1934_s4 + $0x24] sm:$0xff]  ;;  %s2537_s23 = sld [smem:[#allocation2 + $0x1c]] }
 0x107   : > { %v938_v45 = vmul.f32 %v2398_v9, %v936_v34 }
 0x108   : > { %v539_v20 = vadd.f32 %v537_v46, %v495_v52 }
 0x109   : > { %844 = vrot.lane.b32.xlu1 %v840_v19, %s1859_s25  ;;  %846 = vrot.lane.b32.xlu2 %v841_v50, %s1859_s25 }
 0x10a   : > { %v2330_v31 = vadd.f32 %v574_v21, %v539_v20  ;;  %v540_v21 = vadd.f32 %v538_v24, %v2318_v3 }
 0x10b   : > { %831 = vrot.lane.b32.xlu0 %v826_v53, %s1858_s8  ;;  %v518_v55 = vpop.permute.xlu1 %517  ;;  %v617_v57 = vpop.permute.xlu2 %616 }
 0x10c   : > { %v2336_v61 = vadd.f32 %v518_v55, %v2266_v33  ;;  %v535_v33 = vadd.f32 %v533_v14, %v2279_v0  ;;  %v881_v0 = vmul.f32 %v2198_v54, %v880_v13  ;;  %v2370_v54 = vld [vmem:[%s1934_s4 + $0xc] sm:$0xff] }
 0x10d   : > { %v507_v35 = vpop.permute.xlu0 %506 }
 0x10e   : > { %v511_v49 = vadd.f32 %v507_v35, %v455_v23  ;;  %v544_v23 = vmul.f32 %v543_v59, %v2082_v32  ;;  %v551_v28 = vadd.f32 %v549_v38, %v2336_v61  ;;  %v966_v61 = vmul.f32 %v2398_v9, %v964_v22 }
 0x110   : > { %v547_v10 = vadd.f32 %v545_v47, %v511_v49  ;;  %v546_v8 = vadd.f32 %v544_v23, %v2291_v27  ;;  %v925_v27 = vmul.f32 %v923_v58, %v2370_v54  ;;  %v980_v47 = vmul.f32 %v979_v11, %v2381_v36 }
 0x111   : > { %859 = vrot.lane.b32.xlu1 %v854_v5, %s1859_s25  ;;  %872 = vrot.lane.b32.xlu2 %v868_v15, %s1859_s25  ;;  %v965_v5 = vmul.f32 %v2374_v56, %v964_v22  ;;  %v992_v49 = vstv %s1656_s7  ;;  %v1035_v58 = vstv %s1659_s21  ;;  %s1672_s7 = sld [smem:[#allocation2 + $0x58]] }
 0x112   : > { %v2352_v29 = vadd.f32 %v591_v41, %v547_v10  ;;  %v951_v41 = vstv %s1653_s29  ;;  %v993_v12 = vmul.f32 %v2374_v56, %v992_v49  ;;  %v1036_v51 = vmul.f32 %v1035_v58, %v2381_v36  ;;  %s2469_s29 = sld [smem:[#allocation2 + $0x55]]  ;;  %v2474_v22 = vld [vmem:[%s1934_s4 + $0xd] sm:$0xff] }
 0x113   : > { %857 = vrot.lane.b32.xlu0 %v853_v6, %s1859_s25  ;;  %v563_v26 = vpop.permute.xlu1 %562  ;;  %v632_v16 = vpop.permute.xlu2 %631  ;;  %v952_v50 = vmul.f32 %v951_v41, %v2381_v36  ;;  %v953_v52 = vmul.f32 %v951_v41, %v2370_v54  ;;  %s2525_s21 = sld [smem:[#allocation2 + $0x4d]] }
 0x114   : > { %v2357_v17 = vadd.f32 %v563_v26, %v535_v33  ;;  %v994_v33 = vmul.f32 %v2398_v9, %v992_v49  ;;  %v981_v26 = vmul.f32 %v979_v11, %v2370_v54 }
 0x115   : > { %v561_v63 = vpop.permute.xlu0 %560 }
 0x116   : > { %v566_v18 = vadd.f32 %v561_v63, %v534_v39  ;;  %v1020_v39 = vstv %s2418_s17  ;;  %s2514_s17 = sld [smem:[#allocation2 + $0x5a]] }
 0x117   : > { %v1021_v23 = vmul.f32 %v2374_v56, %v1020_v39 }
 0x118   : > { %v2364_v25 = vadd.f32 %v617_v57, %v566_v18 }
 0x119   : > { %885 = vrot.lane.b32.xlu1 %v881_v0, %s1859_s25  ;;  %887 = vrot.lane.b32.xlu2 %v882_v2, %s1859_s25 }
 0x11b   : > { %874 = vrot.lane.b32.xlu0 %v869_v30, %s1859_s25  ;;  %v589_v32 = vpop.permute.xlu1 %588  ;;  %v658_v4 = vpop.permute.xlu2 %657 }
 0x11c   : > { %v594_v37 = vadd.f32 %v589_v32, %v546_v8 }
 0x11d   : > { %v576_v48 = vpop.permute.xlu0 %575 }
 0x11e   : > { %v580_v7 = vadd.f32 %v576_v48, %v540_v21  ;;  %v1022_v48 = vmul.f32 %v2398_v9, %v1020_v39 }
 0x120   : > { %v2388_v62 = vadd.f32 %v632_v16, %v580_v7  ;;  %v2451_v7 = vld [vmem:[%s1934_s4 + $0x5] sm:$0xff] }
 0x121   : > { %930 = vrot.lane.b32.xlu1 %v925_v27, %s1853_s5  ;;  %941 = vrot.lane.b32.xlu2 %v937_v42, %s1853_s5  ;;  %v1048_v42 = vstv %s1660_s22  ;;  %s1685_s22 = sld [smem:[#allocation2 + $0x2d]] }
 0x122   : > { %v1050_v41 = vmul.f32 %v2398_v9, %v1048_v42 }
 0x123   : > { %928 = vrot.lane.b32.xlu0 %v924_v44, %s1853_s5  ;;  %v604_v40 = vpop.permute.xlu1 %603  ;;  %v675_v3 = vpop.permute.xlu2 %674 }
 0x124   : > { %v608_v46 = vadd.f32 %v604_v40, %v552_v1  ;;  %v1068_v40 = vmul.f32 %v1067_v43, %v2451_v7 }
 0x125   : > { %v602_v19 = vpop.permute.xlu0 %601 }
 0x126   : > { %v607_v53 = vadd.f32 %v602_v19, %v551_v28  ;;  %v2464_v19 = vld [vmem:[%s1934_s4 + $0x1d] sm:$0xff] }
 0x128   : > { %v2403_v20 = vadd.f32 %v658_v4, %v607_v53 }
 0x129   : > { %956 = vrot.lane.b32.xlu1 %v952_v50, %s1853_s5  ;;  %958 = vrot.lane.b32.xlu2 %v953_v52, %s1853_s5  ;;  %v1080_v50 = vstv %s1662_s27  ;;  %v2467_v52 = vld [vmem:[%s1934_s4 + $0x25] sm:$0xff]  ;;  %s2542_s27 = sld [smem:[#allocation2 + $0x5e]] }
 0x12b   : > { %943 = vrot.lane.b32.xlu0 %v938_v45, %s1853_s5  ;;  %v630_v55 = vpop.permute.xlu1 %629  ;;  %v705_v57 = vpop.permute.xlu2 %704 }
 0x12c   : > { %v635_v59 = vadd.f32 %v630_v55, %v2330_v31  ;;  %v1081_v55 = vmul.f32 %v2464_v19, %v1080_v50 }
 0x12d   : > { %v619_v60 = vpop.permute.xlu0 %618 }
 0x12e   : > { %v623_v35 = vadd.f32 %v619_v60, %v2357_v17  ;;  %v1007_v17 = vstv %s1657_s16  ;;  %v1069_v60 = vmul.f32 %v1067_v43, %v2474_v22  ;;  %s1675_s16 = sld [smem:[#allocation2 + $0x29]] }
 0x12f   : > { %v1009_v18 = vmul.f32 %v1007_v17, %v2370_v54  ;;  %v1008_v24 = vmul.f32 %v1007_v17, %v2381_v36 }
 0x130   : > { %v2414_v15 = vadd.f32 %v675_v3, %v623_v35  ;;  %v1108_v35 = vstv %s2469_s29  ;;  %s2553_s29 = sld [smem:[#allocation2 + $0x1d]] }
 0x131   : > { %971 = vrot.lane.b32.xlu1 %v966_v61, %s1853_s5  ;;  %984 = vrot.lane.b32.xlu2 %v980_v47, %s1854_s14  ;;  %v1095_v47 = vstv %s1665_s28  ;;  %s2550_s28 = sld [smem:[#allocation2 + $0x2f]] }
 0x133   : > { %969 = vrot.lane.b32.xlu0 %v965_v5, %s1853_s5  ;;  %v647_v31 = vpop.permute.xlu1 %646  ;;  %v720_v14 = vpop.permute.xlu2 %719 }
 0x134   : > { %v651_v6 = vadd.f32 %v647_v31, %v2352_v29 }
 0x135   : > { %v645_v10 = vpop.permute.xlu0 %644 }
 0x136   : > { %v650_v13 = vadd.f32 %v645_v10, %v594_v37  ;;  %v1037_v37 = vmul.f32 %v1035_v58, %v2370_v54 }
 0x138   : > { %v2425_v16 = vadd.f32 %v705_v57, %v650_v13  ;;  %v1082_v57 = vmul.f32 %v2467_v52, %v1080_v50  ;;  %v1123_v13 = vstv %s1667_s3  ;;  %s2569_s3 = sld [smem:[#allocation2 + $0x60]] }
 0x139   : > { %997 = vrot.lane.b32.xlu1 %v993_v12, %s1854_s14  ;;  %999 = vrot.lane.b32.xlu2 %v994_v33, %s1854_s14  ;;  %v1096_v12 = vmul.f32 %v1095_v47, %v2451_v7 }
 0x13b   : > { %986 = vrot.lane.b32.xlu0 %v981_v26, %s1854_s14  ;;  %v673_v29 = vpop.permute.xlu1 %672  ;;  %v746_v63 = vpop.permute.xlu2 %745 }
 0x13c   : > { %v678_v0 = vadd.f32 %v673_v29, %v2364_v25  ;;  %v1124_v29 = vmul.f32 %v1123_v13, %v2451_v7 }
 0x13d   : > { %v660_v2 = vpop.permute.xlu0 %659 }
 0x13e   : > { %v664_v30 = vadd.f32 %v660_v2, %v608_v46  ;;  %v1049_v46 = vmul.f32 %v2374_v56, %v1048_v42  ;;  %v1110_v2 = vmul.f32 %v2467_v52, %v1108_v35 }
 0x140   : > { %v2435_v8 = vadd.f32 %v720_v14, %v664_v30  ;;  %v1097_v14 = vmul.f32 %v1095_v47, %v2474_v22  ;;  %v2548_v47 = vld [vmem:[%s1934_s4 + $0xe] sm:$0xff] }
 0x141   : > { %1014 = vrot.lane.b32.xlu1 %v1009_v18, %s1854_s14  ;;  %1025 = vrot.lane.b32.xlu2 %v1021_v23, %s1854_s14  ;;  %v1136_v23 = vstv %s1668_s6  ;;  %s2588_s6 = sld [smem:[#allocation2 + $0x26]] }
 0x143   : > { %1012 = vrot.lane.b32.xlu0 %v1008_v24, %s1854_s14  ;;  %v688_v25 = vpop.permute.xlu1 %687  ;;  %v763_v34 = vpop.permute.xlu2 %762 }
 0x144   : > { %v692_v32 = vadd.f32 %v688_v25, %v2388_v62 }
 0x145   : > { %v686_v4 = vpop.permute.xlu0 %685 }
 0x146   : > { %v691_v21 = vadd.f32 %v686_v4, %v635_v59 }
 0x148   : > { %v2446_v27 = vadd.f32 %v746_v63, %v691_v21  ;;  %v1125_v63 = vmul.f32 %v1123_v13, %v2474_v22  ;;  %v1192_v21 = vstv %s1672_s7  ;;  %s1673_s7 = sld [smem:[#allocation2 + $0x28]] }
 0x149   : > { %1040 = vrot.lane.b32.xlu1 %v1036_v51, %s1855_s24  ;;  %1042 = vrot.lane.b32.xlu2 %v1037_v37, %s1855_s24  ;;  %v1137_v51 = vmul.f32 %v2464_v19, %v1136_v23 }
 0x14b   : > { %1027 = vrot.lane.b32.xlu0 %v1022_v48, %s1854_s14  ;;  %v718_v44 = vpop.permute.xlu1 %717  ;;  %v789_v38 = vpop.permute.xlu2 %788 }
 0x14c   : > { %v723_v62 = vadd.f32 %v718_v44, %v2403_v20  ;;  %v1193_v44 = vmul.f32 %v2464_v19, %v1192_v21 }
 0x14d   : > { %v707_v1 = vpop.permute.xlu0 %706 }
 0x14e   : > { %v711_v3 = vadd.f32 %v707_v1, %v651_v6  ;;  %v1109_v6 = vmul.f32 %v2464_v19, %v1108_v35 }
 0x150   : > { %v2459_v28 = vadd.f32 %v763_v34, %v711_v3  ;;  %v1138_v34 = vmul.f32 %v2467_v52, %v1136_v23  ;;  %v1248_v3 = vstv %s2514_s17  ;;  %s2623_s17 = sld [smem:[#allocation2 + $0x2c]] }
 0x151   : > { %1055 = vrot.lane.b32.xlu1 %v1050_v41, %s1855_s24  ;;  %1072 = vrot.lane.b32.xlu2 %v1068_v40, %s1856_s26  ;;  %v1235_v40 = vstv %s1675_s16  ;;  %s1674_s16 = sld [smem:[#allocation2 + $0x59]] }
 0x153   : > { %1053 = vrot.lane.b32.xlu0 %v1049_v46, %s1855_s24  ;;  %v735_v53 = vpop.permute.xlu1 %734  ;;  %v804_v45 = vpop.permute.xlu2 %803 }
 0x154   : > { %v739_v20 = vadd.f32 %v735_v53, %v2414_v15 }
 0x155   : > { %v733_v11 = vpop.permute.xlu0 %732 }
 0x156   : > { %v738_v59 = vadd.f32 %v733_v11, %v678_v0 }
 0x158   : > { %v2479_v61 = vadd.f32 %v789_v38, %v738_v59  ;;  %v1194_v38 = vmul.f32 %v2467_v52, %v1192_v21  ;;  %v904_v59 = vstv %s2525_s21  ;;  %v1388_v21 = vstv %s2569_s3  ;;  %s1684_s21 = sld [smem:[#allocation2 + $0x5d]]  ;;  %s1700_s3 = sshll.u32 %s1898_s13, 4 }
 0x159   : > { %1085 = vrot.lane.b32.xlu1 %v1081_v55, %s1856_s26  ;;  %1087 = vrot.lane.b32.xlu2 %v1082_v57, %s1856_s26  ;;  %v1236_v55 = vmul.f32 %v1235_v40, %v2451_v7 }
 0x15b   : > { %1074 = vrot.lane.b32.xlu0 %v1069_v60, %s1856_s26  ;;  %v761_v5 = vpop.permute.xlu1 %760  ;;  %v830_v15 = vpop.permute.xlu2 %829  ;;  %s2493_s26 = sld [smem:[#allocation2 + $0x27]]  ;;  %v2545_v60 = vld [vmem:[%s1934_s4 + $0x6] sm:$0xff] }
 0x15c   : > { %v766_v49 = vadd.f32 %v761_v5, %v2425_v16 }
 0x15d   : > { %v748_v31 = vpop.permute.xlu0 %747 }
 0x15e   : > { %v752_v10 = vadd.f32 %v748_v31, %v692_v32 }
 0x160   : > { %v2489_v33 = vadd.f32 %v804_v45, %v752_v10  ;;  %v1237_v45 = vmul.f32 %v1235_v40, %v2474_v22 }
 0x161   : > { %1102 = vrot.lane.b32.xlu1 %v1097_v14, %s1857_s30  ;;  %1113 = vrot.lane.b32.xlu2 %v1109_v6, %s1857_s30  ;;  %v1179_v30 = vstv %s2493_s26  ;;  %s1650_s26 = sld [smem:[#allocation2 + $0x4e]] }
 0x162   : > { %v1180_v32 = vmul.f32 %v1179_v30, %v2451_v7  ;;  %v1181_v1 = vmul.f32 %v1179_v30, %v2474_v22  ;;  %v2579_v30 = vld [vmem:[%s1934_s4 + $0x1e] sm:$0xff] }
 0x163   : > { %1100 = vrot.lane.b32.xlu0 %v1096_v12, %s1857_s30  ;;  %v776_v26 = vpop.permute.xlu1 %775  ;;  %v847_v16 = vpop.permute.xlu2 %846  ;;  %v1250_v12 = vmul.f32 %v2467_v52, %v1248_v3 }
 0x164   : > { %v780_v17 = vadd.f32 %v776_v26, %v2435_v8  ;;  %v1332_v26 = vstv %s2542_s27  ;;  %s1678_s27 = sld [smem:[#allocation2 + $0x5b]] }
 0x165   : > { %v774_v39 = vpop.permute.xlu0 %773 }
 0x166   : > { %v779_v0 = vadd.f32 %v774_v39, %v723_v62 }
 0x168   : > { %v2500_v18 = vadd.f32 %v830_v15, %v779_v0  ;;  %v899_v0 = vstv %s2537_s23  ;;  %s1692_s23 = sld [smem:[#allocation2 + $0x61]] }
 0x169   : > { %1128 = vrot.lane.b32.xlu1 %v1124_v29, %s1857_s30  ;;  %1130 = vrot.lane.b32.xlu2 %v1125_v63, %s1857_s30  ;;  %v911_v63 = vstv %s2553_s29 }
 0x16a   : > { %v913_v23 = vmul.f32 %v911_v63, %v2370_v54 }
 0x16b   : > { %1115 = vrot.lane.b32.xlu0 %v1110_v2, %s1857_s30  ;;  %v802_v24 = vpop.permute.xlu1 %801  ;;  %v873_v8 = vpop.permute.xlu2 %872 }
 0x16c   : > { %v807_v58 = vadd.f32 %v802_v24, %v2446_v27 }
 0x16d   : > { %v791_v25 = vpop.permute.xlu0 %790 }
 0x16e   : > { %v795_v4 = vadd.f32 %v791_v25, %v739_v20  ;;  %v1249_v20 = vmul.f32 %v2464_v19, %v1248_v3  ;;  %v906_v3 = vmul.f32 %v2398_v9, %v904_v59 }
 0x170   : > { %v2510_v37 = vadd.f32 %v847_v16, %v795_v4  ;;  %v1375_v16 = vstv %s2550_s28 }
 0x171   : > { %1143 = vrot.lane.b32.xlu1 %v1138_v34, %s1857_s30  ;;  %1184 = vrot.lane.b32.xlu2 %v1180_v32, %s1858_s8  ;;  %v901_v34 = vmul.f32 %v899_v0, %v2370_v54  ;;  %v1333_v32 = vmul.f32 %v2579_v30, %v1332_v26  ;;  %v1377_v40 = vmul.f32 %v1375_v16, %v2548_v47 }
 0x173   : > { %1141 = vrot.lane.b32.xlu0 %v1137_v51, %s1857_s30  ;;  %v819_v48 = vpop.permute.xlu1 %818  ;;  %v888_v27 = vpop.permute.xlu2 %887  ;;  %v900_v51 = vmul.f32 %v899_v0, %v2381_v36 }
 0x174   : > { %v823_v42 = vadd.f32 %v819_v48, %v2459_v28 }
 0x175   : > { %v817_v43 = vpop.permute.xlu0 %816 }
 0x176   : > { %v822_v62 = vadd.f32 %v817_v43, %v766_v49  ;;  %v905_v49 = vmul.f32 %v2374_v56, %v904_v59 }
 0x178   : > { %v2521_v41 = vadd.f32 %v873_v8, %v822_v62 }
 0x179   : > { %1197 = vrot.lane.b32.xlu1 %v1193_v44, %s1858_s8  ;;  %1199 = vrot.lane.b32.xlu2 %v1194_v38, %s1858_s8  ;;  %v1389_v38 = vmul.f32 %v2579_v30, %v1388_v21 }
 0x17b   : > { %1186 = vrot.lane.b32.xlu0 %v1181_v1, %s1858_s8  ;;  %v845_v46 = vpop.permute.xlu1 %844  ;;  %v942_v28 = vpop.permute.xlu2 %941  ;;  %v912_v1 = vmul.f32 %v911_v63, %v2381_v36  ;;  %v916_v36 = vstv %s1650_s26  ;;  %v1220_v63 = vstv %s1674_s16  ;;  %s1496_s26 = scalar_lea.hbm %s2741_s2, %s1700_s3 }
 0x17c   : > { %v2530_v50 = vadd.f32 %v845_v46, %v2479_v61  ;;  %v1319_v61 = vstv %s1685_s22  ;;  %s2646_s22 = sld [smem:[#allocation2 + $0x5f]]  ;;  %s1499_s16 = sshll.u32 %s1496_s26, 4  ;;  %s1500_s16 = int_to_ptr.hbm [resolvable:$true] %s1499_s16 }
 0x17d   : > { %v832_v53 = vpop.permute.xlu0 %831  ;;  %v1320_v14 = vmul.f32 %v1319_v61, %v2545_v60  ;;  %v1321_v6 = vmul.f32 %v1319_v61, %v2548_v47 }
 0x17e   : > { %v836_v11 = vadd.f32 %v832_v53, %v780_v17  ;;  %v902_v43 = vadd.f32 %v900_v51, %v2530_v50  ;;  %v1151_v50 = vstv %s2588_s6 }
 0x17f   : > { %v1153_v61 = vmul.f32 %v1151_v50, %v2474_v22 }
 0x180   : > { %v2535_v57 = vadd.f32 %v888_v27, %v836_v11 }
 0x181   : > { %1242 = vrot.lane.b32.xlu1 %v1237_v45, %s1859_s25  ;;  %1253 = vrot.lane.b32.xlu2 %v1249_v20, %s1859_s25 }
 0x183   : > { %1240 = vrot.lane.b32.xlu0 %v1236_v55, %s1859_s25  ;;  %v860_v35 = vpop.permute.xlu1 %859  ;;  %v959_v5 = vpop.permute.xlu2 %958 }
 0x184   : > { %v2556_v15 = vadd.f32 %v860_v35, %v2489_v33  ;;  %v2565_v33 = vld [vmem:[%s1934_s4 + $0x26] sm:$0xff]  ;;  %s2592_s4 = sld [smem:[#allocation2 + $0x57]] }
 0x185   : > { %v858_v31 = vpop.permute.xlu0 %857  ;;  %v1334_v8 = vmul.f32 %v2565_v33, %v1332_v26 }
 0x186   : > { %v863_v10 = vadd.f32 %v858_v31, %v807_v58  ;;  %v1376_v58 = vmul.f32 %v1375_v16, %v2545_v60  ;;  %v908_v55 = vadd.f32 %v906_v3, %v2556_v15  ;;  %v917_v31 = vmul.f32 %v2374_v56, %v916_v36 }
 0x188   : > { %v907_v13 = vadd.f32 %v905_v49, %v863_v10  ;;  %v918_v49 = vmul.f32 %v2398_v9, %v916_v36 }
 0x189   : > { %1324 = vrot.lane.b32.xlu1 %v1320_v14, %s1853_s5  ;;  %1326 = vrot.lane.b32.xlu2 %v1321_v6, %s1853_s5  ;;  %v1207_v6 = vstv %s1673_s7 }
 0x18a   : > { %v2571_v17 = vadd.f32 %v942_v28, %v907_v13  ;;  %v914_v28 = vadd.f32 %v912_v1, %v2521_v41  ;;  %v1164_v53 = vstv %s2592_s4  ;;  %v1152_v41 = vmul.f32 %v1151_v50, %v2451_v7 }
 0x18b   : > { %1255 = vrot.lane.b32.xlu0 %v1250_v12, %s1859_s25  ;;  %v886_v39 = vpop.permute.xlu1 %885  ;;  %v985_v29 = vpop.permute.xlu2 %984  ;;  %v1165_v35 = vmul.f32 %v2464_v19, %v1164_v53  ;;  %v920_v15 = vadd.f32 %v918_v49, %v2535_v57  ;;  %v1208_v26 = vmul.f32 %v1207_v6, %v2451_v7  ;;  %v1209_v16 = vmul.f32 %v1207_v6, %v2474_v22 }
 0x18c   : > { %v891_v2 = vadd.f32 %v886_v39, %v2500_v18  ;;  %v903_v18 = vadd.f32 %v901_v34, %v2510_v37  ;;  %v1390_v37 = vmul.f32 %v2565_v33, %v1388_v21 }
 0x18d   : > { %v875_v24 = vpop.permute.xlu0 %874 }
 0x18e   : > { %v879_v25 = vadd.f32 %v875_v24, %v823_v42  ;;  %v919_v9 = vadd.f32 %v917_v31, %v891_v2  ;;  %v1222_v24 = vmul.f32 %v2467_v52, %v1220_v63 }
 0x190   : > { %v915_v4 = vadd.f32 %v913_v23, %v879_v25  ;;  %v1291_v23 = vstv %s2623_s17  ;;  %v1221_v25 = vmul.f32 %v2464_v19, %v1220_v63  ;;  %s1798_s17 = sshra.s32 %s1500_s16, 4  ;;  %s1799_s17 = int_to_ptr.hbm [resolvable:$true] %s1798_s17 }
 0x191   : > { %1339 = vrot.lane.b32.xlu1 %v1334_v8, %s1853_s5  ;;  %1380 = vrot.lane.b32.xlu2 %v1376_v58, %s1854_s14  ;;  %v1292_v8 = vmul.f32 %v1291_v23, %v2545_v60  ;;  %p1805_p3 = scmp.lt.s32.totalorder %s1799_s17, %s2741_s2 }
 0x192   : > { %v2594_v48 = vadd.f32 %v959_v5, %v915_v4 }
 0x193   : > { %1337 = vrot.lane.b32.xlu0 %v1333_v32, %s1853_s5  ;;  %v931_v54 = vpop.permute.xlu1 %930  ;;  %v1000_v27 = vpop.permute.xlu2 %999  ;;  %v1304_v32 = vstv %s1684_s21  ;;  %s1800_s21 = scalar_lea.hbm %s1799_s17, 16 }
 0x194   : > { %v935_v42 = vadd.f32 %v931_v54, %v903_v18  ;;  %v1305_v51 = vmul.f32 %v2579_v30, %v1304_v32  ;;  %v1306_v19 = vmul.f32 %v2565_v33, %v1304_v32  ;;  %v1293_v54 = vmul.f32 %v1291_v23, %v2548_v47  ;;  %p1801_p0 = scmp.ne.s32.totalorder %s1799_s17, %s1800_s21 }
 0x195   : > { %v929_v44 = vpop.permute.xlu0 %928 }
 0x196   : > { %v934_v62 = vadd.f32 %v929_v44, %v902_v43  ;;  %v1360_v43 = vstv %s2646_s22  ;;  %p1802_p1 = pnand %p1801_p0, %p1915_p5 }
 0x197   : > { %v1362_v36 = vmul.f32 %v2565_v33, %v1360_v43 }
 0x198   : > { %v2603_v46 = vadd.f32 %v985_v29, %v934_v62  ;;  %v1166_v29 = vmul.f32 %v2467_v52, %v1164_v53  ;;  %p1803_p2 = pneg %p1802_p1 }
 0x199   : > { %1393 = vrot.lane.b32.xlu1 %v1389_v38, %s1854_s14  ;;  %1395 = vrot.lane.b32.xlu2 %v1390_v37, %s1854_s14  ;;  %v1361_v37 = vmul.f32 %v2579_v30, %v1360_v43 }
 0x19b   : > { %1382 = vrot.lane.b32.xlu0 %v1377_v40, %s1854_s14  ;;  %v957_v45 = vpop.permute.xlu1 %956  ;;  %v1026_v20 = vpop.permute.xlu2 %1025 }
 0x19c   : > { %v962_v11 = vadd.f32 %v957_v45, %v914_v28 }
 0x19d   : > { %v944_v59 = vpop.permute.xlu0 %943 }
 0x19e   : > { %v948_v5 = vadd.f32 %v944_v59, %v908_v55  ;;  %v1416_v55 = vstv %s1692_s23 }
 0x19f   : > { %v1417_v49 = vmul.f32 %v2579_v30, %v1416_v55 }
 0x1a0   : > { %v2617_v14 = vadd.f32 %v1000_v27, %v948_v5  ;;  %v1418_v5 = vmul.f32 %v2565_v33, %v1416_v55 }
 0x1a1   : > { %1158 = vrot.lane.b32.xlu1 %v1153_v61, %s1858_s8  ;;  %1169 = vrot.lane.b32.xlu2 %v1165_v35, %s1858_s8 }
 0x1a3   : > { %1156 = vrot.lane.b32.xlu0 %v1152_v41, %s1858_s8  ;;  %v972_v10 = vpop.permute.xlu1 %971  ;;  %v1043_v12 = vpop.permute.xlu2 %1042 }
 0x1a4   : > { %v976_v13 = vadd.f32 %v972_v10, %v920_v15 }
 0x1a5   : > { %v970_v56 = vpop.permute.xlu0 %969 }
 0x1a6   : > { %v975_v39 = vadd.f32 %v970_v56, %v919_v9 }
 0x1a8   : > { %v2628_v57 = vadd.f32 %v1026_v20, %v975_v39 }
 0x1a9   : > { %1212 = vrot.lane.b32.xlu1 %v1208_v26, %s1859_s25  ;;  %1214 = vrot.lane.b32.xlu2 %v1209_v16, %s1859_s25 }
 0x1ab   : > { %1171 = vrot.lane.b32.xlu0 %v1166_v29, %s1858_s8  ;;  %v998_v0 = vpop.permute.xlu1 %997  ;;  %v2635_v7 = vpop.permute.xlu2 %1072  ;;  %s1687_s8 = sld [smem:[#allocation2 + $0x2e]] }
 0x1ac   : > { %v1003_v2 = vadd.f32 %v998_v0, %v2571_v17 }
 0x1ad   : > { %v987_v22 = vpop.permute.xlu0 %986 }
 0x1ae   : > { %v991_v58 = vadd.f32 %v987_v22, %v935_v42 }
 0x1b0   : > { %v1047_v34 = vadd.f32 %v1043_v12, %v991_v58 }
 0x1b1   : > { %1227 = vrot.lane.b32.xlu1 %v1222_v24, %s1859_s25  ;;  %1296 = vrot.lane.b32.xlu2 %v1292_v8, %s1853_s5  ;;  %v1347_v27 = vstv %s1687_s8 }
 0x1b2   : > { %v1349_v38 = vmul.f32 %v1347_v27, %v2548_v47  ;;  %v1348_v1 = vmul.f32 %v1347_v27, %v2545_v60 }
 0x1b3   : > { %1225 = vrot.lane.b32.xlu0 %v1221_v25, %s1859_s25  ;;  %v1015_v17 = vpop.permute.xlu1 %1014  ;;  %v2650_v21 = vpop.permute.xlu2 %1087  ;;  %s1691_s25 = sld [smem:[#allocation2 + $0x30]] }
 0x1b4   : > { %v2644_v4 = vadd.f32 %v1015_v17, %v2594_v48 }
 0x1b5   : > { %v1013_v52 = vpop.permute.xlu0 %1012 }
 0x1b6   : > { %v1018_v18 = vadd.f32 %v1013_v52, %v962_v11 }
 0x1b8   : > { %v1078_v23 = vadd.f32 %v2635_v7, %v1018_v18 }
 0x1b9   : > { %1309 = vrot.lane.b32.xlu1 %v1305_v51, %s1853_s5  ;;  %1311 = vrot.lane.b32.xlu2 %v1306_v19, %s1853_s5  ;;  %v1403_v3 = vstv %s1691_s25  ;;  %s1804_s25 = scalar_lea.hbm %s2741_s2, 32 }
 0x1ba   : > { %v1404_v53 = vmul.f32 %v1403_v3, %v2545_v60  ;;  %v1405_v45 = vmul.f32 %v1403_v3, %v2548_v47  ;;  %p1806_p4 = scmp.lt.s32.totalorder %s1804_s25, %s1800_s21 }
 0x1bb   : > { %1298 = vrot.lane.b32.xlu0 %v1293_v54, %s1853_s5  ;;  %v1041_v48 = vpop.permute.xlu1 %1040  ;;  %v1114_v40 = vpop.permute.xlu2 %1113  ;;  %s1681_s5 = sld [smem:[#allocation2 + $0x2b]] }
 0x1bc   : > { %v1046_v42 = vadd.f32 %v1041_v48, %v2603_v46  ;;  %p1807_p7 = por %p1806_p4, %p1805_p3 }
 0x1bd   : > { %v1028_v44 = vpop.permute.xlu0 %1027 }
 0x1be   : > { %v1032_v62 = vadd.f32 %v1028_v44, %v976_v13  ;;  %p1808_p8 = pnand %p1807_p7, %p1803_p2 }
 0x1c0   : > { %v1092_v25 = vadd.f32 %v2650_v21, %v1032_v62 }
 0x1c1   : > { %1354 = vrot.lane.b32.xlu1 %v1349_v38, %s1854_s14  ;;  %1365 = vrot.lane.b32.xlu2 %v1361_v37, %s1854_s14  ;;  %v1279_v51 = vstv %s1681_s5 }
 0x1c2   : > { %v1280_v7 = vmul.f32 %v1279_v51, %v2545_v60 }
 0x1c3   : > { %1352 = vrot.lane.b32.xlu0 %v1348_v1, %s1854_s14  ;;  %v1056_v28 = vpop.permute.xlu1 %1055  ;;  %v1131_v59 = vpop.permute.xlu2 %1130 }
 0x1c4   : > { %v1060_v46 = vadd.f32 %v1056_v28, %v2617_v14 }
 0x1c5   : > { %v1054_v50 = vpop.permute.xlu0 %1053 }
 0x1c6   : > { %v1059_v20 = vadd.f32 %v1054_v50, %v1003_v2 }
 0x1c8   : > { %v2668_v11 = vadd.f32 %v1114_v40, %v1059_v20 }
 0x1c9   : > { %1408 = vrot.lane.b32.xlu1 %v1404_v53, %s1855_s24  ;;  %1410 = vrot.lane.b32.xlu2 %v1405_v45, %s1855_s24 }
 0x1cb   : > { %1367 = vrot.lane.b32.xlu0 %v1362_v36, %s1854_s14  ;;  %v1086_v61 = vpop.permute.xlu1 %1085  ;;  %v1185_v14 = vpop.permute.xlu2 %1184  ;;  %s1682_s14 = sld [smem:[#allocation2 + $0x5c]] }
 0x1cc   : > { %v1091_v24 = vadd.f32 %v1086_v61, %v2628_v57  ;;  %v1281_v57 = vmul.f32 %v1279_v51, %v2548_v47 }
 0x1cd   : > { %v1075_v35 = vpop.permute.xlu0 %1074 }
 0x1ce   : > { %v1079_v8 = vadd.f32 %v1075_v35, %v2644_v4 }
 0x1d0   : > { %v1135_v54 = vadd.f32 %v1131_v59, %v1079_v8  ;;  %v1272_v8 = vstv %s1678_s27 }
 0x1d1   : > { %1423 = vrot.lane.b32.xlu1 %v1418_v5, %s1855_s24  ;;  %v1284_v48 = vstv %s1682_s14 }
 0x1d2   : > { %v1285_v44 = vmul.f32 %v2579_v30, %v1284_v48  ;;  %v1286_v62 = vmul.f32 %v2565_v33, %v1284_v48 }
 0x1d3   : > { %1421 = vrot.lane.b32.xlu0 %v1417_v49, %s1855_s24  ;;  %v1103_v41 = vpop.permute.xlu1 %1102  ;;  %v1200_v9 = vpop.permute.xlu2 %1199  ;;  %s1677_s24 = sld [smem:[#allocation2 + $0x2a]] }
 0x1d4   : > { %v2677_v31 = vadd.f32 %v1103_v41, %v1047_v34 }
 0x1d5   : > { %v1101_v15 = vpop.permute.xlu0 %1100 }
 0x1d6   : > { %v2679_v6 = vadd.f32 %v1101_v15, %v1046_v42 }
 0x1db   : > { %v1129_v10 = vpop.permute.xlu1 %1128  ;;  %v1254_v16 = vpop.permute.xlu2 %1253 }
 0x1dc   : > { %v1134_v58 = vadd.f32 %v1129_v10, %v1078_v23 }
 0x1dd   : > { %v1116_v12 = vpop.permute.xlu0 %1115 }
 0x1de   : > { %v2681_v13 = vadd.f32 %v1116_v12, %v1060_v46  ;;  %v1190_v27 = vadd.f32 %v1185_v14, %v1134_v58 }
 0x1e3   : > { %v1144_v56 = vpop.permute.xlu1 %1143  ;;  %v1327_v63 = vpop.permute.xlu2 %1326 }
 0x1e4   : > { %v1148_v17 = vadd.f32 %v1144_v56, %v1092_v25 }
 0x1e5   : > { %v1142_v26 = vpop.permute.xlu0 %1141 }
 0x1e6   : > { %v1147_v52 = vadd.f32 %v1142_v26, %v1091_v24  ;;  %v1204_v18 = vadd.f32 %v1200_v9, %v1148_v17  ;;  %v1267_v24 = vstv %s1677_s24 }
 0x1e7   : > { %v1268_v48 = vmul.f32 %v1267_v24, %v2545_v60 }
 0x1eb   : > { %v1198_v39 = vpop.permute.xlu1 %1197  ;;  %v1381_v34 = vpop.permute.xlu2 %1380 }
 0x1ec   : > { %v1203_v19 = vadd.f32 %v1198_v39, %v1147_v52 }
 0x1ed   : > { %v1187_v29 = vpop.permute.xlu0 %1186 }
 0x1ee   : > { %v1191_v42 = vadd.f32 %v1187_v29, %v1135_v54  ;;  %v1259_v21 = vadd.f32 %v1254_v16, %v1203_v19  ;;  %v1274_v54 = vmul.f32 %v2565_v33, %v1272_v8 }
 0x1f0   : > { %v1287_v53 = vadd.f32 %v1285_v44, %v1259_v21 }
 0x1f3   : > { %v1243_v0 = vpop.permute.xlu1 %1242  ;;  %v1396_v3 = vpop.permute.xlu2 %1395 }
 0x1f4   : > { %v1247_v38 = vadd.f32 %v1243_v0, %v1191_v42  ;;  %v1273_v42 = vmul.f32 %v2579_v30, %v1272_v8 }
 0x1f5   : > { %v1241_v2 = vpop.permute.xlu0 %1240 }
 0x1f6   : > { %v1246_v43 = vadd.f32 %v1241_v2, %v1190_v27  ;;  %v1283_v28 = vadd.f32 %v1281_v57, %v1247_v38 }
 0x1f8   : > { %v1282_v40 = vadd.f32 %v1280_v7, %v1246_v43  ;;  %v1331_v61 = vadd.f32 %v1327_v63, %v1283_v28 }
 0x1fb   : > { %v1325_v22 = vpop.permute.xlu1 %1324  ;;  %v1170_v15 = vpop.permute.xlu2 %1169 }
 0x1fc   : > { %v1330_v46 = vadd.f32 %v1325_v22, %v1282_v40 }
 0x1fd   : > { %v1256_v32 = vpop.permute.xlu0 %1255 }
 0x1fe   : > { %v1260_v37 = vadd.f32 %v1256_v32, %v1204_v18  ;;  %v1386_v55 = vadd.f32 %v1381_v34, %v1330_v46  ;;  %v1175_v34 = vadd.f32 %v1170_v15, %v2668_v11  ;;  %v1269_v32 = vmul.f32 %v1267_v24, %v2548_v47 }
 0x200   : > { %v1288_v50 = vadd.f32 %v1286_v62, %v1260_v37 }
 0x203   : > { %v1340_v4 = vpop.permute.xlu1 %1339  ;;  %v1215_v9 = vpop.permute.xlu2 %1214 }
 0x204   : > { %v1344_v45 = vadd.f32 %v1340_v4, %v1288_v50 }
 0x205   : > { %v1338_v1 = vpop.permute.xlu0 %1337 }
 0x206   : > { %v1343_v20 = vadd.f32 %v1338_v1, %v1287_v53  ;;  %v1400_v5 = vadd.f32 %v1396_v3, %v1344_v45 }
 0x20b   : > { %v1394_v36 = vpop.permute.xlu1 %1393  ;;  %v1297_v16 = vpop.permute.xlu2 %1296 }
 0x20c   : > { %v1399_v59 = vadd.f32 %v1394_v36, %v1343_v20 }
 0x20d   : > { %v1383_v35 = vpop.permute.xlu0 %1382 }
 0x20e   : > { %v1431_v49 = vadd.f32 %v1399_v59, %v1386_v55  ;;  %v1387_v41 = vadd.f32 %v1383_v35, %v1331_v61 }
 0x210   : > { %v1432_v14 = vadd.f32 %v1400_v5, %v1387_v41  ;;  %1435 = vrot.lane.b32.xlu2 %v1431_v49, %s1857_s30 }
 0x212   : > { %1437 = vrot.lane.b32.xlu0 %v1432_v14, %s1857_s30  ;;  %s148_s30 = sand.u32 1, %s1842_s10  }
 0x213   : > { %v1159_v10 = vpop.permute.xlu1 %1158  ;;  %v1312_v63 = vpop.permute.xlu2 %1311  ;;  %s1580_s28 = sshll.u32 %s148_s30, 4  ;;  %s1485_s13 = scalar_lea.sflag [#allocation3], %s148_s30 }
 0x214   : > { %v1163_v22 = vadd.f32 %v1159_v10, %v2677_v31  ;;  %s150_s29 = scalar_lea.vmem [#allocation5], %s1580_s28 }
 0x215   : > { %v1157_v12 = vpop.permute.xlu0 %1156  ;;  %s1497_s7 = sshll.u32 %s150_s29, 4  ;;  %s1498_s7 = int_to_ptr.vmem [resolvable:$true] %s1497_s7 }
 0x216   : > { %v1162_v52 = vadd.f32 %v1157_v12, %v2679_v6  ;;  %v1219_v51 = vadd.f32 %v1215_v9, %v1163_v22 }
 0x21b   : > { %v1213_v56 = vpop.permute.xlu1 %1212  ;;  %v1366_v17 = vpop.permute.xlu2 %1365 }
 0x21c   : > { %v1218_v27 = vadd.f32 %v1213_v56, %v1162_v52 }
 0x21d   : > { %v1172_v26 = vpop.permute.xlu0 %1171 }
 0x21e   : > { %v1176_v25 = vadd.f32 %v1172_v26, %v2681_v13  ;;  %v1271_v13 = vadd.f32 %v1269_v32, %v1219_v51  ;;  %v1270_v11 = vadd.f32 %v1268_v48, %v1218_v27 }
 0x220   : > { %v1302_v38 = vadd.f32 %v1297_v16, %v1270_v11 }
 0x223   : > { %v1228_v39 = vpop.permute.xlu1 %1227  ;;  %v1411_v21 = vpop.permute.xlu2 %1410 }
 0x224   : > { %v1232_v19 = vadd.f32 %v1228_v39, %v1176_v25 }
 0x225   : > { %v1226_v29 = vpop.permute.xlu0 %1225 }
 0x226   : > { %v1231_v31 = vadd.f32 %v1226_v29, %v1175_v34  ;;  %v1276_v7 = vadd.f32 %v1274_v54, %v1232_v19 }
 0x228   : > { %v1275_v57 = vadd.f32 %v1273_v42, %v1231_v31  ;;  %v1316_v4 = vadd.f32 %v1312_v63, %v1276_v7 }
 0x22b   : > { %v1310_v0 = vpop.permute.xlu1 %1309 }
 0x22c   : > { %v1315_v44 = vadd.f32 %v1310_v0, %v1275_v57 }
 0x22d   : > { %v1299_v2 = vpop.permute.xlu0 %1298 }
 0x22e   : > { %v1303_v47 = vadd.f32 %v1299_v2, %v1271_v13  ;;  %v1371_v62 = vadd.f32 %v1366_v17, %v1315_v44 }
 0x233   : > { %v1355_v23 = vpop.permute.xlu1 %1354 }
 0x234   : > { %v1359_v6 = vadd.f32 %v1355_v23, %v1303_v47 }
 0x235   : > { %v1353_v58 = vpop.permute.xlu0 %1352 }
 0x236   : > { %v1358_v1 = vadd.f32 %v1353_v58, %v1302_v38  ;;  %v1415_v60 = vadd.f32 %v1411_v21, %v1359_v6 }
 0x23b   : > { %v1409_v43 = vpop.permute.xlu1 %1408 }
 0x23c   : > { %v1414_v3 = vadd.f32 %v1409_v43, %v1358_v1 }
 0x23d   : > { %v1368_v18 = vpop.permute.xlu0 %1367 }
 0x23e   : > { %v1372_v37 = vadd.f32 %v1368_v18, %v1316_v4 }
 0x243   : > { %v1424_v33 = vpop.permute.xlu1 %1423 }
 0x244   : > { %v1428_v40 = vadd.f32 %v1424_v33, %v1372_v37 }
 0x245   : > { %v1422_v30 = vpop.permute.xlu0 %1421 }
 0x246   : > { %v1427_v28 = vadd.f32 %v1422_v30, %v1371_v62  ;;  %v1430_v46 = vadd.f32 %v1428_v40, %v1415_v60 }
 0x248   : > { %v1429_v50 = vadd.f32 %v1427_v28, %v1414_v3 }
 0x26a   : > { %v1436_v53 = vpop.permute.xlu2 %1435 }
 0x26b   : > { %v1441_v45 = vadd.f32 %v1436_v53, %v1429_v50 }
 0x26d   : > { %v1693_v20 = vmul.f32 -1.442695, %v1441_v45 }
 0x26f   : > { %1761 = vpow2.f32 %v1693_v20 }
 0x275   : > { %v1762_v36 = vpop.eup %1761 }
 0x276   : > { %v1449_v55 = vadd.f32 1.0, %v1762_v36 }
 0x278   : > { %1763 = vrcp.f32 %v1449_v55  ;;  %v1462_v5 = vand.u32 2147483648, %v1449_v55  ;;  %v1460_v41 = vand.u32 2147483647, %v1449_v55  ;;  %vm1456_vm1 = vweird.f32 %v1449_v55 }
 0x27a   : > { %v1463_v12 = vor.u32 1.1754944e-38, %v1462_v5  ;;  %vm1461_vm4 = vcmp.eq.f32.partialorder %v1460_v41, 8.507059e+37 }
 0x27e   : > { %v1764_v59 = vpop.eup %1763 }
 0x27f   : > { %v1452_v61 = vmul.f32 %v1764_v59, %v1449_v55  ;;  %vm1457_vm0 = vweird.f32 %v1764_v59 }
 0x280   : > { %vm1458_vm2 = vmor %vm1456_vm1, %vm1457_vm0 }
 0x281   : > { %v1453_v35 = vsub.f32 1.0, %v1452_v61 }
 0x283   : > { %v1454_v49 = vmul.f32 %v1764_v59, %v1453_v35 }
 0x284   : > { %v1438_v14 = vpop.permute.xlu0 %1437 }
 0x285   : > { %v1455_v15 = vadd.f32 %v1764_v59, %v1454_v49  ;;  %v1442_v10 = vadd.f32 %v1438_v14, %v1430_v46 }
 0x287   : > { %v1694_v9 = vmul.f32 -1.442695, %v1442_v10  ;;  %v1459_v56 = vsel %vm1458_vm2, %v1764_v59, %v1455_v15 }
 0x288   : > { %v1464_v26 = vsel %vm1461_vm4, %v1463_v12, %v1459_v56 }
 0x289   : > { %1765 = vpow2.f32 %v1694_v9  ;;  %1482 = vst.msk [vmem:[%s150_s29] sm:$0xff] %vm1481_vm3, %v1464_v26 }
 0x28f   : > { %v1766_v16 = vpop.eup %1765 }
 0x290   : > { %v1450_v39 = vadd.f32 1.0, %v1766_v16 }
 0x292   : > { %1767 = vrcp.f32 %v1450_v39  ;;  %v1477_v2 = vand.u32 2147483648, %v1450_v39  ;;  %v1475_v22 = vand.u32 2147483647, %v1450_v39  ;;  %vm1471_vm6 = vweird.f32 %v1450_v39 }
 0x294   : > { %v1478_v8 = vor.u32 1.1754944e-38, %v1477_v2  ;;  %vm1476_vm8 = vcmp.eq.f32.partialorder %v1475_v22, 8.507059e+37 }
 0x298   : > { %v1768_v29 = vpop.eup %1767 }
 0x299   : > { %v1467_v0 = vmul.f32 %v1768_v29, %v1450_v39  ;;  %vm1472_vm5 = vweird.f32 %v1768_v29 }
 0x29a   : > { %vm1473_vm7 = vmor %vm1471_vm6, %vm1472_vm5 }
 0x29b   : > { %v1468_v63 = vsub.f32 1.0, %v1467_v0 }
 0x29d   : > { %v1469_v23 = vmul.f32 %v1768_v29, %v1468_v63 }
 0x29f   : > { %v1470_v24 = vadd.f32 %v1768_v29, %v1469_v23 }
 0x2a1   : > { %v1474_v58 = vsel %vm1473_vm7, %v1768_v29, %v1470_v24 }
 0x2a2   : > { %v1479_v25 = vsel %vm1476_vm8, %v1478_v8, %v1474_v58 }
 0x2a3   : > { %1483 = vst.msk [vmem:[%s150_s29 + $0x8] sm:$0xff] %vm1481_vm3, %v1479_v25 }
 0x2a4   : > { %1811 = shalt.err (!%p1808_p8)
}
 0x2a5   : > { %s1860_s14 = smov 128   ;;  %s1861_s24 = smov 8  }
 0x2a6   : > { %1706 = dma.vmem_to_hbm [thread:$0]  (%p1915_p5), %s1498_s7, 256, %s1500_s16, %s1485_s13, %s1860_s14, %s1860_s14, %s1861_s24  }
 0x2a7 PF: > { %p1718_p9 = scmp.ge.s32.totalorder %s1850_s12, 2  ;;  %s1514_s27 = sand.u32 1, %s1838_s9  }
 0x2a8   : > { %s1515_s30 = scalar_lea.sflag [#allocation3], %s1514_s27 }
 0x2a9   : > { %p1713_p10 = pnand %p1718_p9, %p1919_p6 }
 0x2ab   : > { %p1714_p11 = pneg %p1713_p10 }
 0x2ad   : > { %1833 = dma.done.wait (%p1714_p11), %s1515_s30, 256  }
 0x2ae   : > { %1835 = vsyncadd (%p1714_p11), %s1515_s30, 4294967040  ;;  %p13_p12 = scmp.ge.s32.totalorder %s1902_s15, 4   ;;  %s2744_s9 = smov %s1842_s10 }
 0x2af   : > { %s2745_s10 = smov %s1846_s11  ;;  %s2746_s11 = smov %s1913_s18 }
 0x2b0   : > { %s2747_s12 = smov %s1902_s15  ;;  %15 = sbr.rel (!%p13_p12) target bundleno = 4 (0x4), region = 69 }
 0x2b5   :  { %1521 = vsyncpa [#allocation3], 1 }
 0x2b6   :  { %1523 = vsyncpa [#allocation3 + $0x1], 1 }
 0x2b7   :  { %1524 = vsyncpa [#allocation4], 1 }
 0x2b8   :  { %1526 = vsyncpa [#allocation4 + $0x1], 1 }

</bundles_post_ra>
